<compile_context>
chip_gen: v6e
topology: v6e:2x2x1
jax: 0.10.0
libtpu: 0.0.40
codegen_flags: <defaults>
</compile_context>

<pallas_src>
import jax
import jax.numpy as jnp
from jax.experimental import pallas as pl
from jax.experimental.pallas import tpu as pltpu


# ----------------------------- fused Pallas kernel --------------------------

def _fused_simple_block_kernel(xp_ref, w1_ref, b1_ref, w2_ref, b2_ref,
                               w3_ref, b3_ref, o_ref, hpad_ref):
    # xp_ref : (1, H+2, W+2, Cin)   zero-padded input image, compute dtype
    # w1_ref : (9, Cin,  Ch)        conv1 taps, order (dy, dx)
    # b1_ref : (1, Ch)              f32
    # w2_ref : (Ch, Ch)             conv2 (1x1)
    # b2_ref : (1, Ch)              f32
    # w3_ref : (9, Ch,  Cout)       conv3 taps, order (dy, dx)
    # b3_ref : (1, Cout)            f32
    # o_ref  : (1, H*W, Cout)       f32 output rows
    # hpad_ref: VMEM (H+2, W+2, Ch) scratch — zero-padded hidden (halo for conv3)
    Hp, Wp, Cin = xp_ref.shape[1], xp_ref.shape[2], xp_ref.shape[3]
    H, W = Hp - 2, Wp - 2
    C_hid = w2_ref.shape[0]
    Cout = w3_ref.shape[-1]
    cdt = w1_ref.dtype                         # MXU input dtype (bf16 or f32)

    xp = xp_ref[0]                             # (H+2, W+2, Cin)

    # ---- conv1: 3x3 pad=1 as 9 shifted matmuls, f32 accumulation ----
    acc = jnp.zeros((H * W, C_hid), jnp.float32)
    t = 0
    for dy in range(3):
        for dx in range(3):
            patch = xp[dy:dy + H, dx:dx + W, :].reshape(H * W, Cin)
            acc = acc + jnp.dot(patch, w1_ref[t],
                                preferred_element_type=jnp.float32)
            t += 1
    h = jnp.maximum(acc + b1_ref[...], 0.0)    # (H*W, C_hid) f32

    # ---- conv2: 1x1 ----
    h = jnp.dot(h.astype(cdt), w2_ref[...], preferred_element_type=jnp.float32)
    h = jnp.maximum(h + b2_ref[...], 0.0)

    # ---- stage hidden into zero-padded VMEM tile (halo for conv3) ----
    hpad_ref[...] = jnp.zeros_like(hpad_ref)   # ring must be zero every step
    hpad_ref[1:H + 1, 1:W + 1, :] = h.reshape(H, W, C_hid).astype(hpad_ref.dtype)
    hp = hpad_ref[...]                         # (H+2, W+2, C_hid)

    # ---- conv3: 3x3 pad=1 as 9 shifted matmuls ----
    acc3 = jnp.zeros((H * W, Cout), jnp.float32)
    t = 0
    for dy in range(3):
        for dx in range(3):
            patch = hp[dy:dy + H, dx:dx + W, :].reshape(H * W, C_hid)
            acc3 = acc3 + jnp.dot(patch, w3_ref[t],
                                  preferred_element_type=jnp.float32)
            t += 1
    o_ref[0] = (acc3 + b3_ref[...]).astype(o_ref.dtype)


def fused_simple_block(xp_nhwc, w1k, b1, w2k, b2, w3k, b3):
    """xp_nhwc: (N, H+2, W+2, Cin) zero-padded input.  Returns (N, H*W, Cout) f32."""
    N, Hp, Wp, Cin = xp_nhwc.shape
    H, W = Hp - 2, Wp - 2
    C_hid = w2k.shape[0]
    Cout = w3k.shape[-1]
    return pl.pallas_call(
        _fused_simple_block_kernel,
        out_shape=jax.ShapeDtypeStruct((N, H * W, Cout), jnp.float32),
        grid_spec=pltpu.PrefetchScalarGridSpec(
            num_scalar_prefetch=0,
            grid=(N,),                                            # one image / step
            in_specs=[
                pl.BlockSpec((1, Hp, Wp, Cin), lambda n: (n, 0, 0, 0)),
                pl.BlockSpec((9, Cin, C_hid), lambda n: (0, 0, 0)),
                pl.BlockSpec((1, C_hid), lambda n: (0, 0)),
                pl.BlockSpec((C_hid, C_hid), lambda n: (0, 0)),
                pl.BlockSpec((1, C_hid), lambda n: (0, 0)),
                pl.BlockSpec((9, C_hid, Cout), lambda n: (0, 0, 0)),
                pl.BlockSpec((1, Cout), lambda n: (0, 0)),
            ],
            out_specs=pl.BlockSpec((1, H * W, Cout), lambda n: (n, 0, 0)),
            scratch_shapes=[pltpu.VMEM((Hp, Wp, C_hid), w1k.dtype)],
        ),
        compiler_params=pltpu.CompilerParams(
            dimension_semantics=("parallel",)),
    )(xp_nhwc, w1k, b1, w2k, b2, w3k, b3)


# ------------------------------- glue (JAX) ---------------------------------

def prepare_params(params, compute_dtype=jnp.bfloat16):
    """Hoisted one-time weight layout conversion: OIHW -> (kh*kw, Cin, Cout)."""
    (w1, b1), (w2, b2), (w3, b3) = params
    C_hid, Cin = w1.shape[0], w1.shape[1]
    Cout = w3.shape[0]
    w1k = jnp.transpose(w1, (2, 3, 1, 0)).reshape(9, Cin, C_hid).astype(compute_dtype)
    w2k = jnp.transpose(w2[:, :, 0, 0], (1, 0)).astype(compute_dtype)
    w3k = jnp.transpose(w3, (2, 3, 1, 0)).reshape(9, C_hid, Cout).astype(compute_dtype)
    return (w1k, b1.reshape(1, -1).astype(jnp.float32),
            w2k, b2.reshape(1, -1).astype(jnp.float32),
            w3k, b3.reshape(1, -1).astype(jnp.float32))


def simple_block_forward(x_nchw, kparams):
    """PyTorch SimpleBlock forward. x: (N, Cin, H, W) f32 -> (N, Cout, H, W) f32."""
    w1k, b1, w2k, b2, w3k, b3 = kparams
    cdt = w1k.dtype
    N, Cin, H, W = x_nchw.shape
    Cout = w3k.shape[-1]
    x = jnp.transpose(x_nchw, (0, 2, 3, 1)).astype(cdt)        # NCHW -> NHWC (once)
    xp = jnp.pad(x, ((0, 0), (1, 1), (1, 1), (0, 0)))          # spatial zero halo
    y = fused_simple_block(xp, w1k, b1, w2k, b2, w3k, b3)      # (N, H*W, Cout)
    y = y.reshape(N, H, W, Cout)
    return jnp.transpose(y, (0, 3, 1, 2))                      # NHWC -> NCHW (once)


# --------------------------- deterministic init ------------------------------

def init_params(key, in_channels, out_channels, hidden_channels):
    k1, k2, k3, k4 = jax.random.split(key, 4)
    w1 = 0.03 * jax.random.normal(k1, (hidden_channels, in_channels, 3, 3), jnp.float32)
    bnd1 = 1.0 / jnp.sqrt(in_channels * 9.0)
    b1 = jax.random.uniform(k2, (hidden_channels,), jnp.float32, -bnd1, bnd1)
    w2 = 0.03 * jax.random.normal(k3, (hidden_channels, hidden_channels, 1, 1), jnp.float32)
    bnd2 = 1.0 / jnp.sqrt(float(hidden_channels))
    b2 = jax.random.uniform(k4, (hidden_channels,), jnp.float32, -bnd2, bnd2)
    w3 = jnp.zeros((out_channels, hidden_channels, 3, 3), jnp.float32)   # GLOW zero-init
    b3 = jnp.zeros((out_channels,), jnp.float32)
    return ((w1, b1), (w2, b2), (w3, b3))


# ------------------------------ reference ------------------------------------

def ref_forward(x_nchw, params, compute_dtype=None):
    """lax.conv reference. If compute_dtype is set, quantize inputs/weights and
    inter-layer activations to it (f32 accumulation) — mirrors the kernel."""
    (w1, b1), (w2, b2), (w3, b3) = params
    q = (lambda a: a.astype(compute_dtype)) if compute_dtype is not None else (lambda a: a)

    def conv(x, w, b, pad):
        y = jax.lax.conv_general_dilated(
            q(x), q(w), window_strides=(1, 1), padding=((pad, pad), (pad, pad)),
            dimension_numbers=("NCHW", "OIHW", "NCHW"),
            preferred_element_type=jnp.float32,
            precision=jax.lax.Precision.HIGHEST)
        return y + b[None, :, None, None]

    y = jax.nn.relu(conv(x_nchw, w1, b1, 1))
    y = jax.nn.relu(conv(y, w2, b2, 0))
    return conv(y, w3, b3, 1)


# --------------------------------- main ---------------------------------------

if __name__ == "__main__":
    key = jax.random.PRNGKey(0)
    kx, kp, kw = jax.random.split(key, 3)

    N, C_in, H, W = 2, 4, 16, 16
    C_out, C_hidden = 4, 32

    x = jax.random.normal(kx, (N, C_in, H, W), jnp.float32)
    params = init_params(kp, C_in, C_out, C_hidden)

    # 1) f32 compute mode — exact module semantics (GLOW zero-init last conv).
    out = jax.block_until_ready(simple_block_forward(x, prepare_params(params, jnp.float32)))
    ref = jax.block_until_ready(ref_forward(x, params))
    assert out.shape == (N, C_out, H, W)
    assert jnp.allclose(out, ref, atol=1e-3), "f32 Pallas output mismatch vs reference"

    # 2) nonzero last-conv weights/bias — exercises the conv3 weight-layout path.
    (w1, b1), (w2, b2), _ = params
    kw1, kw2 = jax.random.split(kw)
    w3_nz = 0.03 * jax.random.normal(kw1, (C_out, C_hidden, 3, 3), jnp.float32)
    b3_nz = 0.1 * jax.random.normal(kw2, (C_out,), jnp.float32)
    params_nz = ((w1, b1), (w2, b2), (w3_nz, b3_nz))

    out_nz = jax.block_until_ready(
        simple_block_forward(x, prepare_params(params_nz, jnp.float32)))
    ref_nz = jax.block_until_ready(ref_forward(x, params_nz))
    assert jnp.allclose(out_nz, ref_nz, atol=1e-3), "nonzero-w3 f32 mismatch vs reference"

    # 3) bf16 fast path (bf16 MXU inputs, f32 accumulation).
    out_bf = jax.block_until_ready(
        simple_block_forward(x, prepare_params(params_nz, jnp.bfloat16)))
    ref_bf = jax.block_until_ready(ref_forward(x, params_nz, jnp.bfloat16))
    assert jnp.allclose(out_bf, ref_bf, atol=1e-3), \
        "bf16 Pallas output mismatch vs precision-matched reference"
    assert jnp.allclose(out_bf, ref_nz, atol=3e-2, rtol=3e-2), \
        "bf16 output too far from f32 reference"

    print("KERNEL_OK")
</pallas_src>

<mosaic_0001>
module attributes {stable_mosaic.version = 11 : i64} {
  func.func @_fused_simple_block_kernel(%arg0: i32, %arg1: memref<1x18x18x4xf32, #tpu.memory_space<vmem>>, %arg2: memref<9x4x32xf32, #tpu.memory_space<vmem>>, %arg3: memref<1x32xf32, #tpu.memory_space<vmem>>, %arg4: memref<32x32xf32, #tpu.memory_space<vmem>>, %arg5: memref<1x32xf32, #tpu.memory_space<vmem>>, %arg6: memref<9x32x4xf32, #tpu.memory_space<vmem>>, %arg7: memref<1x4xf32, #tpu.memory_space<vmem>>, %arg8: memref<1x256x4xf32, #tpu.memory_space<vmem>>, %arg9: memref<18x18x32xf32, #tpu.memory_space<vmem>>) attributes {dimension_semantics = [#tpu.dimension_semantics<parallel>], iteration_bounds = array<i64: 2>, scalar_prefetch = 0 : i64, scratch_operands = 1 : i64, tpu.core_type = #tpu.core_type<tc>, window_params = [{transform_indices = @transform_0, window_bounds = array<i64: 1, 18, 18, 4>}, {pipeline_mode = #tpu.pipeline_mode<synchronous>, transform_indices = @transform_1, window_bounds = array<i64: 9, 4, 32>}, {pipeline_mode = #tpu.pipeline_mode<synchronous>, transform_indices = @transform_2, window_bounds = array<i64: 1, 32>}, {pipeline_mode = #tpu.pipeline_mode<synchronous>, transform_indices = @transform_3, window_bounds = array<i64: 32, 32>}, {pipeline_mode = #tpu.pipeline_mode<synchronous>, transform_indices = @transform_4, window_bounds = array<i64: 1, 32>}, {pipeline_mode = #tpu.pipeline_mode<synchronous>, transform_indices = @transform_5, window_bounds = array<i64: 9, 32, 4>}, {pipeline_mode = #tpu.pipeline_mode<synchronous>, transform_indices = @transform_6, window_bounds = array<i64: 1, 4>}, {transform_indices = @transform_7, window_bounds = array<i64: 1, 256, 4>}]} {
    %c0 = arith.constant 0 : index
    %c0_0 = arith.constant 0 : index
    %c0_1 = arith.constant 0 : index
    %c0_2 = arith.constant 0 : index
    %0 = vector.load %arg1[%c0, %c0_0, %c0_1, %c0_2] : memref<1x18x18x4xf32, #tpu.memory_space<vmem>>, vector<1x18x18x4xf32>
    %1 = vector.shape_cast %0 : vector<1x18x18x4xf32> to vector<18x18x4xf32>
    %cst = arith.constant 0.000000e+00 : f32
    %2 = vector.broadcast %cst : f32 to vector<256x32xf32>
    %3 = vector.extract_strided_slice %1 {offsets = [0, 0, 0], sizes = [16, 16, 4], strides = [1, 1, 1]} : vector<18x18x4xf32> to vector<16x16x4xf32>
    %4 = vector.shape_cast %3 : vector<16x16x4xf32> to vector<256x4xf32>
    %c0_3 = arith.constant 0 : index
    %c0_4 = arith.constant 0 : index
    %c0_5 = arith.constant 0 : index
    %5 = vector.load %arg2[%c0_3, %c0_4, %c0_5] : memref<9x4x32xf32, #tpu.memory_space<vmem>>, vector<1x4x32xf32>
    %6 = vector.shape_cast %5 : vector<1x4x32xf32> to vector<4x32xf32>
    %cst_6 = arith.constant dense<0.000000e+00> : vector<256x32xf32>
    %7 = tpu.matmul %4, %6, %cst_6 {dimension_numbers = #tpu.dot_dimension_numbers<[1], [0], [0], [1], [0, 0, 1, 1], [], []>} : vector<256x4xf32>, vector<4x32xf32>, vector<256x32xf32> -> vector<256x32xf32>
    %8 = arith.addf %2, %7 : vector<256x32xf32>
    %9 = vector.extract_strided_slice %1 {offsets = [0, 1, 0], sizes = [16, 16, 4], strides = [1, 1, 1]} : vector<18x18x4xf32> to vector<16x16x4xf32>
    %10 = vector.shape_cast %9 : vector<16x16x4xf32> to vector<256x4xf32>
    %c1 = arith.constant 1 : index
    %c0_7 = arith.constant 0 : index
    %c0_8 = arith.constant 0 : index
    %11 = vector.load %arg2[%c1, %c0_7, %c0_8] : memref<9x4x32xf32, #tpu.memory_space<vmem>>, vector<1x4x32xf32>
    %12 = vector.shape_cast %11 : vector<1x4x32xf32> to vector<4x32xf32>
    %cst_9 = arith.constant dense<0.000000e+00> : vector<256x32xf32>
    %13 = tpu.matmul %10, %12, %cst_9 {dimension_numbers = #tpu.dot_dimension_numbers<[1], [0], [0], [1], [0, 0, 1, 1], [], []>} : vector<256x4xf32>, vector<4x32xf32>, vector<256x32xf32> -> vector<256x32xf32>
    %14 = arith.addf %8, %13 : vector<256x32xf32>
    %15 = vector.extract_strided_slice %1 {offsets = [0, 2, 0], sizes = [16, 16, 4], strides = [1, 1, 1]} : vector<18x18x4xf32> to vector<16x16x4xf32>
    %16 = vector.shape_cast %15 : vector<16x16x4xf32> to vector<256x4xf32>
    %c2 = arith.constant 2 : index
    %c0_10 = arith.constant 0 : index
    %c0_11 = arith.constant 0 : index
    %17 = vector.load %arg2[%c2, %c0_10, %c0_11] : memref<9x4x32xf32, #tpu.memory_space<vmem>>, vector<1x4x32xf32>
    %18 = vector.shape_cast %17 : vector<1x4x32xf32> to vector<4x32xf32>
    %cst_12 = arith.constant dense<0.000000e+00> : vector<256x32xf32>
    %19 = tpu.matmul %16, %18, %cst_12 {dimension_numbers = #tpu.dot_dimension_numbers<[1], [0], [0], [1], [0, 0, 1, 1], [], []>} : vector<256x4xf32>, vector<4x32xf32>, vector<256x32xf32> -> vector<256x32xf32>
    %20 = arith.addf %14, %19 : vector<256x32xf32>
    %21 = vector.extract_strided_slice %1 {offsets = [1, 0, 0], sizes = [16, 16, 4], strides = [1, 1, 1]} : vector<18x18x4xf32> to vector<16x16x4xf32>
    %22 = vector.shape_cast %21 : vector<16x16x4xf32> to vector<256x4xf32>
    %c3 = arith.constant 3 : index
    %c0_13 = arith.constant 0 : index
    %c0_14 = arith.constant 0 : index
    %23 = vector.load %arg2[%c3, %c0_13, %c0_14] : memref<9x4x32xf32, #tpu.memory_space<vmem>>, vector<1x4x32xf32>
    %24 = vector.shape_cast %23 : vector<1x4x32xf32> to vector<4x32xf32>
    %cst_15 = arith.constant dense<0.000000e+00> : vector<256x32xf32>
    %25 = tpu.matmul %22, %24, %cst_15 {dimension_numbers = #tpu.dot_dimension_numbers<[1], [0], [0], [1], [0, 0, 1, 1], [], []>} : vector<256x4xf32>, vector<4x32xf32>, vector<256x32xf32> -> vector<256x32xf32>
    %26 = arith.addf %20, %25 : vector<256x32xf32>
    %27 = vector.extract_strided_slice %1 {offsets = [1, 1, 0], sizes = [16, 16, 4], strides = [1, 1, 1]} : vector<18x18x4xf32> to vector<16x16x4xf32>
    %28 = vector.shape_cast %27 : vector<16x16x4xf32> to vector<256x4xf32>
    %c4 = arith.constant 4 : index
    %c0_16 = arith.constant 0 : index
    %c0_17 = arith.constant 0 : index
    %29 = vector.load %arg2[%c4, %c0_16, %c0_17] : memref<9x4x32xf32, #tpu.memory_space<vmem>>, vector<1x4x32xf32>
    %30 = vector.shape_cast %29 : vector<1x4x32xf32> to vector<4x32xf32>
    %cst_18 = arith.constant dense<0.000000e+00> : vector<256x32xf32>
    %31 = tpu.matmul %28, %30, %cst_18 {dimension_numbers = #tpu.dot_dimension_numbers<[1], [0], [0], [1], [0, 0, 1, 1], [], []>} : vector<256x4xf32>, vector<4x32xf32>, vector<256x32xf32> -> vector<256x32xf32>
    %32 = arith.addf %26, %31 : vector<256x32xf32>
    %33 = vector.extract_strided_slice %1 {offsets = [1, 2, 0], sizes = [16, 16, 4], strides = [1, 1, 1]} : vector<18x18x4xf32> to vector<16x16x4xf32>
    %34 = vector.shape_cast %33 : vector<16x16x4xf32> to vector<256x4xf32>
    %c5 = arith.constant 5 : index
    %c0_19 = arith.constant 0 : index
    %c0_20 = arith.constant 0 : index
    %35 = vector.load %arg2[%c5, %c0_19, %c0_20] : memref<9x4x32xf32, #tpu.memory_space<vmem>>, vector<1x4x32xf32>
    %36 = vector.shape_cast %35 : vector<1x4x32xf32> to vector<4x32xf32>
    %cst_21 = arith.constant dense<0.000000e+00> : vector<256x32xf32>
    %37 = tpu.matmul %34, %36, %cst_21 {dimension_numbers = #tpu.dot_dimension_numbers<[1], [0], [0], [1], [0, 0, 1, 1], [], []>} : vector<256x4xf32>, vector<4x32xf32>, vector<256x32xf32> -> vector<256x32xf32>
    %38 = arith.addf %32, %37 : vector<256x32xf32>
    %39 = vector.extract_strided_slice %1 {offsets = [2, 0, 0], sizes = [16, 16, 4], strides = [1, 1, 1]} : vector<18x18x4xf32> to vector<16x16x4xf32>
    %40 = vector.shape_cast %39 : vector<16x16x4xf32> to vector<256x4xf32>
    %c6 = arith.constant 6 : index
    %c0_22 = arith.constant 0 : index
    %c0_23 = arith.constant 0 : index
    %41 = vector.load %arg2[%c6, %c0_22, %c0_23] : memref<9x4x32xf32, #tpu.memory_space<vmem>>, vector<1x4x32xf32>
    %42 = vector.shape_cast %41 : vector<1x4x32xf32> to vector<4x32xf32>
    %cst_24 = arith.constant dense<0.000000e+00> : vector<256x32xf32>
    %43 = tpu.matmul %40, %42, %cst_24 {dimension_numbers = #tpu.dot_dimension_numbers<[1], [0], [0], [1], [0, 0, 1, 1], [], []>} : vector<256x4xf32>, vector<4x32xf32>, vector<256x32xf32> -> vector<256x32xf32>
    %44 = arith.addf %38, %43 : vector<256x32xf32>
    %45 = vector.extract_strided_slice %1 {offsets = [2, 1, 0], sizes = [16, 16, 4], strides = [1, 1, 1]} : vector<18x18x4xf32> to vector<16x16x4xf32>
    %46 = vector.shape_cast %45 : vector<16x16x4xf32> to vector<256x4xf32>
    %c7 = arith.constant 7 : index
    %c0_25 = arith.constant 0 : index
    %c0_26 = arith.constant 0 : index
    %47 = vector.load %arg2[%c7, %c0_25, %c0_26] : memref<9x4x32xf32, #tpu.memory_space<vmem>>, vector<1x4x32xf32>
    %48 = vector.shape_cast %47 : vector<1x4x32xf32> to vector<4x32xf32>
    %cst_27 = arith.constant dense<0.000000e+00> : vector<256x32xf32>
    %49 = tpu.matmul %46, %48, %cst_27 {dimension_numbers = #tpu.dot_dimension_numbers<[1], [0], [0], [1], [0, 0, 1, 1], [], []>} : vector<256x4xf32>, vector<4x32xf32>, vector<256x32xf32> -> vector<256x32xf32>
    %50 = arith.addf %44, %49 : vector<256x32xf32>
    %51 = vector.extract_strided_slice %1 {offsets = [2, 2, 0], sizes = [16, 16, 4], strides = [1, 1, 1]} : vector<18x18x4xf32> to vector<16x16x4xf32>
    %52 = vector.shape_cast %51 : vector<16x16x4xf32> to vector<256x4xf32>
    %c8 = arith.constant 8 : index
    %c0_28 = arith.constant 0 : index
    %c0_29 = arith.constant 0 : index
    %53 = vector.load %arg2[%c8, %c0_28, %c0_29] : memref<9x4x32xf32, #tpu.memory_space<vmem>>, vector<1x4x32xf32>
    %54 = vector.shape_cast %53 : vector<1x4x32xf32> to vector<4x32xf32>
    %cst_30 = arith.constant dense<0.000000e+00> : vector<256x32xf32>
    %55 = tpu.matmul %52, %54, %cst_30 {dimension_numbers = #tpu.dot_dimension_numbers<[1], [0], [0], [1], [0, 0, 1, 1], [], []>} : vector<256x4xf32>, vector<4x32xf32>, vector<256x32xf32> -> vector<256x32xf32>
    %56 = arith.addf %50, %55 : vector<256x32xf32>
    %c0_31 = arith.constant 0 : index
    %c0_32 = arith.constant 0 : index
    %57 = vector.load %arg3[%c0_31, %c0_32] : memref<1x32xf32, #tpu.memory_space<vmem>>, vector<1x32xf32>
    %58 = vector.broadcast %57 : vector<1x32xf32> to vector<256x32xf32>
    %59 = arith.addf %56, %58 : vector<256x32xf32>
    %cst_33 = arith.constant 0.000000e+00 : f32
    %60 = vector.broadcast %cst_33 : f32 to vector<256x32xf32>
    %61 = arith.maximumf %59, %60 : vector<256x32xf32>
    %c0_34 = arith.constant 0 : index
    %c0_35 = arith.constant 0 : index
    %62 = vector.load %arg4[%c0_34, %c0_35] : memref<32x32xf32, #tpu.memory_space<vmem>>, vector<32x32xf32>
    %cst_36 = arith.constant dense<0.000000e+00> : vector<256x32xf32>
    %63 = tpu.matmul %61, %62, %cst_36 {dimension_numbers = #tpu.dot_dimension_numbers<[1], [0], [0], [1], [0, 0, 1, 1], [], []>} : vector<256x32xf32>, vector<32x32xf32>, vector<256x32xf32> -> vector<256x32xf32>
    %c0_37 = arith.constant 0 : index
    %c0_38 = arith.constant 0 : index
    %64 = vector.load %arg5[%c0_37, %c0_38] : memref<1x32xf32, #tpu.memory_space<vmem>>, vector<1x32xf32>
    %65 = vector.broadcast %64 : vector<1x32xf32> to vector<256x32xf32>
    %66 = arith.addf %63, %65 : vector<256x32xf32>
    %cst_39 = arith.constant 0.000000e+00 : f32
    %67 = vector.broadcast %cst_39 : f32 to vector<256x32xf32>
    %68 = arith.maximumf %66, %67 : vector<256x32xf32>
    %cst_40 = arith.constant 0.000000e+00 : f32
    %69 = vector.broadcast %cst_40 : f32 to vector<18x18x32xf32>
    %c0_41 = arith.constant 0 : index
    %c0_42 = arith.constant 0 : index
    %c0_43 = arith.constant 0 : index
    %70 = vector.load %arg9[%c0_41, %c0_42, %c0_43] : memref<18x18x32xf32, #tpu.memory_space<vmem>>, vector<18x18x32xf32>
    tpu.vector_store %arg9[%c0_41, %c0_42, %c0_43], %69 {strides = array<i32>} : memref<18x18x32xf32, #tpu.memory_space<vmem>>, vector<18x18x32xf32>,
    %71 = vector.shape_cast %68 : vector<256x32xf32> to vector<16x16x32xf32>
    %c1_44 = arith.constant 1 : index
    %c1_45 = arith.constant 1 : index
    %c0_46 = arith.constant 0 : index
    %72 = vector.load %arg9[%c1_44, %c1_45, %c0_46] : memref<18x18x32xf32, #tpu.memory_space<vmem>>, vector<16x16x32xf32>
    tpu.vector_store %arg9[%c1_44, %c1_45, %c0_46], %71 {strides = array<i32>} : memref<18x18x32xf32, #tpu.memory_space<vmem>>, vector<16x16x32xf32>,
    %c0_47 = arith.constant 0 : index
    %c0_48 = arith.constant 0 : index
    %c0_49 = arith.constant 0 : index
    %73 = vector.load %arg9[%c0_47, %c0_48, %c0_49] : memref<18x18x32xf32, #tpu.memory_space<vmem>>, vector<18x18x32xf32>
    %cst_50 = arith.constant 0.000000e+00 : f32
    %74 = vector.broadcast %cst_50 : f32 to vector<256x4xf32>
    %75 = vector.extract_strided_slice %73 {offsets = [0, 0, 0], sizes = [16, 16, 32], strides = [1, 1, 1]} : vector<18x18x32xf32> to vector<16x16x32xf32>
    %76 = vector.shape_cast %75 : vector<16x16x32xf32> to vector<256x32xf32>
    %c0_51 = arith.constant 0 : index
    %c0_52 = arith.constant 0 : index
    %c0_53 = arith.constant 0 : index
    %77 = vector.load %arg6[%c0_51, %c0_52, %c0_53] : memref<9x32x4xf32, #tpu.memory_space<vmem>>, vector<1x32x4xf32>
    %78 = vector.shape_cast %77 : vector<1x32x4xf32> to vector<32x4xf32>
    %cst_54 = arith.constant dense<0.000000e+00> : vector<256x4xf32>
    %79 = tpu.matmul %76, %78, %cst_54 {dimension_numbers = #tpu.dot_dimension_numbers<[1], [0], [0], [1], [0, 0, 1, 1], [], []>} : vector<256x32xf32>, vector<32x4xf32>, vector<256x4xf32> -> vector<256x4xf32>
    %80 = arith.addf %74, %79 : vector<256x4xf32>
    %81 = vector.extract_strided_slice %73 {offsets = [0, 1, 0], sizes = [16, 16, 32], strides = [1, 1, 1]} : vector<18x18x32xf32> to vector<16x16x32xf32>
    %82 = vector.shape_cast %81 : vector<16x16x32xf32> to vector<256x32xf32>
    %c1_55 = arith.constant 1 : index
    %c0_56 = arith.constant 0 : index
    %c0_57 = arith.constant 0 : index
    %83 = vector.load %arg6[%c1_55, %c0_56, %c0_57] : memref<9x32x4xf32, #tpu.memory_space<vmem>>, vector<1x32x4xf32>
    %84 = vector.shape_cast %83 : vector<1x32x4xf32> to vector<32x4xf32>
    %cst_58 = arith.constant dense<0.000000e+00> : vector<256x4xf32>
    %85 = tpu.matmul %82, %84, %cst_58 {dimension_numbers = #tpu.dot_dimension_numbers<[1], [0], [0], [1], [0, 0, 1, 1], [], []>} : vector<256x32xf32>, vector<32x4xf32>, vector<256x4xf32> -> vector<256x4xf32>
    %86 = arith.addf %80, %85 : vector<256x4xf32>
    %87 = vector.extract_strided_slice %73 {offsets = [0, 2, 0], sizes = [16, 16, 32], strides = [1, 1, 1]} : vector<18x18x32xf32> to vector<16x16x32xf32>
    %88 = vector.shape_cast %87 : vector<16x16x32xf32> to vector<256x32xf32>
    %c2_59 = arith.constant 2 : index
    %c0_60 = arith.constant 0 : index
    %c0_61 = arith.constant 0 : index
    %89 = vector.load %arg6[%c2_59, %c0_60, %c0_61] : memref<9x32x4xf32, #tpu.memory_space<vmem>>, vector<1x32x4xf32>
    %90 = vector.shape_cast %89 : vector<1x32x4xf32> to vector<32x4xf32>
    %cst_62 = arith.constant dense<0.000000e+00> : vector<256x4xf32>
    %91 = tpu.matmul %88, %90, %cst_62 {dimension_numbers = #tpu.dot_dimension_numbers<[1], [0], [0], [1], [0, 0, 1, 1], [], []>} : vector<256x32xf32>, vector<32x4xf32>, vector<256x4xf32> -> vector<256x4xf32>
    %92 = arith.addf %86, %91 : vector<256x4xf32>
    %93 = vector.extract_strided_slice %73 {offsets = [1, 0, 0], sizes = [16, 16, 32], strides = [1, 1, 1]} : vector<18x18x32xf32> to vector<16x16x32xf32>
    %94 = vector.shape_cast %93 : vector<16x16x32xf32> to vector<256x32xf32>
    %c3_63 = arith.constant 3 : index
    %c0_64 = arith.constant 0 : index
    %c0_65 = arith.constant 0 : index
    %95 = vector.load %arg6[%c3_63, %c0_64, %c0_65] : memref<9x32x4xf32, #tpu.memory_space<vmem>>, vector<1x32x4xf32>
    %96 = vector.shape_cast %95 : vector<1x32x4xf32> to vector<32x4xf32>
    %cst_66 = arith.constant dense<0.000000e+00> : vector<256x4xf32>
    %97 = tpu.matmul %94, %96, %cst_66 {dimension_numbers = #tpu.dot_dimension_numbers<[1], [0], [0], [1], [0, 0, 1, 1], [], []>} : vector<256x32xf32>, vector<32x4xf32>, vector<256x4xf32> -> vector<256x4xf32>
    %98 = arith.addf %92, %97 : vector<256x4xf32>
    %99 = vector.extract_strided_slice %73 {offsets = [1, 1, 0], sizes = [16, 16, 32], strides = [1, 1, 1]} : vector<18x18x32xf32> to vector<16x16x32xf32>
    %100 = vector.shape_cast %99 : vector<16x16x32xf32> to vector<256x32xf32>
    %c4_67 = arith.constant 4 : index
    %c0_68 = arith.constant 0 : index
    %c0_69 = arith.constant 0 : index
    %101 = vector.load %arg6[%c4_67, %c0_68, %c0_69] : memref<9x32x4xf32, #tpu.memory_space<vmem>>, vector<1x32x4xf32>
    %102 = vector.shape_cast %101 : vector<1x32x4xf32> to vector<32x4xf32>
    %cst_70 = arith.constant dense<0.000000e+00> : vector<256x4xf32>
    %103 = tpu.matmul %100, %102, %cst_70 {dimension_numbers = #tpu.dot_dimension_numbers<[1], [0], [0], [1], [0, 0, 1, 1], [], []>} : vector<256x32xf32>, vector<32x4xf32>, vector<256x4xf32> -> vector<256x4xf32>
    %104 = arith.addf %98, %103 : vector<256x4xf32>
    %105 = vector.extract_strided_slice %73 {offsets = [1, 2, 0], sizes = [16, 16, 32], strides = [1, 1, 1]} : vector<18x18x32xf32> to vector<16x16x32xf32>
    %106 = vector.shape_cast %105 : vector<16x16x32xf32> to vector<256x32xf32>
    %c5_71 = arith.constant 5 : index
    %c0_72 = arith.constant 0 : index
    %c0_73 = arith.constant 0 : index
    %107 = vector.load %arg6[%c5_71, %c0_72, %c0_73] : memref<9x32x4xf32, #tpu.memory_space<vmem>>, vector<1x32x4xf32>
    %108 = vector.shape_cast %107 : vector<1x32x4xf32> to vector<32x4xf32>
    %cst_74 = arith.constant dense<0.000000e+00> : vector<256x4xf32>
    %109 = tpu.matmul %106, %108, %cst_74 {dimension_numbers = #tpu.dot_dimension_numbers<[1], [0], [0], [1], [0, 0, 1, 1], [], []>} : vector<256x32xf32>, vector<32x4xf32>, vector<256x4xf32> -> vector<256x4xf32>
    %110 = arith.addf %104, %109 : vector<256x4xf32>
    %111 = vector.extract_strided_slice %73 {offsets = [2, 0, 0], sizes = [16, 16, 32], strides = [1, 1, 1]} : vector<18x18x32xf32> to vector<16x16x32xf32>
    %112 = vector.shape_cast %111 : vector<16x16x32xf32> to vector<256x32xf32>
    %c6_75 = arith.constant 6 : index
    %c0_76 = arith.constant 0 : index
    %c0_77 = arith.constant 0 : index
    %113 = vector.load %arg6[%c6_75, %c0_76, %c0_77] : memref<9x32x4xf32, #tpu.memory_space<vmem>>, vector<1x32x4xf32>
    %114 = vector.shape_cast %113 : vector<1x32x4xf32> to vector<32x4xf32>
    %cst_78 = arith.constant dense<0.000000e+00> : vector<256x4xf32>
    %115 = tpu.matmul %112, %114, %cst_78 {dimension_numbers = #tpu.dot_dimension_numbers<[1], [0], [0], [1], [0, 0, 1, 1], [], []>} : vector<256x32xf32>, vector<32x4xf32>, vector<256x4xf32> -> vector<256x4xf32>
    %116 = arith.addf %110, %115 : vector<256x4xf32>
    %117 = vector.extract_strided_slice %73 {offsets = [2, 1, 0], sizes = [16, 16, 32], strides = [1, 1, 1]} : vector<18x18x32xf32> to vector<16x16x32xf32>
    %118 = vector.shape_cast %117 : vector<16x16x32xf32> to vector<256x32xf32>
    %c7_79 = arith.constant 7 : index
    %c0_80 = arith.constant 0 : index
    %c0_81 = arith.constant 0 : index
    %119 = vector.load %arg6[%c7_79, %c0_80, %c0_81] : memref<9x32x4xf32, #tpu.memory_space<vmem>>, vector<1x32x4xf32>
    %120 = vector.shape_cast %119 : vector<1x32x4xf32> to vector<32x4xf32>
    %cst_82 = arith.constant dense<0.000000e+00> : vector<256x4xf32>
    %121 = tpu.matmul %118, %120, %cst_82 {dimension_numbers = #tpu.dot_dimension_numbers<[1], [0], [0], [1], [0, 0, 1, 1], [], []>} : vector<256x32xf32>, vector<32x4xf32>, vector<256x4xf32> -> vector<256x4xf32>
    %122 = arith.addf %116, %121 : vector<256x4xf32>
    %123 = vector.extract_strided_slice %73 {offsets = [2, 2, 0], sizes = [16, 16, 32], strides = [1, 1, 1]} : vector<18x18x32xf32> to vector<16x16x32xf32>
    %124 = vector.shape_cast %123 : vector<16x16x32xf32> to vector<256x32xf32>
    %c8_83 = arith.constant 8 : index
    %c0_84 = arith.constant 0 : index
    %c0_85 = arith.constant 0 : index
    %125 = vector.load %arg6[%c8_83, %c0_84, %c0_85] : memref<9x32x4xf32, #tpu.memory_space<vmem>>, vector<1x32x4xf32>
    %126 = vector.shape_cast %125 : vector<1x32x4xf32> to vector<32x4xf32>
    %cst_86 = arith.constant dense<0.000000e+00> : vector<256x4xf32>
    %127 = tpu.matmul %124, %126, %cst_86 {dimension_numbers = #tpu.dot_dimension_numbers<[1], [0], [0], [1], [0, 0, 1, 1], [], []>} : vector<256x32xf32>, vector<32x4xf32>, vector<256x4xf32> -> vector<256x4xf32>
    %128 = arith.addf %122, %127 : vector<256x4xf32>
    %c0_87 = arith.constant 0 : index
    %c0_88 = arith.constant 0 : index
    %129 = vector.load %arg7[%c0_87, %c0_88] : memref<1x4xf32, #tpu.memory_space<vmem>>, vector<1x4xf32>
    %130 = vector.broadcast %129 : vector<1x4xf32> to vector<256x4xf32>
    %131 = arith.addf %128, %130 : vector<256x4xf32>
    %c0_89 = arith.constant 0 : index
    %c0_90 = arith.constant 0 : index
    %c0_91 = arith.constant 0 : index
    %132 = vector.load %arg8[%c0_89, %c0_90, %c0_91] : memref<1x256x4xf32, #tpu.memory_space<vmem>>, vector<1x256x4xf32>
    %133 = vector.shape_cast %132 : vector<1x256x4xf32> to vector<256x4xf32>
    %134 = vector.shape_cast %131 : vector<256x4xf32> to vector<1x256x4xf32>
    tpu.vector_store %arg8[%c0_89, %c0_90, %c0_91], %134 {strides = array<i32>} : memref<1x256x4xf32, #tpu.memory_space<vmem>>, vector<1x256x4xf32>,
    return
  }
  func.func @transform_0(%arg0: i32) -> (i32, i32, i32, i32) {
    %c0_i32 = arith.constant 0 : i32
    %c0_i32_0 = arith.constant 0 : i32
    %c0_i32_1 = arith.constant 0 : i32
    %c0_i32_2 = arith.constant 0 : i32
    return %arg0, %c0_i32, %c0_i32_0, %c0_i32_1 : i32, i32, i32, i32
  }
  func.func @transform_1(%arg0: i32) -> (i32, i32, i32) {
    %c0_i32 = arith.constant 0 : i32
    %c0_i32_0 = arith.constant 0 : i32
    %c0_i32_1 = arith.constant 0 : i32
    %c0_i32_2 = arith.constant 0 : i32
    return %c0_i32, %c0_i32_0, %c0_i32_1 : i32, i32, i32
  }
  func.func @transform_2(%arg0: i32) -> (i32, i32) {
    %c0_i32 = arith.constant 0 : i32
    %c0_i32_0 = arith.constant 0 : i32
    %c0_i32_1 = arith.constant 0 : i32
    return %c0_i32, %c0_i32_0 : i32, i32
  }
  func.func @transform_3(%arg0: i32) -> (i32, i32) {
    %c0_i32 = arith.constant 0 : i32
    %c0_i32_0 = arith.constant 0 : i32
    %c0_i32_1 = arith.constant 0 : i32
    return %c0_i32, %c0_i32_0 : i32, i32
  }
  func.func @transform_4(%arg0: i32) -> (i32, i32) {
    %c0_i32 = arith.constant 0 : i32
    %c0_i32_0 = arith.constant 0 : i32
    %c0_i32_1 = arith.constant 0 : i32
    return %c0_i32, %c0_i32_0 : i32, i32
  }
  func.func @transform_5(%arg0: i32) -> (i32, i32, i32) {
    %c0_i32 = arith.constant 0 : i32
    %c0_i32_0 = arith.constant 0 : i32
    %c0_i32_1 = arith.constant 0 : i32
    %c0_i32_2 = arith.constant 0 : i32
    return %c0_i32, %c0_i32_0, %c0_i32_1 : i32, i32, i32
  }
  func.func @transform_6(%arg0: i32) -> (i32, i32) {
    %c0_i32 = arith.constant 0 : i32
    %c0_i32_0 = arith.constant 0 : i32
    %c0_i32_1 = arith.constant 0 : i32
    return %c0_i32, %c0_i32_0 : i32, i32
  }
  func.func @transform_7(%arg0: i32) -> (i32, i32, i32) {
    %c0_i32 = arith.constant 0 : i32
    %c0_i32_0 = arith.constant 0 : i32
    %c0_i32_1 = arith.constant 0 : i32
    return %arg0, %c0_i32, %c0_i32_0 : i32, i32, i32
  }
}

</mosaic_0001>

<bundles_post_ra>
// kernel: tpu_custom_call.1
= control target key start
LH: loop header
LB: loop body
LE: loop exit
PB: predicated region body
PF: predicated region fallthrough
CT: control target
= control target key end

     0   :  { %s8933_s24 = smov 0   ;;  %s12555_s0 = inlined_call_operand.vmem [shape: f32[2,18,18,4], index: 0, kind: input, shape index: {}]   ;;  %s12556_s1 = inlined_call_operand.vmem [shape: f32[9,4,32], index: 1, kind: input, shape index: {}]   ;;  %s12557_s2 = inlined_call_operand.vmem [shape: f32[1,32], index: 2, kind: input, shape index: {}]   ;;  %s12558_s3 = inlined_call_operand.vmem [shape: f32[32,32], index: 3, kind: input, shape index: {}]   ;;  %s12559_s4 = inlined_call_operand.vmem [shape: f32[1,32], index: 4, kind: input, shape index: {}]   ;;  %s12560_s5 = inlined_call_operand.vmem [shape: f32[9,32,4], index: 5, kind: input, shape index: {}]   ;;  %s12561_s6 = inlined_call_operand.vmem [shape: f32[1,4], index: 6, kind: input, shape index: {}]   ;;  %s12562_s7 = inlined_call_operand.vmem [shape: f32[2,256,4], index: 7, kind: output, shape index: {}]  }
   0x1 LB: > { %s6527_s25 = sadd.s32 4294967295, %s8890_s24   ;;  %p6531_p0 = scmp.ge.s32.totalorder %s8890_s24, 1  ;;  %s8890_s24 = sphi %s8933_s24, %s17_s24  }
   0x2   : > { %p237_p1 = scmp.lt.s32.totalorder %s8890_s24, 3 }
   0x4   : > { %p238_p2 = pnand %p6531_p0, %p237_p1 }
   0x6   : > { %241 = sbr.rel (%p238_p2) target bundleno = 1175 (0x497), region = 48 }
   0xb   : > { %v6535_v0 = vld [vmem:[%s12556_s1 + $0x4] sm:$0xf]  ;;  %vm530_vm0 = vcmask 1043456   ;;  %p269_p3 = scmp.lt.s32.totalorder %s6527_s25, 1  ;;  %v333_v1 = vld [vmem:[%s12556_s1] sm:$0xf] }
   0xc   : > { %8865 = vmatprep.subr.msk.mxu1 %vm530_vm0, %v6535_v0  ;;  %7855 = vmatprep.subr.msk.mxu0 %vm530_vm0, %v6535_v0  ;;  %v6602_v2 = vld [vmem:[%s12556_s1 + $0x8] sm:$0xf]  ;;  %vm382_vm1 = vcmask 1046528   ;;  %vm465_vm2 = vcmask 31744   ;;  %v9005_v21 = vld [vmem:[%s12556_s1 + $0xc] sm:$0xf] }
   0xd   : > { %8866 = vmatpush3.msk.msra.mxu1 %vm530_vm0, %v6535_v0  ;;  %7856 = vmatpush3.msk.msra.mxu0 %vm530_vm0, %v6535_v0  ;;  %s13213_s25 = smov (!%p269_p3, %s6527_s25), 1  ;;  %v9023_v28 = vld [vmem:[%s12556_s1 + $0x10] sm:$0xf]  ;;  %vm1051_vm3 = vcmask 1045504   ;;  %vm3162_vm4 = vcmask 261120   ;;  %vm3518_vm5 = vcmask 254976  }
   0xe   : > { %7905 = vmatprep.subr.msk.mxu1 %vm530_vm0, %v333_v1  ;;  %7955 = vmatprep.subr.msk.mxu0 %vm530_vm0, %v6602_v2  ;;  %s8867_s9 = smul.u32 432, %s13213_s25  ;;  %s7197_s27 = sshll.u32 %s13213_s25, 8 }
   0xf   : > { %s12339_s8 = scalar_lea.vmem %s12562_s7, %s7197_s27 }
  0x10   : > { %s8962_s12 = scalar_lea.vmem %s12555_s0, %s8867_s9 }
  0x11   : > { %v8965_v3 = vld [vmem:[%s8962_s12] sm:$0xff]  ;;  %v8968_v4 = vld [vmem:[%s8962_s12 + $0x8] sm:$0xff]  ;;  %v8980_v10 = vld [vmem:[%s8962_s12 + $0x10] sm:$0x3] }
  0x12   : > { %v8971_v5 = vld [vmem:[%s8962_s12 + $0xc0] sm:$0xff]  ;;  %v383_v6 = vrot.slane %v8965_v3, 1  ;;  %v384_v7 = vrot.slane %v8968_v4, 1  ;;  %v8976_v8 = vld [vmem:[%s8962_s12 + $0xc8] sm:$0xff]  ;;  %v386_v12 = vrot.slane %v8980_v10, 1  ;;  %v8988_v14 = vld [vmem:[%s8962_s12 + $0x18] sm:$0xff] }
  0x13   : > { %v423_v9 = vrot.slane %v8971_v5, 1  ;;  %v424_v11 = vrot.slane %v8976_v8, 1  ;;  %v8985_v13 = vld [vmem:[%s8962_s12 + $0xd0] sm:$0x3]  ;;  %v8993_v17 = vld [vmem:[%s8962_s12 + $0x20] sm:$0xff]  ;;  %v388_v18 = vrot.slane %v8988_v14, 1 }
  0x14   : > { %v385_v15 = vsel %vm382_vm1, %v383_v6, %v384_v7  ;;  %v426_v16 = vrot.slane %v8985_v13, 1  ;;  %v8997_v19 = vld [vmem:[%s8962_s12 + $0xd8] sm:$0xff]  ;;  %v9000_v20 = vld [vmem:[%s8962_s12 + $0xe0] sm:$0xff]  ;;  %v387_v23 = vsel %vm382_vm1, %v384_v7, %v386_v12  ;;  %v389_v24 = vrot.slane %v8993_v17, 1  ;;  %v9015_v26 = vld [vmem:[%s8962_s12 + $0x28] sm:$0x3] }
  0x15   : > { %7857 = vmatprep.mubr.msk.f32.mxu0 %vm465_vm2, %v385_v15  ;;  %v9009_v22 = vsel %vm382_vm1, %v423_v9, %v424_v11  ;;  %v428_v25 = vrot.slane %v8997_v19, 1  ;;  %v9018_v27 = vld [vmem:[%s8962_s12 + $0xe8] sm:$0x3]  ;;  %v429_v30 = vrot.slane %v9000_v20, 1  ;;  %v391_v31 = vrot.slane %v9015_v26, 1  ;;  %v9035_v33 = vld [vmem:[%s8962_s12 + $0x30] sm:$0xff] }
  0x16   : > { %12716 = vst [vmem:[#allocation3_spill] sm:$0xff] %v9009_v22  ;;  %7881 = vmatprep.mubr.msk.f32.mxu1 %vm465_vm2, %v9009_v22  ;;  %7858 = vmatmul.mubr.msk.f32.vlgmr.msra.gmra.mxu0 %vm465_vm2, %v387_v23  ;;  %v9029_v29 = vsel %vm382_vm1, %v424_v11, %v426_v16  ;;  %v431_v32 = vrot.slane %v9018_v27, 1  ;;  %v9038_v34 = vld [vmem:[%s8962_s12 + $0x38] sm:$0xff]  ;;  %v9041_v35 = vld [vmem:[%s8962_s12 + $0xf0] sm:$0xff]  ;;  %v9047_v36 = vsel %vm382_vm1, %v388_v18, %v389_v24  ;;  %v393_v37 = vrot.slane %v9035_v33, 1  ;;  %v9075_v47 = vld [vmem:[%s8962_s12 + $0x48] sm:$0xff] }
  0x17   : > { %12717 = vst [vmem:[#allocation4_spill] sm:$0xff] %v9029_v29  ;;  %7882 = vmatmul.mubr.msk.f32.vlgmr.msra.gmra.mxu1 %vm465_vm2, %v9029_v29  ;;  %7956 = vmatpush3.msk.msra.mxu0 %vm530_vm0, %v6602_v2  ;;  %12718 = vst [vmem:[#allocation5_spill] sm:$0xff] %v9047_v36  ;;  %v394_v38 = vrot.slane %v9038_v34, 1  ;;  %v9052_v39 = vld [vmem:[%s8962_s12 + $0xf8] sm:$0xff]  ;;  %v433_v40 = vrot.slane %v9041_v35, 1  ;;  %v9062_v42 = vsel %vm382_vm1, %v428_v25, %v429_v30  ;;  %v9078_v48 = vld [vmem:[%s8962_s12 + $0x50] sm:$0xff] }
  0x18   : > { %v9056_v41 = vld [vmem:[%s8962_s12 + $0x40] sm:$0x3]  ;;  %7906 = vmatpush3.msk.msra.mxu1 %vm530_vm0, %v333_v1  ;;  %7860 = vmatprep.mubr.msk.f32.mxu0 %vm465_vm2, %v9047_v36  ;;  %12719 = vst [vmem:[#allocation6_spill] sm:$0xff] %v9062_v42  ;;  %v9065_v43 = vsel %vm382_vm1, %v389_v24, %v391_v31  ;;  %v9068_v44 = vsel %vm382_vm1, %v429_v30, %v431_v32  ;;  %v434_v45 = vrot.slane %v9052_v39, 1  ;;  %v398_v52 = vrot.slane %v9075_v47, 1  ;;  %v9089_v53 = vld [vmem:[%s8962_s12 + $0x108] sm:$0xff] }
  0x19   : > { %12720 = vst [vmem:[#allocation7_spill] sm:$0xff] %v9065_v43  ;;  %12721 = vst [vmem:[#allocation8_spill] sm:$0xff] %v9068_v44  ;;  %v9072_v46 = vld [vmem:[%s8962_s12 + $0x100] sm:$0x3]  ;;  %7884 = vmatprep.mubr.msk.f32.mxu1 %vm465_vm2, %v9062_v42  ;;  %v9083_v49 = vsel %vm382_vm1, %v393_v37, %v394_v38  ;;  %v396_v50 = vrot.slane %v9056_v41, 1  ;;  %v9092_v54 = vld [vmem:[%s8962_s12 + $0x110] sm:$0xff]  ;;  %8005 = vmatprep.subr.msk.mxu1 %vm530_vm0, %v9005_v21 }
  0x1a   : > { %12722 = vst [vmem:[#allocation9_spill] sm:$0xff] %v9083_v49  ;;  %v436_v51 = vrot.slane %v9072_v46, 1  ;;  %v9095_v55 = vld [vmem:[%s8962_s12 + $0x60] sm:$0xff]  ;;  %7861 = vmatmul.mubr.msk.f32.gmra.mxu0 %vm465_vm2, %v9065_v43  ;;  %v9102_v56 = vsel %vm382_vm1, %v433_v40, %v434_v45  ;;  %v399_v57 = vrot.slane %v9078_v48, 1  ;;  %v438_v58 = vrot.slane %v9089_v53, 1  ;;  %v9111_v61 = vld [vmem:[%s8962_s12 + $0x68] sm:$0xff]  ;;  %8055 = vmatprep.subr.msk.mxu0 %vm530_vm0, %v9023_v28 }
  0x1b   : > { %12723 = vst [vmem:[#allocation10_spill] sm:$0xff] %v9102_v56  ;;  %v439_v59 = vrot.slane %v9092_v54, 1  ;;  %v9108_v60 = vld [vmem:[%s8962_s12 + $0x58] sm:$0x3]  ;;  %7885 = vmatmul.mubr.msk.f32.gmra.mxu1 %vm465_vm2, %v9068_v44  ;;  %7863 = vmatprep.mubr.msk.f32.mxu0 %vm465_vm2, %v9083_v49  ;;  %v9120_v62 = vsel %vm382_vm1, %v394_v38, %v396_v50  ;;  %v403_v1 = vrot.slane %v9095_v55, 1  ;;  %v9128_v2 = vld [vmem:[%s8962_s12 + $0x120] sm:$0xff] }
  0x1c   : > { %12724 = vst [vmem:[#allocation11_spill] sm:$0xff] %v9120_v62  ;;  %v401_v63 = vrot.slane %v9108_v60, 1  ;;  %v9124_v0 = vld [vmem:[%s8962_s12 + $0x118] sm:$0x3]  ;;  %v9131_v6 = vld [vmem:[%s8962_s12 + $0x128] sm:$0xff]  ;;  %7887 = vmatprep.mubr.msk.f32.mxu1 %vm465_vm2, %v9102_v56  ;;  %v9136_v7 = vsel %vm382_vm1, %v434_v45, %v436_v51  ;;  %v9139_v9 = vsel %vm382_vm1, %v398_v52, %v399_v57  ;;  %v404_v12 = vrot.slane %v9111_v61, 1 }
  0x1d   : > { %12725 = vst [vmem:[#allocation12_spill] sm:$0xff] %v9136_v7  ;;  %12726 = vst [vmem:[#allocation13_spill] sm:$0xff] %v9139_v9  ;;  %v441_v11 = vrot.slane %v9124_v0, 1  ;;  %v9144_v15 = vld [vmem:[%s8962_s12 + $0x70] sm:$0x3]  ;;  %v9150_v18 = vsel %vm382_vm1, %v438_v58, %v439_v59  ;;  %v443_v23 = vrot.slane %v9128_v2, 1 }
  0x1e   : > { %v9147_v16 = vld [vmem:[%s8962_s12 + $0x130] sm:$0x3]  ;;  %12727 = vst [vmem:[#allocation14_spill] sm:$0xff] %v9150_v18  ;;  %v444_v24 = vrot.slane %v9131_v6, 1  ;;  %v9155_v25 = vld [vmem:[%s8962_s12 + $0x78] sm:$0xff]  ;;  %v9158_v30 = vld [vmem:[%s8962_s12 + $0x80] sm:$0xff]  ;;  %7864 = vmatmul.mubr.msk.f32.gmra.mxu0 %vm465_vm2, %v9120_v62  ;;  %v9173_v37 = vsel %vm382_vm1, %v399_v57, %v401_v63  ;;  %v9183_v50 = vsel %vm382_vm1, %v403_v1, %v404_v12 }
  0x1f   : > { %v9163_v31 = vld [vmem:[%s8962_s12 + $0x138] sm:$0xff]  ;;  %v9166_v32 = vld [vmem:[%s8962_s12 + $0x140] sm:$0xff]  ;;  %7888 = vmatmul.mubr.msk.f32.gmra.mxu1 %vm465_vm2, %v9136_v7  ;;  %7866 = vmatprep.mubr.msk.f32.mxu0 %vm465_vm2, %v9139_v9  ;;  %12728 = vst [vmem:[#allocation15_spill] sm:$0xff] %v9173_v37  ;;  %v406_v38 = vrot.slane %v9144_v15, 1  ;;  %v446_v40 = vrot.slane %v9147_v16, 1  ;;  %v9180_v45 = vsel %vm382_vm1, %v439_v59, %v441_v11  ;;  %12730 = vst [vmem:[#allocation17_spill] sm:$0xff] %v9183_v50 }
  0x20   : > { %7890 = vmatprep.mubr.msk.f32.mxu1 %vm465_vm2, %v9150_v18  ;;  %12729 = vst [vmem:[#allocation16_spill] sm:$0xff] %v9180_v45  ;;  %v408_v51 = vrot.slane %v9155_v25, 1  ;;  %v409_v52 = vrot.slane %v9158_v30, 1  ;;  %v9188_v57 = vld [vmem:[%s8962_s12 + $0x88] sm:$0x3]  ;;  %v9194_v63 = vsel %vm382_vm1, %v443_v23, %v444_v24  ;;  %v448_v7 = vrot.slane %v9163_v31, 1 }
  0x21   : > { %v9191_v58 = vld [vmem:[%s8962_s12 + $0x148] sm:$0x3]  ;;  %12731 = vst [vmem:[#allocation18_spill] sm:$0xff] %v9194_v63  ;;  %v449_v18 = vrot.slane %v9166_v32, 1  ;;  %v9199_v59 = vld [vmem:[%s8962_s12 + $0x90] sm:$0xff]  ;;  %v9202_v1 = vld [vmem:[%s8962_s12 + $0x98] sm:$0xff]  ;;  %v9217_v23 = vsel %vm382_vm1, %v404_v12, %v406_v38  ;;  %v9224_v29 = vsel %vm382_vm1, %v444_v24, %v446_v40 }
  0x22   : > { %7867 = vmatmul.mubr.msk.f32.gmra.mxu0 %vm465_vm2, %v9173_v37  ;;  %v9207_v11 = vld [vmem:[%s8962_s12 + $0x150] sm:$0xff]  ;;  %v9210_v56 = vld [vmem:[%s8962_s12 + $0x158] sm:$0xff]  ;;  %12733 = vst [vmem:[#allocation20_spill] sm:$0xff] %v9217_v23  ;;  %v411_v44 = vrot.slane %v9188_v57, 1  ;;  %v451_v42 = vrot.slane %v9191_v58, 1  ;;  %12734 = vst [vmem:[#allocation21_spill] sm:$0xff] %v9224_v29 }
  0x23   : > { %12732 = vst [vmem:[#allocation19_spill] sm:$0xff] %v9210_v56  ;;  %7891 = vmatmul.mubr.msk.f32.gmra.mxu1 %vm465_vm2, %v9180_v45  ;;  %7869 = vmatprep.mubr.msk.f32.mxu0 %vm465_vm2, %v9183_v50  ;;  %v9227_v45 = vsel %vm382_vm1, %v408_v51, %v409_v52  ;;  %v413_v22 = vrot.slane %v9199_v59, 1  ;;  %v414_v12 = vrot.slane %v9202_v1, 1  ;;  %v9232_v38 = vld [vmem:[%s8962_s12 + $0xa0] sm:$0x3]  ;;  %v9235_v50 = vsel %vm382_vm1, %v448_v7, %v449_v18  ;;  %v9243_v24 = vld [vmem:[%s8962_s12 + $0xa8] sm:$0xff] }
  0x24   : > { %7893 = vmatprep.mubr.msk.f32.mxu1 %vm465_vm2, %v9194_v63  ;;  %12735 = vst [vmem:[#allocation22_spill] sm:$0xff] %v9227_v45  ;;  %12736 = vst [vmem:[#allocation23_spill] sm:$0xff] %v9235_v50  ;;  %v453_v37 = vrot.slane %v9207_v11, 1  ;;  %v454_v9 = vrot.slane %v9210_v56, 1  ;;  %v9240_v63 = vld [vmem:[%s8962_s12 + $0x160] sm:$0x3]  ;;  %v9261_v7 = vsel %vm382_vm1, %v409_v52, %v411_v44  ;;  %v9264_v49 = vsel %vm382_vm1, %v449_v18, %v451_v42 }
  0x25   : > { %v9246_v40 = vld [vmem:[%s8962_s12 + $0xb0] sm:$0xff]  ;;  %v9251_v51 = vld [vmem:[%s8962_s12 + $0x168] sm:$0xff]  ;;  %12738 = vst [vmem:[#allocation25_spill] sm:$0xff] %v9261_v7  ;;  %12739 = vst [vmem:[#allocation26_spill] sm:$0xff] %v9264_v49  ;;  %v416_v43 = vrot.slane %v9232_v38, 1  ;;  %v456_v36 = vrot.slane %v9240_v63, 1 }
  0x26   : > { %7870 = vmatmul.mubr.msk.f32.gmra.mxu0 %vm465_vm2, %v9217_v23  ;;  %v9254_v62 = vld [vmem:[%s8962_s12 + $0x170] sm:$0xff]  ;;  %v9270_v23 = vsel %vm382_vm1, %v413_v22, %v414_v12  ;;  %v9276_v56 = vld [vmem:[%s8962_s12 + $0xb8] sm:$0x3]  ;;  %v9279_v44 = vsel %vm382_vm1, %v453_v37, %v454_v9  ;;  %v458_v42 = vrot.slane %v9251_v51, 1 }
  0x27   : > { %12737 = vst [vmem:[#allocation24_spill] sm:$0xff] %v9254_v62  ;;  %7894 = vmatmul.mubr.msk.f32.gmra.mxu1 %vm465_vm2, %v9224_v29  ;;  %7872 = vmatprep.mubr.msk.f32.mxu0 %vm465_vm2, %v9227_v45  ;;  %12740 = vst [vmem:[#allocation27_spill] sm:$0xff] %v9270_v23  ;;  %v418_v29 = vrot.slane %v9243_v24, 1  ;;  %v419_v45 = vrot.slane %v9246_v40, 1  ;;  %v459_v18 = vrot.slane %v9254_v62, 1  ;;  %v9293_v22 = vsel %vm382_vm1, %v414_v12, %v416_v43 }
  0x28   : > { %7896 = vmatprep.mubr.msk.f32.mxu1 %vm465_vm2, %v9235_v50  ;;  %12741 = vst [vmem:[#allocation28_spill] sm:$0xff] %v9279_v44  ;;  %v9284_v52 = vld [vmem:[%s8962_s12 + $0x178] sm:$0x3]  ;;  %12742 = vst [vmem:[#allocation29_spill] sm:$0xff] %v9293_v22  ;;  %v421_v37 = vrot.slane %v9276_v56, 1  ;;  %v1052_v50 = vrot.slane %v8965_v3, 2  ;;  %v9300_v62 = vsel %vm382_vm1, %v454_v9, %v456_v36 }
  0x29   : > { %12743 = vst [vmem:[#allocation30_spill] sm:$0xff] %v9300_v62  ;;  %v9308_v43 = vsel %vm382_vm1, %v458_v42, %v459_v18  ;;  %v1055_v12 = vrot.slane %v8980_v10, 2  ;;  %v1057_v10 = vrot.slane %v8988_v14, 2  ;;  %v1058_v42 = vrot.slane %v8993_v17, 2 }
  0x2a   : > { %7873 = vmatmul.mubr.msk.f32.gmra.mxu0 %vm465_vm2, %v9261_v7  ;;  %v9303_v7 = vsel %vm382_vm1, %v418_v29, %v419_v45  ;;  %v9318_v29 = vsel %vm382_vm1, %v419_v45, %v421_v37  ;;  %v1060_v37 = vrot.slane %v9015_v26, 2  ;;  %v1065_v26 = vrot.slane %v9056_v41, 2 }
  0x2b   : > { %7897 = vmatmul.mubr.msk.f32.gmra.mxu1 %vm465_vm2, %v9264_v49  ;;  %7875 = vmatprep.mubr.msk.f32.mxu0 %vm465_vm2, %v9270_v23  ;;  %12744 = vst [vmem:[#allocation31_spill] sm:$0xff] %v9303_v7  ;;  %v461_v49 = vrot.slane %v9284_v52, 1  ;;  %v1053_v23 = vrot.slane %v8968_v4, 2  ;;  %12745 = vst [vmem:[#allocation32_spill] sm:$0xff] %v9318_v29  ;;  %v1070_v41 = vrot.slane %v9108_v60, 2 }
  0x2c   : > { %7899 = vmatprep.mubr.msk.f32.mxu1 %vm465_vm2, %v9279_v44 }
  0x2d   : > { %v9323_v36 = vsel %vm382_vm1, %v459_v18, %v461_v49  ;;  %v1054_v9 = vsel %vm1051_vm3, %v1052_v50, %v1053_v23  ;;  %v1056_v45 = vsel %vm1051_vm3, %v1053_v23, %v1055_v12  ;;  %v1062_v49 = vrot.slane %v9035_v33, 2  ;;  %v9359_v23 = vld [vmem:[%s12556_s1 + $0x18] sm:$0xf] }
  0x2e   : > { %7876 = vmatmul.mubr.msk.f32.gmra.mxu0 %vm465_vm2, %v9293_v22  ;;  %v1063_v50 = vrot.slane %v9038_v34, 2  ;;  %v9341_v18 = vsel %vm1051_vm3, %v1057_v10, %v1058_v42  ;;  %v1068_v12 = vrot.slane %v9078_v48, 2 }
  0x2f   : > { %7900 = vmatmul.mubr.msk.f32.gmra.mxu1 %vm465_vm2, %v9300_v62  ;;  %7878 = vmatprep.mubr.msk.f32.mxu0 %vm465_vm2, %v9303_v7 }
  0x30   : > { %7902 = vmatprep.mubr.msk.f32.mxu1 %vm465_vm2, %v9308_v43  ;;  %v9400_v60 = vsel %vm1051_vm3, %v1068_v12, %v1070_v41  ;;  %v1082_v41 = vrot.slane %v9199_v59, 2 }
  0x32   : > { %7879 = vmatmul.mubr.msk.f32.gmra.mxu0 %vm465_vm2, %v9318_v29 }
  0x33   : > { %7903 = vmatmul.mubr.msk.f32.gmra.mxu1 %vm465_vm2, %v9323_v36  ;;  %7957 = vmatprep.mubr.msk.f32.mxu0 %vm465_vm2, %v1054_v9  ;;  %v9346_v9 = vld [vmem:[%s12556_s1 + $0x14] sm:$0xf] }
  0x34   : > { %7907 = vmatprep.mubr.msk.f32.mxu1 %vm465_vm2, %v8965_v3  ;;  %v9353_v3 = vsel %vm1051_vm3, %v1058_v42, %v1060_v37  ;;  %v1072_v42 = vrot.slane %v9095_v55, 2  ;;  %v1075_v37 = vrot.slane %v9144_v15, 2 }
  0x36   : > { %7958 = vmatmul.mubr.msk.f32.vlgmr.msra.gmra.mxu0 %vm465_vm2, %v1056_v45  ;;  %v1073_v45 = vrot.slane %v9111_v61, 2 }
  0x37   : > { %7908 = vmatmul.mubr.msk.f32.vlgmr.msra.gmra.mxu1 %vm465_vm2, %v8968_v4  ;;  %8056 = vmatpush3.msk.msra.mxu0 %vm530_vm0, %v9023_v28  ;;  %v9366_v4 = vsel %vm1051_vm3, %v1062_v49, %v1063_v50  ;;  %v1067_v28 = vrot.slane %v9075_v47, 2 }
  0x38   : > { %8006 = vmatpush3.msk.msra.mxu1 %vm530_vm0, %v9005_v21  ;;  %7910 = vmatprep.mubr.msk.f32.mxu1 %vm465_vm2, %v8988_v14  ;;  %v9383_v21 = vsel %vm1051_vm3, %v1063_v50, %v1065_v26  ;;  %v9406_v49 = vsel %vm1051_vm3, %v1072_v42, %v1073_v45  ;;  %v1077_v50 = vrot.slane %v9155_v25, 2  ;;  %v1078_v26 = vrot.slane %v9158_v30, 2 }
  0x39   : > { %7960 = vmatprep.mubr.msk.f32.mxu0 %vm465_vm2, %v9341_v18  ;;  %8105 = vmatprep.subr.msk.mxu1 %vm530_vm0, %v9346_v9  ;;  %v9389_v10 = vsel %vm1051_vm3, %v1067_v28, %v1068_v12  ;;  %v9417_v15 = vsel %vm1051_vm3, %v1073_v45, %v1075_v37  ;;  %v1080_v28 = vrot.slane %v9188_v57, 2  ;;  %v1083_v42 = vrot.slane %v9202_v1, 2 }
  0x3a   : > { %7961 = vmatmul.mubr.msk.f32.gmra.mxu0 %vm465_vm2, %v9353_v3  ;;  %8155 = vmatprep.subr.msk.mxu0 %vm530_vm0, %v9359_v23  ;;  %12746 = vst [vmem:[#allocation33_spill] sm:$0xff] %v9417_v15  ;;  %v9423_v12 = vsel %vm1051_vm3, %v1077_v50, %v1078_v26  ;;  %v1085_v45 = vrot.slane %v9232_v38, 2  ;;  %v1087_v50 = vrot.slane %v9243_v24, 2 }
  0x3b   : > { %7911 = vmatmul.mubr.msk.f32.gmra.mxu1 %vm465_vm2, %v8993_v17  ;;  %7963 = vmatprep.mubr.msk.f32.mxu0 %vm465_vm2, %v9366_v4  ;;  %v9434_v57 = vsel %vm1051_vm3, %v1078_v26, %v1080_v28  ;;  %v9440_v37 = vsel %vm1051_vm3, %v1082_v41, %v1083_v42  ;;  %v1090_v26 = vrot.slane %v9276_v56, 2  ;;  %v1092_v41 = vrot.slane %v8971_v5, 2 }
  0x3c   : > { %7913 = vmatprep.mubr.msk.f32.mxu1 %vm465_vm2, %v9035_v33  ;;  %12747 = vst [vmem:[#allocation34_spill] sm:$0xff] %v9434_v57  ;;  %v9451_v38 = vsel %vm1051_vm3, %v1083_v42, %v1085_v45  ;;  %v1095_v42 = vrot.slane %v8985_v13, 2 }
  0x3d   : > { %12748 = vst [vmem:[#allocation35_spill] sm:$0xff] %v9451_v38 }
  0x3e   : > { %7964 = vmatmul.mubr.msk.f32.gmra.mxu0 %vm465_vm2, %v9383_v21 }
  0x3f   : > { %7914 = vmatmul.mubr.msk.f32.gmra.mxu1 %vm465_vm2, %v9038_v34  ;;  %7966 = vmatprep.mubr.msk.f32.mxu0 %vm465_vm2, %v9389_v10 }
  0x40   : > { %7916 = vmatprep.mubr.msk.f32.mxu1 %vm465_vm2, %v9075_v47 }
  0x42   : > { %7967 = vmatmul.mubr.msk.f32.gmra.mxu0 %vm465_vm2, %v9400_v60 }
  0x43   : > { %7917 = vmatmul.mubr.msk.f32.gmra.mxu1 %vm465_vm2, %v9078_v48  ;;  %7969 = vmatprep.mubr.msk.f32.mxu0 %vm465_vm2, %v9406_v49 }
  0x44   : > { %7919 = vmatprep.mubr.msk.f32.mxu1 %vm465_vm2, %v9095_v55 }
  0x46   : > { %7970 = vmatmul.mubr.msk.f32.gmra.mxu0 %vm465_vm2, %v9417_v15  ;;  %v1088_v15 = vrot.slane %v9246_v40, 2 }
  0x47   : > { %7920 = vmatmul.mubr.msk.f32.gmra.mxu1 %vm465_vm2, %v9111_v61  ;;  %7972 = vmatprep.mubr.msk.f32.mxu0 %vm465_vm2, %v9423_v12 }
  0x48   : > { %7922 = vmatprep.mubr.msk.f32.mxu1 %vm465_vm2, %v9155_v25  ;;  %v9457_v28 = vsel %vm1051_vm3, %v1087_v50, %v1088_v15  ;;  %v9468_v56 = vsel %vm1051_vm3, %v1088_v15, %v1090_v26  ;;  %v1097_v50 = vrot.slane %v8997_v19, 2  ;;  %v1100_v15 = vrot.slane %v9018_v27, 2 }
  0x49   : > { %12749 = vst [vmem:[#allocation36_spill] sm:$0xff] %v9468_v56 }
  0x4a   : > { %7973 = vmatmul.mubr.msk.f32.gmra.mxu0 %vm465_vm2, %v9434_v57  ;;  %v1093_v57 = vrot.slane %v8976_v8, 2 }
  0x4b   : > { %7923 = vmatmul.mubr.msk.f32.gmra.mxu1 %vm465_vm2, %v9158_v30  ;;  %7975 = vmatprep.mubr.msk.f32.mxu0 %vm465_vm2, %v9440_v37 }
  0x4c   : > { %7925 = vmatprep.mubr.msk.f32.mxu1 %vm465_vm2, %v9199_v59  ;;  %v9474_v45 = vsel %vm1051_vm3, %v1092_v41, %v1093_v57  ;;  %v9485_v13 = vsel %vm1051_vm3, %v1093_v57, %v1095_v42  ;;  %v1102_v41 = vrot.slane %v9041_v35, 2  ;;  %v1105_v57 = vrot.slane %v9072_v46, 2 }
  0x4d   : > { %12750 = vst [vmem:[#allocation37_spill] sm:$0xff] %v9485_v13 }
  0x4e   : > { %7976 = vmatmul.mubr.msk.f32.gmra.mxu0 %vm465_vm2, %v9451_v38  ;;  %v1098_v38 = vrot.slane %v9000_v20, 2 }
  0x4f   : > { %7926 = vmatmul.mubr.msk.f32.gmra.mxu1 %vm465_vm2, %v9202_v1  ;;  %7978 = vmatprep.mubr.msk.f32.mxu0 %vm465_vm2, %v9457_v28 }
  0x50   : > { %7928 = vmatprep.mubr.msk.f32.mxu1 %vm465_vm2, %v9243_v24  ;;  %v9491_v26 = vsel %vm1051_vm3, %v1097_v50, %v1098_v38  ;;  %v9502_v27 = vsel %vm1051_vm3, %v1098_v38, %v1100_v15  ;;  %v1107_v50 = vrot.slane %v9089_v53, 2  ;;  %v1110_v38 = vrot.slane %v9124_v0, 2 }
  0x51   : > { %12751 = vst [vmem:[#allocation38_spill] sm:$0xff] %v9502_v27 }
  0x52   : > { %7979 = vmatmul.mubr.msk.f32.gmra.mxu0 %vm465_vm2, %v9468_v56  ;;  %v1103_v56 = vrot.slane %v9052_v39, 2 }
  0x53   : > { %7929 = vmatmul.mubr.msk.f32.gmra.mxu1 %vm465_vm2, %v9246_v40  ;;  %7981 = vmatprep.mubr.msk.f32.mxu0 %vm465_vm2, %v9474_v45 }
  0x54   : > { %7931 = vmatprep.mubr.msk.f32.mxu1 %vm465_vm2, %v8971_v5  ;;  %v9508_v42 = vsel %vm1051_vm3, %v1102_v41, %v1103_v56  ;;  %v9519_v46 = vsel %vm1051_vm3, %v1103_v56, %v1105_v57  ;;  %v1112_v41 = vrot.slane %v9128_v2, 2  ;;  %v1115_v56 = vrot.slane %v9147_v16, 2 }
  0x55   : > { %12752 = vst [vmem:[#allocation39_spill] sm:$0xff] %v9519_v46 }
  0x56   : > { %7982 = vmatmul.mubr.msk.f32.gmra.mxu0 %vm465_vm2, %v9485_v13  ;;  %v1108_v13 = vrot.slane %v9092_v54, 2 }
  0x57   : > { %7932 = vmatmul.mubr.msk.f32.gmra.mxu1 %vm465_vm2, %v8976_v8  ;;  %7984 = vmatprep.mubr.msk.f32.mxu0 %vm465_vm2, %v9491_v26 }
  0x58   : > { %7934 = vmatprep.mubr.msk.f32.mxu1 %vm465_vm2, %v8997_v19  ;;  %v9525_v15 = vsel %vm1051_vm3, %v1107_v50, %v1108_v13  ;;  %v9536_v0 = vsel %vm1051_vm3, %v1108_v13, %v1110_v38  ;;  %v1117_v50 = vrot.slane %v9163_v31, 2  ;;  %v1120_v13 = vrot.slane %v9191_v58, 2 }
  0x59   : > { %12753 = vst [vmem:[#allocation40_spill] sm:$0xff] %v9525_v15  ;;  %12754 = vst [vmem:[#allocation41_spill] sm:$0xff] %v9536_v0 }
  0x5a   : > { %7985 = vmatmul.mubr.msk.f32.gmra.mxu0 %vm465_vm2, %v9502_v27  ;;  %v1113_v27 = vrot.slane %v9131_v6, 2 }
  0x5b   : > { %7935 = vmatmul.mubr.msk.f32.gmra.mxu1 %vm465_vm2, %v9000_v20  ;;  %7987 = vmatprep.mubr.msk.f32.mxu0 %vm465_vm2, %v9508_v42 }
  0x5c   : > { %7937 = vmatprep.mubr.msk.f32.mxu1 %vm465_vm2, %v9041_v35  ;;  %v9542_v57 = vsel %vm1051_vm3, %v1112_v41, %v1113_v27  ;;  %v9553_v16 = vsel %vm1051_vm3, %v1113_v27, %v1115_v56  ;;  %v1122_v41 = vrot.slane %v9207_v11, 2  ;;  %v1125_v27 = vrot.slane %v9240_v63, 2 }
  0x5d   : > { %12755 = vst [vmem:[#allocation42_spill] sm:$0xff] %v9542_v57  ;;  %12756 = vst [vmem:[#allocation43_spill] sm:$0xff] %v9553_v16 }
  0x5e   : > { %7988 = vmatmul.mubr.msk.f32.gmra.mxu0 %vm465_vm2, %v9519_v46  ;;  %v1118_v46 = vrot.slane %v9166_v32, 2 }
  0x5f   : > { %7938 = vmatmul.mubr.msk.f32.gmra.mxu1 %vm465_vm2, %v9052_v39  ;;  %7990 = vmatprep.mubr.msk.f32.mxu0 %vm465_vm2, %v9525_v15 }
  0x60   : > { %7940 = vmatprep.mubr.msk.f32.mxu1 %vm465_vm2, %v9089_v53  ;;  %v9559_v38 = vsel %vm1051_vm3, %v1117_v50, %v1118_v46  ;;  %v9570_v58 = vsel %vm1051_vm3, %v1118_v46, %v1120_v13  ;;  %v1127_v50 = vrot.slane %v9251_v51, 2  ;;  %v1130_v46 = vrot.slane %v9284_v52, 2  ;;  %v12759_v52 = vld [vmem:[#allocation5_spill] sm:$0xff] }
  0x62   : > { %7991 = vmatmul.mubr.msk.f32.gmra.mxu0 %vm465_vm2, %v9536_v0  ;;  %v12757_v0 = vld [vmem:[#allocation19_spill] sm:$0xff] }
  0x63   : > { %7941 = vmatmul.mubr.msk.f32.gmra.mxu1 %vm465_vm2, %v9092_v54  ;;  %7993 = vmatprep.mubr.msk.f32.mxu0 %vm465_vm2, %v9542_v57  ;;  %v1123_v15 = vrot.slane %v12757_v0, 2 }
  0x64   : > { %7943 = vmatprep.mubr.msk.f32.mxu1 %vm465_vm2, %v9128_v2 }
  0x65   : > { %v9576_v56 = vsel %vm1051_vm3, %v1122_v41, %v1123_v15  ;;  %v9587_v63 = vsel %vm1051_vm3, %v1123_v15, %v1125_v27  ;;  %v12760_v41 = vld [vmem:[#allocation7_spill] sm:$0xff]  ;;  %v9628_v27 = vld [vmem:[%s12556_s1 + $0x20] sm:$0xf] }
  0x66   : > { %7994 = vmatmul.mubr.msk.f32.gmra.mxu0 %vm465_vm2, %v9553_v16  ;;  %v12758_v16 = vld [vmem:[#allocation24_spill] sm:$0xff] }
  0x67   : > { %7944 = vmatmul.mubr.msk.f32.gmra.mxu1 %vm465_vm2, %v9131_v6  ;;  %7996 = vmatprep.mubr.msk.f32.mxu0 %vm465_vm2, %v9559_v38  ;;  %v1128_v57 = vrot.slane %v12758_v16, 2 }
  0x68   : > { %7946 = vmatprep.mubr.msk.f32.mxu1 %vm465_vm2, %v9163_v31 }
  0x69   : > { %v9593_v13 = vsel %vm1051_vm3, %v1127_v50, %v1128_v57  ;;  %v9602_v15 = vsel %vm1051_vm3, %v1128_v57, %v1130_v46  ;;  %v9619_v57 = vld [vmem:[%s12556_s1 + $0x1c] sm:$0xf]  ;;  %v12765_v50 = vld [vmem:[#allocation17_spill] sm:$0xff] }
  0x6a   : > { %7997 = vmatmul.mubr.msk.f32.gmra.mxu0 %vm465_vm2, %v9570_v58  ;;  %v12766_v46 = vld [vmem:[#allocation20_spill] sm:$0xff] }
  0x6b   : > { %7947 = vmatmul.mubr.msk.f32.gmra.mxu1 %vm465_vm2, %v9166_v32  ;;  %7999 = vmatprep.mubr.msk.f32.mxu0 %vm465_vm2, %v9576_v56 }
  0x6c   : > { %7949 = vmatprep.mubr.msk.f32.mxu1 %vm465_vm2, %v9207_v11 }
  0x6e   : > { %8000 = vmatmul.mubr.msk.f32.gmra.mxu0 %vm465_vm2, %v9587_v63 }
  0x6f   : > { %7950 = vmatmul.mubr.msk.f32.gmra.mxu1 %vm465_vm2, %v12757_v0  ;;  %8002 = vmatprep.mubr.msk.f32.mxu0 %vm465_vm2, %v9593_v13 }
  0x70   : > { %7952 = vmatprep.mubr.msk.f32.mxu1 %vm465_vm2, %v9251_v51 }
  0x72   : > { %8003 = vmatmul.mubr.msk.f32.gmra.mxu0 %vm465_vm2, %v9602_v15 }
  0x73   : > { %7953 = vmatmul.mubr.msk.f32.gmra.mxu1 %vm465_vm2, %v12758_v16  ;;  %8057 = vmatprep.mubr.msk.f32.mxu0 %vm465_vm2, %v12759_v52  ;;  %v12767_v52 = vld [vmem:[#allocation22_spill] sm:$0xff] }
  0x74   : > { %8007 = vmatprep.mubr.msk.f32.mxu1 %vm465_vm2, %v8988_v14  ;;  %v12761_v14 = vld [vmem:[#allocation9_spill] sm:$0xff] }
  0x76   : > { %8058 = vmatmul.mubr.msk.f32.vlgmr.msra.gmra.mxu0 %vm465_vm2, %v12760_v41  ;;  %v12768_v41 = vld [vmem:[#allocation25_spill] sm:$0xff] }
  0x77   : > { %8008 = vmatmul.mubr.msk.f32.vlgmr.msra.gmra.mxu1 %vm465_vm2, %v8993_v17  ;;  %8156 = vmatpush3.msk.msra.mxu0 %vm530_vm0, %v9359_v23  ;;  %v12762_v17 = vld [vmem:[#allocation11_spill] sm:$0xff]  ;;  %v12763_v23 = vld [vmem:[#allocation13_spill] sm:$0xff] }
  0x78   : > { %8106 = vmatpush3.msk.msra.mxu1 %vm530_vm0, %v9346_v9  ;;  %8010 = vmatprep.mubr.msk.f32.mxu1 %vm465_vm2, %v9035_v33  ;;  %v12764_v9 = vld [vmem:[#allocation15_spill] sm:$0xff] }
  0x79   : > { %8060 = vmatprep.mubr.msk.f32.mxu0 %vm465_vm2, %v12761_v14  ;;  %8205 = vmatprep.subr.msk.mxu1 %vm530_vm0, %v9619_v57 }
  0x7a   : > { %8061 = vmatmul.mubr.msk.f32.gmra.mxu0 %vm465_vm2, %v12762_v17  ;;  %8255 = vmatprep.subr.msk.mxu0 %vm530_vm0, %v9628_v27 }
  0x7b   : > { %8011 = vmatmul.mubr.msk.f32.gmra.mxu1 %vm465_vm2, %v9038_v34  ;;  %8063 = vmatprep.mubr.msk.f32.mxu0 %vm465_vm2, %v12763_v23 }
  0x7c   : > { %8013 = vmatprep.mubr.msk.f32.mxu1 %vm465_vm2, %v9075_v47 }
  0x7e   : > { %8064 = vmatmul.mubr.msk.f32.gmra.mxu0 %vm465_vm2, %v12764_v9 }
  0x7f   : > { %8014 = vmatmul.mubr.msk.f32.gmra.mxu1 %vm465_vm2, %v9078_v48  ;;  %8066 = vmatprep.mubr.msk.f32.mxu0 %vm465_vm2, %v12765_v50  ;;  %v12769_v50 = vld [vmem:[#allocation27_spill] sm:$0xff] }
  0x80   : > { %8016 = vmatprep.mubr.msk.f32.mxu1 %vm465_vm2, %v9095_v55 }
  0x82   : > { %8067 = vmatmul.mubr.msk.f32.gmra.mxu0 %vm465_vm2, %v12766_v46 }
  0x83   : > { %8017 = vmatmul.mubr.msk.f32.gmra.mxu1 %vm465_vm2, %v9111_v61  ;;  %8069 = vmatprep.mubr.msk.f32.mxu0 %vm465_vm2, %v12767_v52  ;;  %v9745_v52 = vld [vmem:[%s8962_s12 + $0x190] sm:$0x3] }
  0x84   : > { %8019 = vmatprep.mubr.msk.f32.mxu1 %vm465_vm2, %v9155_v25 }
  0x86   : > { %8070 = vmatmul.mubr.msk.f32.gmra.mxu0 %vm465_vm2, %v12768_v41  ;;  %v9732_v41 = vld [vmem:[%s8962_s12 + $0x188] sm:$0xff] }
  0x87   : > { %8020 = vmatmul.mubr.msk.f32.gmra.mxu1 %vm465_vm2, %v9158_v30  ;;  %8072 = vmatprep.mubr.msk.f32.mxu0 %vm465_vm2, %v12769_v50  ;;  %v12770_v50 = vld [vmem:[#allocation3_spill] sm:$0xff] }
  0x88   : > { %8022 = vmatprep.mubr.msk.f32.mxu1 %vm465_vm2, %v9199_v59 }
  0x8a   : > { %8073 = vmatmul.mubr.msk.f32.gmra.mxu0 %vm465_vm2, %v9293_v22  ;;  %v12771_v22 = vld [vmem:[#allocation4_spill] sm:$0xff] }
  0x8b   : > { %8023 = vmatmul.mubr.msk.f32.gmra.mxu1 %vm465_vm2, %v9202_v1  ;;  %8075 = vmatprep.mubr.msk.f32.mxu0 %vm465_vm2, %v9303_v7  ;;  %v12772_v7 = vld [vmem:[#allocation6_spill] sm:$0xff] }
  0x8c   : > { %8025 = vmatprep.mubr.msk.f32.mxu1 %vm465_vm2, %v9243_v24 }
  0x8e   : > { %8076 = vmatmul.mubr.msk.f32.gmra.mxu0 %vm465_vm2, %v9318_v29  ;;  %v12773_v29 = vld [vmem:[#allocation8_spill] sm:$0xff] }
  0x8f   : > { %8026 = vmatmul.mubr.msk.f32.gmra.mxu1 %vm465_vm2, %v9246_v40  ;;  %8078 = vmatprep.mubr.msk.f32.mxu0 %vm465_vm2, %v12770_v50  ;;  %v12774_v50 = vld [vmem:[#allocation10_spill] sm:$0xff] }
  0x90   : > { %8028 = vmatprep.mubr.msk.f32.mxu1 %vm465_vm2, %v8971_v5 }
  0x92   : > { %8079 = vmatmul.mubr.msk.f32.gmra.mxu0 %vm465_vm2, %v12771_v22  ;;  %v12775_v22 = vld [vmem:[#allocation12_spill] sm:$0xff] }
  0x93   : > { %8029 = vmatmul.mubr.msk.f32.gmra.mxu1 %vm465_vm2, %v8976_v8  ;;  %8081 = vmatprep.mubr.msk.f32.mxu0 %vm465_vm2, %v12772_v7  ;;  %v12776_v7 = vld [vmem:[#allocation14_spill] sm:$0xff] }
  0x94   : > { %8031 = vmatprep.mubr.msk.f32.mxu1 %vm465_vm2, %v8997_v19 }
  0x96   : > { %8082 = vmatmul.mubr.msk.f32.gmra.mxu0 %vm465_vm2, %v12773_v29  ;;  %v12777_v29 = vld [vmem:[#allocation16_spill] sm:$0xff] }
  0x97   : > { %8032 = vmatmul.mubr.msk.f32.gmra.mxu1 %vm465_vm2, %v9000_v20  ;;  %8084 = vmatprep.mubr.msk.f32.mxu0 %vm465_vm2, %v12774_v50  ;;  %v12778_v50 = vld [vmem:[#allocation18_spill] sm:$0xff] }
  0x98   : > { %8034 = vmatprep.mubr.msk.f32.mxu1 %vm465_vm2, %v9041_v35 }
  0x9a   : > { %8085 = vmatmul.mubr.msk.f32.gmra.mxu0 %vm465_vm2, %v12775_v22  ;;  %v12779_v22 = vld [vmem:[#allocation21_spill] sm:$0xff] }
  0x9b   : > { %8035 = vmatmul.mubr.msk.f32.gmra.mxu1 %vm465_vm2, %v9052_v39  ;;  %8087 = vmatprep.mubr.msk.f32.mxu0 %vm465_vm2, %v12776_v7  ;;  %v12780_v7 = vld [vmem:[#allocation23_spill] sm:$0xff] }
  0x9c   : > { %8037 = vmatprep.mubr.msk.f32.mxu1 %vm465_vm2, %v9089_v53 }
  0x9e   : > { %8088 = vmatmul.mubr.msk.f32.gmra.mxu0 %vm465_vm2, %v12777_v29  ;;  %v9729_v29 = vld [vmem:[%s8962_s12 + $0x180] sm:$0xff] }
  0x9f   : > { %8038 = vmatmul.mubr.msk.f32.gmra.mxu1 %vm465_vm2, %v9092_v54  ;;  %8090 = vmatprep.mubr.msk.f32.mxu0 %vm465_vm2, %v12778_v50  ;;  %v12781_v50 = vld [vmem:[#allocation26_spill] sm:$0xff] }
  0xa0   : > { %8040 = vmatprep.mubr.msk.f32.mxu1 %vm465_vm2, %v9128_v2 }
  0xa2   : > { %8091 = vmatmul.mubr.msk.f32.gmra.mxu0 %vm465_vm2, %v12779_v22  ;;  %v1728_v22 = vrot.slane %v9732_v41, 1 }
  0xa3   : > { %8041 = vmatmul.mubr.msk.f32.gmra.mxu1 %vm465_vm2, %v9131_v6  ;;  %8093 = vmatprep.mubr.msk.f32.mxu0 %vm465_vm2, %v12780_v7  ;;  %v1727_v7 = vrot.slane %v9729_v29, 1 }
  0xa4   : > { %8043 = vmatprep.mubr.msk.f32.mxu1 %vm465_vm2, %v9163_v31 }
  0xa6   : > { %8094 = vmatmul.mubr.msk.f32.gmra.mxu0 %vm465_vm2, %v12781_v50  ;;  %v9757_v50 = vsel %vm382_vm1, %v1727_v7, %v1728_v22 }
  0xa7   : > { %8044 = vmatmul.mubr.msk.f32.gmra.mxu1 %vm465_vm2, %v9166_v32  ;;  %8096 = vmatprep.mubr.msk.f32.mxu0 %vm465_vm2, %v9279_v44  ;;  %v1730_v44 = vrot.slane %v9745_v52, 1  ;;  %12782 = vst [vmem:[#allocation19_spill] sm:$0xff] %v9757_v50 }
  0xa8   : > { %8046 = vmatprep.mubr.msk.f32.mxu1 %vm465_vm2, %v9207_v11 }
  0xaa   : > { %8097 = vmatmul.mubr.msk.f32.gmra.mxu0 %vm465_vm2, %v9300_v62  ;;  %v9766_v62 = vsel %vm382_vm1, %v1728_v22, %v1730_v44  ;;  %v12797_v22 = vld [vmem:[#allocation43_spill] sm:$0xff] }
  0xab   : > { %8047 = vmatmul.mubr.msk.f32.gmra.mxu1 %vm465_vm2, %v12757_v0  ;;  %8099 = vmatprep.mubr.msk.f32.mxu0 %vm465_vm2, %v9308_v43  ;;  %12783 = vst [vmem:[#allocation24_spill] sm:$0xff] %v9766_v62 }
  0xac   : > { %8049 = vmatprep.mubr.msk.f32.mxu1 %vm465_vm2, %v9251_v51 }
  0xae   : > { %8100 = vmatmul.mubr.msk.f32.gmra.mxu0 %vm465_vm2, %v9323_v36 }
  0xaf   : > { %8050 = vmatmul.mubr.msk.f32.gmra.mxu1 %vm465_vm2, %v12758_v16  ;;  %8102 = vmatprep.mubr.msk.f32.mxu0 %vm465_vm2, %v9757_v50  ;;  %v9962_v50 = vld [vmem:[%s8962_s12 + $0x1a0] sm:$0xff] }
  0xb0   : > { %8052 = vmatprep.mubr.msk.f32.mxu1 %vm465_vm2, %v9729_v29 }
  0xb2   : > { %8103 = vmatmul.mubr.msk.f32.gmra.mxu0 %vm465_vm2, %v9766_v62 }
  0xb3   : > { %8053 = vmatmul.mubr.msk.f32.gmra.mxu1 %vm465_vm2, %v9732_v41  ;;  %8157 = vmatprep.mubr.msk.f32.mxu0 %vm465_vm2, %v9035_v33  ;;  %v12784_v33 = vld [vmem:[#allocation33_spill] sm:$0xff] }
  0xb4   : > { %8107 = vmatprep.mubr.msk.f32.mxu1 %vm465_vm2, %v9341_v18 }
  0xb6   : > { %8158 = vmatmul.mubr.msk.f32.vlgmr.msra.gmra.mxu0 %vm465_vm2, %v9038_v34  ;;  %v12785_v34 = vld [vmem:[#allocation34_spill] sm:$0xff] }
  0xb7   : > { %8108 = vmatmul.mubr.msk.f32.vlgmr.msra.gmra.mxu1 %vm465_vm2, %v9353_v3  ;;  %8256 = vmatpush3.msk.msra.mxu0 %vm530_vm0, %v9628_v27 }
  0xb8   : > { %8206 = vmatpush3.msk.msra.mxu1 %vm530_vm0, %v9619_v57  ;;  %8110 = vmatprep.mubr.msk.f32.mxu1 %vm465_vm2, %v9366_v4  ;;  %v1998_v57 = vrot.slane %v9729_v29, 2 }
  0xb9   : > { %8160 = vmatprep.mubr.msk.f32.mxu0 %vm465_vm2, %v9075_v47  ;;  %v12786_v47 = vld [vmem:[#allocation35_spill] sm:$0xff] }
  0xba   : > { %8161 = vmatmul.mubr.msk.f32.gmra.mxu0 %vm465_vm2, %v9078_v48  ;;  %v12787_v48 = vld [vmem:[#allocation36_spill] sm:$0xff] }
  0xbb   : > { %8111 = vmatmul.mubr.msk.f32.gmra.mxu1 %vm465_vm2, %v9383_v21  ;;  %8163 = vmatprep.mubr.msk.f32.mxu0 %vm465_vm2, %v9095_v55  ;;  %v12788_v55 = vld [vmem:[#allocation37_spill] sm:$0xff] }
  0xbc   : > { %8113 = vmatprep.mubr.msk.f32.mxu1 %vm465_vm2, %v9389_v10 }
  0xbe   : > { %8164 = vmatmul.mubr.msk.f32.gmra.mxu0 %vm465_vm2, %v9111_v61 }
  0xbf   : > { %8114 = vmatmul.mubr.msk.f32.gmra.mxu1 %vm465_vm2, %v9400_v60  ;;  %8166 = vmatprep.mubr.msk.f32.mxu0 %vm465_vm2, %v9155_v25  ;;  %v12791_v25 = vld [vmem:[#allocation39_spill] sm:$0xff] }
  0xc0   : > { %8116 = vmatprep.mubr.msk.f32.mxu1 %vm465_vm2, %v9406_v49 }
  0xc2   : > { %8167 = vmatmul.mubr.msk.f32.gmra.mxu0 %vm465_vm2, %v9158_v30  ;;  %v12792_v30 = vld [vmem:[#allocation40_spill] sm:$0xff] }
  0xc3   : > { %8117 = vmatmul.mubr.msk.f32.gmra.mxu1 %vm465_vm2, %v12784_v33  ;;  %8169 = vmatprep.mubr.msk.f32.mxu0 %vm465_vm2, %v9199_v59 }
  0xc4   : > { %8119 = vmatprep.mubr.msk.f32.mxu1 %vm465_vm2, %v9423_v12 }
  0xc6   : > { %8170 = vmatmul.mubr.msk.f32.gmra.mxu0 %vm465_vm2, %v9202_v1 }
  0xc7   : > { %8120 = vmatmul.mubr.msk.f32.gmra.mxu1 %vm465_vm2, %v12785_v34  ;;  %8172 = vmatprep.mubr.msk.f32.mxu0 %vm465_vm2, %v9243_v24  ;;  %v12794_v24 = vld [vmem:[#allocation41_spill] sm:$0xff] }
  0xc8   : > { %8122 = vmatprep.mubr.msk.f32.mxu1 %vm465_vm2, %v9440_v37 }
  0xca   : > { %8173 = vmatmul.mubr.msk.f32.gmra.mxu0 %vm465_vm2, %v9246_v40  ;;  %v12795_v40 = vld [vmem:[#allocation42_spill] sm:$0xff] }
  0xcb   : > { %8123 = vmatmul.mubr.msk.f32.gmra.mxu1 %vm465_vm2, %v12786_v47  ;;  %8175 = vmatprep.mubr.msk.f32.mxu0 %vm465_vm2, %v8971_v5 }
  0xcc   : > { %8125 = vmatprep.mubr.msk.f32.mxu1 %vm465_vm2, %v9457_v28 }
  0xce   : > { %8176 = vmatmul.mubr.msk.f32.gmra.mxu0 %vm465_vm2, %v8976_v8 }
  0xcf   : > { %8126 = vmatmul.mubr.msk.f32.gmra.mxu1 %vm465_vm2, %v12787_v48  ;;  %8178 = vmatprep.mubr.msk.f32.mxu0 %vm465_vm2, %v8997_v19  ;;  %v12789_v19 = vld [vmem:[#allocation38_spill] sm:$0xff] }
  0xd0   : > { %8128 = vmatprep.mubr.msk.f32.mxu1 %vm465_vm2, %v9474_v45 }
  0xd2   : > { %8179 = vmatmul.mubr.msk.f32.gmra.mxu0 %vm465_vm2, %v9000_v20 }
  0xd3   : > { %8129 = vmatmul.mubr.msk.f32.gmra.mxu1 %vm465_vm2, %v12788_v55  ;;  %8181 = vmatprep.mubr.msk.f32.mxu0 %vm465_vm2, %v9041_v35 }
  0xd4   : > { %8131 = vmatprep.mubr.msk.f32.mxu1 %vm465_vm2, %v9491_v26 }
  0xd6   : > { %v9846_v5 = vpop.f32.mrf.mxu0  ;;  %8182 = vmatmul.mubr.msk.f32.gmra.mxu0 %vm465_vm2, %v9052_v39 }
  0xd7   : > { %v9850_v8 = vpop.f32.mrf.mxu1  ;;  %8132 = vmatmul.mubr.msk.f32.gmra.mxu1 %vm465_vm2, %v12789_v19  ;;  %8184 = vmatprep.mubr.msk.f32.mxu0 %vm465_vm2, %v9089_v53 }
  0xd8   : > { %v9856_v20 = vpop.f32.mrf.mxu0  ;;  %8134 = vmatprep.mubr.msk.f32.mxu1 %vm465_vm2, %v9508_v42 }
  0xd9   : > { %v9860_v35 = vpop.f32.mrf.mxu1 }
  0xda   : > { %12790 = vst [vmem:[#allocation5_spill] sm:$0xff] %v9860_v35  ;;  %v9862_v61 = vpop.f32.mrf.mxu0  ;;  %8185 = vmatmul.mubr.msk.f32.gmra.mxu0 %vm465_vm2, %v9092_v54 }
  0xdb   : > { %v9866_v39 = vpop.f32.mrf.mxu1  ;;  %8135 = vmatmul.mubr.msk.f32.gmra.mxu1 %vm465_vm2, %v12791_v25  ;;  %8187 = vmatprep.mubr.msk.f32.mxu0 %vm465_vm2, %v9128_v2 }
  0xdc   : > { %v9872_v53 = vpop.f32.mrf.mxu0  ;;  %8137 = vmatprep.mubr.msk.f32.mxu1 %vm465_vm2, %v12792_v30 }
  0xdd   : > { %v9876_v59 = vpop.f32.mrf.mxu1 }
  0xde   : > { %12793 = vst [vmem:[#allocation7_spill] sm:$0xff] %v9876_v59  ;;  %v9878_v1 = vpop.f32.mrf.mxu0  ;;  %8188 = vmatmul.mubr.msk.f32.gmra.mxu0 %vm465_vm2, %v9131_v6  ;;  %v2001_v59 = vrot.slane %v9745_v52, 2 }
  0xdf   : > { %v9882_v54 = vpop.f32.mrf.mxu1  ;;  %8138 = vmatmul.mubr.msk.f32.gmra.mxu1 %vm465_vm2, %v12794_v24  ;;  %8190 = vmatprep.mubr.msk.f32.mxu0 %vm465_vm2, %v9163_v31 }
  0xe0   : > { %v9888_v2 = vpop.f32.mrf.mxu0  ;;  %8140 = vmatprep.mubr.msk.f32.mxu1 %vm465_vm2, %v12795_v40 }
  0xe1   : > { %v9892_v7 = vpop.f32.mrf.mxu1 }
  0xe2   : > { %12796 = vst [vmem:[#allocation9_spill] sm:$0xff] %v9892_v7  ;;  %v9894_v44 = vpop.f32.mrf.mxu0  ;;  %8191 = vmatmul.mubr.msk.f32.gmra.mxu0 %vm465_vm2, %v9166_v32 }
  0xe3   : > { %v9898_v6 = vpop.f32.mrf.mxu1  ;;  %8141 = vmatmul.mubr.msk.f32.gmra.mxu1 %vm465_vm2, %v12797_v22  ;;  %8193 = vmatprep.mubr.msk.f32.mxu0 %vm465_vm2, %v9207_v11 }
  0xe4   : > { %v9904_v31 = vpop.f32.mrf.mxu0  ;;  %8143 = vmatprep.mubr.msk.f32.mxu1 %vm465_vm2, %v9559_v38 }
  0xe5   : > { %v9908_v18 = vpop.f32.mrf.mxu1 }
  0xe6   : > { %12798 = vst [vmem:[#allocation11_spill] sm:$0xff] %v9908_v18  ;;  %v9910_v3 = vpop.f32.mrf.mxu0  ;;  %8194 = vmatmul.mubr.msk.f32.gmra.mxu0 %vm465_vm2, %v12757_v0  ;;  %v1999_v0 = vrot.slane %v9732_v41, 2 }
  0xe7   : > { %v9914_v32 = vpop.f32.mrf.mxu1  ;;  %8144 = vmatmul.mubr.msk.f32.gmra.mxu1 %vm465_vm2, %v9570_v58  ;;  %8196 = vmatprep.mubr.msk.f32.mxu0 %vm465_vm2, %v9251_v51 }
  0xe8   : > { %v9920_v11 = vpop.f32.mrf.mxu0  ;;  %8146 = vmatprep.mubr.msk.f32.mxu1 %vm465_vm2, %v9576_v56 }
  0xe9   : > { %v9925_v27 = vpop.f32.mrf.mxu1 }
  0xea   : > { %12799 = vst [vmem:[#allocation13_spill] sm:$0xff] %v9925_v27  ;;  %v9928_v18 = vpop.f32.mrf.mxu0  ;;  %8197 = vmatmul.mubr.msk.f32.gmra.mxu0 %vm465_vm2, %v12758_v16  ;;  %v9943_v27 = vld [vmem:[%s8962_s12 + $0x198] sm:$0xff]  ;;  %v9949_v16 = vsel %vm1051_vm3, %v1998_v57, %v1999_v0  ;;  %v9969_v57 = vsel %vm1051_vm3, %v1999_v0, %v2001_v59 }
  0xeb   : > { %v9932_v7 = vpop.f32.mrf.mxu1  ;;  %8147 = vmatmul.mubr.msk.f32.gmra.mxu1 %vm465_vm2, %v9587_v63  ;;  %8199 = vmatprep.mubr.msk.f32.mxu0 %vm465_vm2, %v9729_v29  ;;  %12802 = vst [vmem:[#allocation33_spill] sm:$0xff] %v9949_v16  ;;  %12804 = vst [vmem:[#allocation35_spill] sm:$0xff] %v9969_v57 }
  0xec   : > { %12800 = vst [vmem:[#allocation15_spill] sm:$0xff] %v9932_v7  ;;  %v9938_v51 = vpop.f32.mrf.mxu0  ;;  %8149 = vmatprep.mubr.msk.f32.mxu1 %vm465_vm2, %v9593_v13 }
  0xed   : > { %v9946_v35 = vpop.f32.mrf.mxu1 }
  0xee   : > { %12801 = vst [vmem:[#allocation20_spill] sm:$0xff] %v9946_v35  ;;  %v9951_v62 = vpop.f32.mrf.mxu0  ;;  %8200 = vmatmul.mubr.msk.f32.gmra.mxu0 %vm465_vm2, %v9732_v41 }
  0xef   : > { %v9955_v29 = vpop.f32.mrf.mxu1  ;;  %8150 = vmatmul.mubr.msk.f32.gmra.mxu1 %vm465_vm2, %v9602_v15  ;;  %8202 = vmatprep.mubr.msk.f32.mxu0 %vm465_vm2, %v9943_v27 }
  0xf0   : > { %12803 = vst [vmem:[#allocation34_spill] sm:$0xff] %v9955_v29  ;;  %v9964_v52 = vpop.f32.mrf.mxu0  ;;  %8152 = vmatprep.mubr.msk.f32.mxu1 %vm465_vm2, %v9949_v16 }
  0xf1   : > { %v9971_v35 = vpop.f32.mrf.mxu1 }
  0xf2   : > { %12805 = vst [vmem:[#allocation36_spill] sm:$0xff] %v9971_v35  ;;  %v9973_v41 = vpop.f32.mrf.mxu0  ;;  %8203 = vmatmul.mubr.msk.f32.gmra.mxu0 %vm465_vm2, %v9962_v50 }
  0xf3   : > { %v9977_v29 = vpop.f32.mrf.mxu1  ;;  %8153 = vmatmul.mubr.msk.f32.gmra.mxu1 %vm465_vm2, %v9969_v57  ;;  %8257 = vmatprep.mubr.msk.f32.mxu0 %vm465_vm2, %v9366_v4 }
  0xf4   : > { %12806 = vst [vmem:[#allocation37_spill] sm:$0xff] %v9977_v29  ;;  %v9983_v7 = vpop.f32.mrf.mxu0  ;;  %8207 = vmatprep.mubr.msk.f32.mxu1 %vm465_vm2, %v12761_v14 }
  0xf5   : > { %v9987_v59 = vpop.f32.mrf.mxu1 }
  0xf6   : > { %12807 = vst [vmem:[#allocation38_spill] sm:$0xff] %v9987_v59  ;;  %v7959_v0 = vpop.f32.mrf.mxu0  ;;  %8258 = vmatmul.mubr.msk.f32.vlgmr.msra.gmra.mxu0 %vm465_vm2, %v9383_v21 }
  0xf7   : > { %v7909_v35 = vpop.f32.mrf.mxu1  ;;  %8208 = vmatmul.mubr.msk.f32.vlgmr.msra.gmra.mxu1 %vm465_vm2, %v12762_v17  ;;  %8260 = vmatprep.mubr.msk.f32.mxu0 %vm465_vm2, %v9389_v10 }
  0xf8   : > { %v898_v4 = vadd.f32 %v7909_v35, %v9846_v5  ;;  %v1267_v29 = vpop.f32.mrf.mxu0  ;;  %8210 = vmatprep.mubr.msk.f32.mxu1 %vm465_vm2, %v12763_v23  ;;  %v12808_v5 = vld [vmem:[#allocation17_spill] sm:$0xff] }
  0xf9   : > { %v892_v14 = vpop.f32.mrf.mxu1 }
  0xfa   : > { %v9998_v57 = vadd.f32 %v7959_v0, %v898_v4  ;;  %v893_v59 = vadd.f32 %v892_v14, %v9856_v20  ;;  %v7962_v16 = vpop.f32.mrf.mxu0  ;;  %8261 = vmatmul.mubr.msk.f32.gmra.mxu0 %vm465_vm2, %v9400_v60  ;;  %v12810_v14 = vld [vmem:[#allocation25_spill] sm:$0xff] }
  0xfb   : > { %v7912_v21 = vpop.f32.mrf.mxu1  ;;  %8211 = vmatmul.mubr.msk.f32.gmra.mxu1 %vm465_vm2, %v12764_v9  ;;  %8263 = vmatprep.mubr.msk.f32.mxu0 %vm465_vm2, %v9406_v49 }
  0xfc   : > { %v10007_v10 = vadd.f32 %v1267_v29, %v893_v59  ;;  %v908_v17 = vadd.f32 %v7912_v21, %v9862_v61  ;;  %v1277_v23 = vpop.f32.mrf.mxu0  ;;  %8213 = vmatprep.mubr.msk.f32.mxu1 %vm465_vm2, %v12808_v5 }
  0xfd   : > { %v902_v20 = vpop.f32.mrf.mxu1 }
  0xfe   : > { %v10012_v35 = vadd.f32 %v7962_v16, %v908_v17  ;;  %v903_v60 = vadd.f32 %v902_v20, %v9872_v53  ;;  %v7965_v0 = vpop.f32.mrf.mxu0  ;;  %8264 = vmatmul.mubr.msk.f32.gmra.mxu0 %vm465_vm2, %v12784_v33  ;;  %v12809_v16 = vld [vmem:[#allocation22_spill] sm:$0xff]  ;;  %v12811_v17 = vld [vmem:[#allocation27_spill] sm:$0xff] }
  0xff   : > { %v7915_v9 = vpop.f32.mrf.mxu1  ;;  %8214 = vmatmul.mubr.msk.f32.gmra.mxu1 %vm465_vm2, %v12766_v46  ;;  %8266 = vmatprep.mubr.msk.f32.mxu0 %vm465_vm2, %v9423_v12 }
 0x100   : > { %v10021_v49 = vadd.f32 %v1277_v23, %v903_v60  ;;  %v918_v61 = vadd.f32 %v7915_v9, %v9878_v1  ;;  %v1287_v29 = vpop.f32.mrf.mxu0  ;;  %8216 = vmatprep.mubr.msk.f32.mxu1 %vm465_vm2, %v12809_v16 }
 0x101   : > { %v912_v53 = vpop.f32.mrf.mxu1 }
 0x102   : > { %v10026_v59 = vadd.f32 %v7965_v0, %v918_v61  ;;  %v913_v33 = vadd.f32 %v912_v53, %v9888_v2  ;;  %v7968_v4 = vpop.f32.mrf.mxu0  ;;  %8267 = vmatmul.mubr.msk.f32.gmra.mxu0 %vm465_vm2, %v12785_v34  ;;  %v3154_v2 = vld [vmem:[%s12558_s3 + $0x18] sm:$0xff]  ;;  %v12813_v61 = vld [vmem:[#allocation31_spill] sm:$0xff] }
 0x103   : > { %v7918_v46 = vpop.f32.mrf.mxu1  ;;  %8217 = vmatmul.mubr.msk.f32.gmra.mxu1 %vm465_vm2, %v12810_v14  ;;  %8269 = vmatprep.mubr.msk.f32.mxu0 %vm465_vm2, %v9440_v37 }
 0x104   : > { %v10035_v12 = vadd.f32 %v1287_v29, %v913_v33  ;;  %v928_v1 = vadd.f32 %v7918_v46, %v9894_v44  ;;  %v1297_v21 = vpop.f32.mrf.mxu0  ;;  %8219 = vmatprep.mubr.msk.f32.mxu1 %vm465_vm2, %v12811_v17  ;;  %8305 = vmatprep.subr.mxu1 %v3154_v2  ;;  %v12812_v44 = vld [vmem:[#allocation29_spill] sm:$0xff]  ;;  %v12814_v33 = vld [vmem:[#allocation32_spill] sm:$0xff]  ;;  %v12815_v46 = vld [vmem:[#allocation3_spill] sm:$0xff] }
 0x105   : > { %v922_v34 = vpop.f32.mrf.mxu1  ;;  %8306 = vmatpush3.msra.mxu1 %v3154_v2  ;;  %v12816_v17 = vld [vmem:[#allocation4_spill] sm:$0xff] }
 0x106   : > { %v10043_v23 = vadd.f32 %v7968_v4, %v928_v1  ;;  %v923_v5 = vadd.f32 %v922_v34, %v9904_v31  ;;  %v7971_v20 = vpop.f32.mrf.mxu0  ;;  %8270 = vmatmul.mubr.msk.f32.gmra.mxu0 %vm465_vm2, %v12786_v47  ;;  %v12817_v34 = vld [vmem:[#allocation6_spill] sm:$0xff] }
 0x107   : > { %v7921_v37 = vpop.f32.mrf.mxu1  ;;  %8220 = vmatmul.mubr.msk.f32.gmra.mxu1 %vm465_vm2, %v12812_v44  ;;  %8272 = vmatprep.mubr.msk.f32.mxu0 %vm465_vm2, %v9457_v28  ;;  %v12818_v44 = vld [vmem:[#allocation8_spill] sm:$0xff] }
 0x108   : > { %v10052_v60 = vadd.f32 %v1297_v21, %v923_v5  ;;  %v938_v0 = vadd.f32 %v7921_v37, %v9910_v3  ;;  %v1307_v9 = vpop.f32.mrf.mxu0  ;;  %8222 = vmatprep.mubr.msk.f32.mxu1 %vm465_vm2, %v12813_v61 }
 0x109   : > { %v932_v31 = vpop.f32.mrf.mxu1 }
 0x10a   : > { %v10057_v29 = vadd.f32 %v7971_v20, %v938_v0  ;;  %v933_v47 = vadd.f32 %v932_v31, %v9920_v11  ;;  %v7974_v16 = vpop.f32.mrf.mxu0  ;;  %8273 = vmatmul.mubr.msk.f32.gmra.mxu0 %vm465_vm2, %v12787_v48 }
 0x10b   : > { %v7924_v53 = vpop.f32.mrf.mxu1  ;;  %8223 = vmatmul.mubr.msk.f32.gmra.mxu1 %vm465_vm2, %v12814_v33  ;;  %8275 = vmatprep.mubr.msk.f32.mxu0 %vm465_vm2, %v9474_v45 }
 0x10c   : > { %v10066_v28 = vadd.f32 %v1307_v9, %v933_v47  ;;  %v948_v3 = vadd.f32 %v7924_v53, %v9928_v18  ;;  %v1317_v4 = vpop.f32.mrf.mxu0  ;;  %8225 = vmatprep.mubr.msk.f32.mxu1 %vm465_vm2, %v12815_v46  ;;  %v12819_v9 = vld [vmem:[#allocation10_spill] sm:$0xff] }
 0x10d   : > { %v942_v11 = vpop.f32.mrf.mxu1 }
 0x10e   : > { %v10071_v14 = vadd.f32 %v7974_v16, %v948_v3  ;;  %v943_v48 = vadd.f32 %v942_v11, %v9938_v51  ;;  %v7977_v1 = vpop.f32.mrf.mxu0  ;;  %8276 = vmatmul.mubr.msk.f32.gmra.mxu0 %vm465_vm2, %v12788_v55  ;;  %v12821_v3 = vld [vmem:[#allocation14_spill] sm:$0xff]  ;;  %v12822_v11 = vld [vmem:[#allocation16_spill] sm:$0xff] }
 0x10f   : > { %v7927_v21 = vpop.f32.mrf.mxu1  ;;  %8226 = vmatmul.mubr.msk.f32.gmra.mxu1 %vm465_vm2, %v12816_v17  ;;  %8278 = vmatprep.mubr.msk.f32.mxu0 %vm465_vm2, %v9491_v26 }
 0x110   : > { %v10080_v45 = vadd.f32 %v1317_v4, %v943_v48  ;;  %v958_v18 = vadd.f32 %v7927_v21, %v9951_v62  ;;  %v1327_v2 = vpop.f32.mrf.mxu0  ;;  %8228 = vmatprep.mubr.msk.f32.mxu1 %vm465_vm2, %v12817_v34  ;;  %v12824_v48 = vld [vmem:[#allocation18_spill] sm:$0xff] }
 0x111   : > { %v952_v51 = vpop.f32.mrf.mxu1 }
 0x112   : > { %v10085_v5 = vadd.f32 %v7977_v1, %v958_v18  ;;  %v953_v55 = vadd.f32 %v952_v51, %v9964_v52  ;;  %v7980_v20 = vpop.f32.mrf.mxu0  ;;  %8279 = vmatmul.mubr.msk.f32.gmra.mxu0 %vm465_vm2, %v12789_v19  ;;  %v3153_v52 = vld [vmem:[%s12558_s3 + $0x10] sm:$0xff]  ;;  %v12826_v18 = vld [vmem:[#allocation21_spill] sm:$0xff] }
 0x113   : > { %v7930_v37 = vpop.f32.mrf.mxu1  ;;  %8229 = vmatmul.mubr.msk.f32.gmra.mxu1 %vm465_vm2, %v12818_v44  ;;  %8281 = vmatprep.mubr.msk.f32.mxu0 %vm465_vm2, %v9508_v42  ;;  %v3152_v44 = vld [vmem:[%s12558_s3 + $0x8] sm:$0xff] }
 0x114   : > { %v10094_v62 = vadd.f32 %v1327_v2, %v953_v55  ;;  %v968_v26 = vadd.f32 %v7930_v37, %v9973_v41  ;;  %v1337_v0 = vpop.f32.mrf.mxu0  ;;  %8231 = vmatprep.mubr.msk.f32.mxu1 %vm465_vm2, %v12819_v9  ;;  %8307 = vmatprep.subr.mxu1 %v3153_v52  ;;  %v12820_v41 = vld [vmem:[#allocation12_spill] sm:$0xff]  ;;  %v12828_v2 = vld [vmem:[#allocation23_spill] sm:$0xff]  ;;  %v2809_v9 = vrot.slane %v9943_v27, 2 }
 0x115   : > { %v962_v19 = vpop.f32.mrf.mxu1  ;;  %8308 = vmatpush3.msra.mxu1 %v3153_v52  ;;  %v12832_v37 = vld [vmem:[#allocation28_spill] sm:$0xff]  ;;  %v2810_v52 = vrot.slane %v9962_v50, 2 }
 0x116   : > { %v10102_v61 = vadd.f32 %v7980_v20, %v968_v26  ;;  %v963_v31 = vadd.f32 %v962_v19, %v9983_v7  ;;  %v7983_v47 = vpop.f32.mrf.mxu0  ;;  %8282 = vmatmul.mubr.msk.f32.gmra.mxu0 %vm465_vm2, %v12791_v25  ;;  %v12830_v20 = vld [vmem:[#allocation26_spill] sm:$0xff]  ;;  %8309 = vmatprep.subr.mxu1 %v3152_v44 }
 0x117   : > { %v7933_v42 = vpop.f32.mrf.mxu1  ;;  %8232 = vmatmul.mubr.msk.f32.gmra.mxu1 %vm465_vm2, %v12820_v41  ;;  %8284 = vmatprep.mubr.msk.f32.mxu0 %vm465_vm2, %v12792_v30  ;;  %v332_v41 = vld [vmem:[%s8962_s12 + $0x1a8] sm:$0x3] }
 0x118   : > { %v10111_v16 = vadd.f32 %v1337_v0, %v963_v31  ;;  %v978_v53 = vadd.f32 %v7933_v42, %v9850_v8  ;;  %v10114_v33 = vpop.f32.mrf.mxu0  ;;  %8234 = vmatprep.mubr.msk.f32.mxu1 %vm465_vm2, %v12821_v3  ;;  %8310 = vmatpush3.msra.mxu1 %v3152_v44 }
 0x119   : > { %v10118_v7 = vpop.f32.mrf.mxu1 }
 0x11a   : > { %v10120_v25 = vadd.f32 %v7983_v47, %v978_v53  ;;  %v7986_v4 = vpop.f32.mrf.mxu0  ;;  %8285 = vmatmul.mubr.msk.f32.gmra.mxu0 %vm465_vm2, %v12794_v24  ;;  %v2539_v47 = vrot.slane %v9962_v50, 1 }
 0x11b   : > { %v7936_v46 = vpop.f32.mrf.mxu1  ;;  %8235 = vmatmul.mubr.msk.f32.gmra.mxu1 %vm465_vm2, %v12822_v11  ;;  %8287 = vmatprep.mubr.msk.f32.mxu0 %vm465_vm2, %v12795_v40  ;;  %v2541_v11 = vrot.slane %v332_v41, 1 }
 0x11c   : > { %v988_v8 = vadd.f32 %v7936_v46, %v9866_v39  ;;  %v10129_v30 = vpop.f32.mrf.mxu0  ;;  %8237 = vmatprep.mubr.msk.f32.mxu1 %vm465_vm2, %v12824_v48  ;;  %v12840_v46 = vld [vmem:[#allocation19_spill] sm:$0xff] }
 0x11d   : > { %12823 = vst [vmem:[#allocation39_spill] sm:$0xff] %v10129_v30  ;;  %v10133_v1 = vpop.f32.mrf.mxu1 }
 0x11e   : > { %12825 = vst [vmem:[#allocation40_spill] sm:$0xff] %v10133_v1  ;;  %v10135_v21 = vadd.f32 %v7986_v4, %v988_v8  ;;  %v7989_v17 = vpop.f32.mrf.mxu0  ;;  %8288 = vmatmul.mubr.msk.f32.gmra.mxu0 %vm465_vm2, %v12797_v22  ;;  %v2811_v8 = vsel %vm1051_vm3, %v2809_v9, %v2810_v52 }
 0x11f   : > { %v7939_v24 = vpop.f32.mrf.mxu1  ;;  %8238 = vmatmul.mubr.msk.f32.gmra.mxu1 %vm465_vm2, %v12826_v18  ;;  %8290 = vmatprep.mubr.msk.f32.mxu0 %vm465_vm2, %v9559_v38 }
 0x120   : > { %v998_v39 = vadd.f32 %v7939_v24, %v9882_v54  ;;  %v10144_v40 = vpop.f32.mrf.mxu0  ;;  %8240 = vmatprep.mubr.msk.f32.mxu1 %vm465_vm2, %v12828_v2  ;;  %v12842_v24 = vld [vmem:[#allocation35_spill] sm:$0xff] }
 0x121   : > { %12827 = vst [vmem:[#allocation41_spill] sm:$0xff] %v10144_v40  ;;  %v10148_v34 = vpop.f32.mrf.mxu1 }
 0x122   : > { %12829 = vst [vmem:[#allocation42_spill] sm:$0xff] %v10148_v34  ;;  %v10150_v51 = vadd.f32 %v7989_v17, %v998_v39  ;;  %v7992_v55 = vpop.f32.mrf.mxu0  ;;  %8291 = vmatmul.mubr.msk.f32.gmra.mxu0 %vm465_vm2, %v9570_v58  ;;  %v12843_v39 = vld [vmem:[#allocation24_spill] sm:$0xff] }
 0x123   : > { %v7942_v22 = vpop.f32.mrf.mxu1  ;;  %8241 = vmatmul.mubr.msk.f32.gmra.mxu1 %vm465_vm2, %v12830_v20  ;;  %8293 = vmatprep.mubr.msk.f32.mxu0 %vm465_vm2, %v9576_v56 }
 0x124   : > { %v1008_v38 = vadd.f32 %v7942_v22, %v9898_v6  ;;  %v10159_v54 = vpop.f32.mrf.mxu0  ;;  %8243 = vmatprep.mubr.msk.f32.mxu1 %vm465_vm2, %v12832_v37  ;;  %v12834_v6 = vld [vmem:[#allocation30_spill] sm:$0xff] }
 0x125   : > { %12831 = vst [vmem:[#allocation43_spill] sm:$0xff] %v10159_v54  ;;  %v10166_v26 = vpop.f32.mrf.mxu1 }
 0x126   : > { %12833 = vst [vmem:[#allocation17_spill] sm:$0xff] %v10166_v26  ;;  %v10168_v58 = vadd.f32 %v7992_v55, %v1008_v38  ;;  %v7995_v0 = vpop.f32.mrf.mxu0  ;;  %8294 = vmatmul.mubr.msk.f32.gmra.mxu0 %vm465_vm2, %v9587_v63  ;;  %v2538_v63 = vrot.slane %v9943_v27, 1  ;;  %v12838_v27 = vld [vmem:[#allocation15_spill] sm:$0xff]  ;;  %v12844_v55 = vld [vmem:[#allocation34_spill] sm:$0xff]  ;;  %v2542_v38 = vsel %vm382_vm1, %v2539_v47, %v2541_v11 }
 0x127   : > { %v7945_v56 = vpop.f32.mrf.mxu1  ;;  %8244 = vmatmul.mubr.msk.f32.gmra.mxu1 %vm465_vm2, %v12834_v6  ;;  %8296 = vmatprep.mubr.msk.f32.mxu0 %vm465_vm2, %v9593_v13  ;;  %v12847_v6 = vld [vmem:[#allocation37_spill] sm:$0xff] }
 0x128   : > { %v1018_v19 = vadd.f32 %v7945_v56, %v9914_v32  ;;  %v10179_v31 = vpop.f32.mrf.mxu0  ;;  %8246 = vmatprep.mubr.msk.f32.mxu1 %vm465_vm2, %v9308_v43  ;;  %v12837_v32 = vld [vmem:[#allocation33_spill] sm:$0xff]  ;;  %v2812_v43 = vrot.slane %v332_v41, 2 }
 0x129   : > { %12835 = vst [vmem:[#allocation22_spill] sm:$0xff] %v10179_v31  ;;  %v10185_v42 = vpop.f32.mrf.mxu1 }
 0x12a   : > { %12836 = vst [vmem:[#allocation25_spill] sm:$0xff] %v10185_v42  ;;  %v10188_v53 = vadd.f32 %v7995_v0, %v1018_v19  ;;  %v7998_v13 = vpop.f32.mrf.mxu0  ;;  %8297 = vmatmul.mubr.msk.f32.gmra.mxu0 %vm465_vm2, %v9602_v15  ;;  %v2540_v15 = vsel %vm382_vm1, %v2538_v63, %v2539_v47  ;;  %v2813_v2 = vsel %vm1051_vm3, %v2810_v52, %v2812_v43  ;;  %v3151_v19 = vld [vmem:[%s12558_s3] sm:$0xff] }
 0x12b   : > { %v7948_v3 = vpop.f32.mrf.mxu1  ;;  %8247 = vmatmul.mubr.msk.f32.gmra.mxu1 %vm465_vm2, %v9323_v36  ;;  %8299 = vmatprep.mubr.msk.f32.mxu0 %vm465_vm2, %v12837_v32 }
 0x12c   : > { %v1028_v4 = vadd.f32 %v7948_v3, %v12838_v27  ;;  %v10197_v50 = vpop.f32.mrf.mxu0  ;;  %8249 = vmatprep.mubr.msk.f32.mxu1 %vm465_vm2, %v12840_v46  ;;  %8311 = vmatprep.subr.mxu1 %v3151_v19 }
 0x12d   : > { %12839 = vst [vmem:[#allocation27_spill] sm:$0xff] %v10197_v50  ;;  %v10202_v48 = vpop.f32.mrf.mxu1  ;;  %8312 = vmatpush3.msra.mxu1 %v3151_v19 }
 0x12e   : > { %12841 = vst [vmem:[#allocation29_spill] sm:$0xff] %v10202_v48  ;;  %v10205_v17 = vadd.f32 %v7998_v13, %v1028_v4  ;;  %v8001_v36 = vpop.f32.mrf.mxu0  ;;  %8300 = vmatmul.mubr.msk.f32.gmra.mxu0 %vm465_vm2, %v12842_v24 }
 0x12f   : > { %v7951_v18 = vpop.f32.mrf.mxu1  ;;  %8250 = vmatmul.mubr.msk.f32.gmra.mxu1 %vm465_vm2, %v12843_v39  ;;  %8302 = vmatprep.mubr.msk.f32.mxu0 %vm465_vm2, %v2811_v8 }
 0x130   : > { %v1038_v22 = vadd.f32 %v7951_v18, %v12844_v55  ;;  %v10214_v20 = vpop.f32.mrf.mxu0  ;;  %8252 = vmatprep.mubr.msk.f32.mxu1 %vm465_vm2, %v2540_v15 }
 0x131   : > { %12845 = vst [vmem:[#allocation31_spill] sm:$0xff] %v10214_v20  ;;  %v10218_v37 = vpop.f32.mrf.mxu1 }
 0x132   : > { %12846 = vst [vmem:[#allocation32_spill] sm:$0xff] %v10218_v37  ;;  %v10220_v44 = vadd.f32 %v8001_v36, %v1038_v22  ;;  %v8004_v0 = vpop.f32.mrf.mxu0  ;;  %8303 = vmatmul.mubr.msk.f32.gmra.mxu0 %vm465_vm2, %v2813_v2 }
 0x133   : > { %v7954_v56 = vpop.f32.mrf.mxu1  ;;  %8253 = vmatmul.mubr.msk.f32.gmra.mxu1 %vm465_vm2, %v2542_v38 }
 0x134   : > { %v1048_v9 = vadd.f32 %v7954_v56, %v12847_v6  ;;  %v10225_v52 = vpop.f32.mrf.mxu0 }
 0x135   : > { %12848 = vst [vmem:[#allocation3_spill] sm:$0xff] %v10225_v52  ;;  %v10230_v63 = vpop.f32.mrf.mxu1 }
 0x136   : > { %12849 = vst [vmem:[#allocation4_spill] sm:$0xff] %v10230_v63  ;;  %v10232_v47 = vadd.f32 %v8004_v0, %v1048_v9  ;;  %v8059_v41 = vpop.f32.mrf.mxu0 }
 0x137   : > { %v8009_v13 = vpop.f32.mrf.mxu1 }
 0x138   : > { %v1695_v3 = vadd.f32 %v8009_v13, %v9998_v57  ;;  %v10235_v32 = vpop.f32.mrf.mxu0 }
 0x139   : > { %v10237_v43 = vpop.f32.mrf.mxu1 }
 0x13a   : > { %v10239_v27 = vadd.f32 %v8059_v41, %v1695_v3  ;;  %v8062_v4 = vpop.f32.mrf.mxu0 }
 0x13b   : > { %v8012_v46 = vpop.f32.mrf.mxu1 }
 0x13c   : > { %v1697_v11 = vadd.f32 %v8012_v46, %v10012_v35  ;;  %v10242_v8 = vpop.f32.mrf.mxu0 }
 0x13d   : > { %v10244_v15 = vpop.f32.mrf.mxu1 }
 0x13e   : > { %v10246_v36 = vadd.f32 %v8062_v4, %v1697_v11  ;;  %v8065_v24 = vpop.f32.mrf.mxu0 }
 0x13f   : > { %v8015_v18 = vpop.f32.mrf.mxu1 }
 0x140   : > { %v1699_v57 = vadd.f32 %v8015_v18, %v10026_v59  ;;  %v10249_v39 = vpop.f32.mrf.mxu0 }
 0x141   : > { %v10251_v2 = vpop.f32.mrf.mxu1 }
 0x142   : > { %v10253_v55 = vadd.f32 %v8065_v24, %v1699_v57  ;;  %v8068_v22 = vpop.f32.mrf.mxu0 }
 0x143   : > { %v8018_v38 = vpop.f32.mrf.mxu1 }
 0x144   : > { %v1701_v35 = vadd.f32 %v8018_v38, %v10043_v23  ;;  %v10256_v0 = vpop.f32.mrf.mxu0 }
 0x145   : > { %v10258_v56 = vpop.f32.mrf.mxu1 }
 0x146   : > { %v10260_v6 = vadd.f32 %v8068_v22, %v1701_v35  ;;  %v8071_v9 = vpop.f32.mrf.mxu0 }
 0x147   : > { %v8021_v19 = vpop.f32.mrf.mxu1 }
 0x148   : > { %v1703_v59 = vadd.f32 %v8021_v19, %v10057_v29  ;;  %v10263_v41 = vpop.f32.mrf.mxu0 }
 0x149   : > { %v10265_v13 = vpop.f32.mrf.mxu1 }
 0x14a   : > { %v10267_v3 = vadd.f32 %v8071_v9, %v1703_v59  ;;  %v8074_v4 = vpop.f32.mrf.mxu0 }
 0x14b   : > { %v8024_v46 = vpop.f32.mrf.mxu1 }
 0x14c   : > { %v1705_v23 = vadd.f32 %v8024_v46, %v10071_v14  ;;  %v10270_v11 = vpop.f32.mrf.mxu0 }
 0x14d   : > { %v10272_v24 = vpop.f32.mrf.mxu1 }
 0x14e   : > { %v10274_v18 = vadd.f32 %v8074_v4, %v1705_v23  ;;  %v8077_v57 = vpop.f32.mrf.mxu0 }
 0x14f   : > { %v8027_v22 = vpop.f32.mrf.mxu1 }
 0x150   : > { %v1707_v29 = vadd.f32 %v8027_v22, %v10085_v5  ;;  %v10277_v38 = vpop.f32.mrf.mxu0 }
 0x151   : > { %v10279_v35 = vpop.f32.mrf.mxu1 }
 0x152   : > { %v10281_v9 = vadd.f32 %v8077_v57, %v1707_v29  ;;  %v8080_v19 = vpop.f32.mrf.mxu0 }
 0x153   : > { %v8030_v59 = vpop.f32.mrf.mxu1 }
 0x154   : > { %12850 = vst [vmem:[#allocation6_spill] sm:$0xff] %v10281_v9  ;;  %v1709_v14 = vadd.f32 %v8030_v59, %v10102_v61  ;;  %v10284_v46 = vpop.f32.mrf.mxu0 }
 0x155   : > { %12851 = vst [vmem:[#allocation8_spill] sm:$0xff] %v10284_v46  ;;  %v10286_v52 = vpop.f32.mrf.mxu1 }
 0x156   : > { %v10288_v4 = vadd.f32 %v8080_v19, %v1709_v14  ;;  %v8083_v23 = vpop.f32.mrf.mxu0 }
 0x157   : > { %v8033_v63 = vpop.f32.mrf.mxu1 }
 0x158   : > { %12852 = vst [vmem:[#allocation10_spill] sm:$0xff] %v10288_v4  ;;  %v1711_v5 = vadd.f32 %v8033_v63, %v10120_v25  ;;  %v10291_v22 = vpop.f32.mrf.mxu0 }
 0x159   : > { %12853 = vst [vmem:[#allocation12_spill] sm:$0xff] %v10291_v22  ;;  %v10293_v20 = vpop.f32.mrf.mxu1 }
 0x15a   : > { %12854 = vst [vmem:[#allocation14_spill] sm:$0xff] %v10293_v20  ;;  %v10295_v57 = vadd.f32 %v8083_v23, %v1711_v5  ;;  %v8086_v29 = vpop.f32.mrf.mxu0 }
 0x15b   : > { %v8036_v50 = vpop.f32.mrf.mxu1 }
 0x15c   : > { %12855 = vst [vmem:[#allocation16_spill] sm:$0xff] %v10295_v57  ;;  %v1713_v61 = vadd.f32 %v8036_v50, %v10135_v21  ;;  %v10298_v59 = vpop.f32.mrf.mxu0 }
 0x15d   : > { %12856 = vst [vmem:[#allocation18_spill] sm:$0xff] %v10298_v59  ;;  %v10300_v37 = vpop.f32.mrf.mxu1 }
 0x15e   : > { %12857 = vst [vmem:[#allocation21_spill] sm:$0xff] %v10300_v37  ;;  %v10302_v19 = vadd.f32 %v8086_v29, %v1713_v61  ;;  %v8089_v14 = vpop.f32.mrf.mxu0 }
 0x15f   : > { %v8039_v48 = vpop.f32.mrf.mxu1 }
 0x160   : > { %12858 = vst [vmem:[#allocation23_spill] sm:$0xff] %v10302_v19  ;;  %v1715_v25 = vadd.f32 %v8039_v48, %v10150_v51  ;;  %v10305_v63 = vpop.f32.mrf.mxu0 }
 0x161   : > { %12859 = vst [vmem:[#allocation26_spill] sm:$0xff] %v10305_v63  ;;  %v10307_v31 = vpop.f32.mrf.mxu1 }
 0x162   : > { %12860 = vst [vmem:[#allocation28_spill] sm:$0xff] %v10307_v31  ;;  %v10309_v23 = vadd.f32 %v8089_v14, %v1715_v25  ;;  %v8092_v5 = vpop.f32.mrf.mxu0 }
 0x163   : > { %v8042_v54 = vpop.f32.mrf.mxu1 }
 0x164   : > { %12861 = vst [vmem:[#allocation30_spill] sm:$0xff] %v10309_v23  ;;  %v1717_v21 = vadd.f32 %v8042_v54, %v10168_v58  ;;  %v10312_v50 = vpop.f32.mrf.mxu0 }
 0x165   : > { %12862 = vst [vmem:[#allocation33_spill] sm:$0xff] %v10312_v50  ;;  %v10314_v59 = vpop.f32.mrf.mxu1 }
 0x166   : > { %12863 = vst [vmem:[#allocation15_spill] sm:$0xff] %v10314_v59  ;;  %v10316_v29 = vadd.f32 %v8092_v5, %v1717_v21  ;;  %v8095_v61 = vpop.f32.mrf.mxu0 }
 0x167   : > { %v8045_v19 = vpop.f32.mrf.mxu1 }
 0x168   : > { %12864 = vst [vmem:[#allocation19_spill] sm:$0xff] %v10316_v29  ;;  %v1719_v51 = vadd.f32 %v8045_v19, %v10188_v53  ;;  %v10319_v48 = vpop.f32.mrf.mxu0 }
 0x169   : > { %12865 = vst [vmem:[#allocation35_spill] sm:$0xff] %v10319_v48  ;;  %v10321_v63 = vpop.f32.mrf.mxu1 }
 0x16a   : > { %12866 = vst [vmem:[#allocation24_spill] sm:$0xff] %v10321_v63  ;;  %v10323_v14 = vadd.f32 %v8095_v61, %v1719_v51  ;;  %v8098_v25 = vpop.f32.mrf.mxu0  ;;  %v6874_v63 = vld [vmem:[%s12560_s5 + $0x20] sm:$0xff] }
 0x16b   : > { %v8048_v23 = vpop.f32.mrf.mxu1 }
 0x16c   : > { %12867 = vst [vmem:[#allocation34_spill] sm:$0xff] %v10323_v14  ;;  %v1721_v54 = vadd.f32 %v8048_v23, %v10205_v17  ;;  %v10326_v58 = vpop.f32.mrf.mxu0 }
 0x16d   : > { %12868 = vst [vmem:[#allocation37_spill] sm:$0xff] %v10326_v58  ;;  %v10328_v50 = vpop.f32.mrf.mxu1 }
 0x16e   : > { %12869 = vst [vmem:[#allocation44_spill] sm:$0xff] %v10328_v50  ;;  %v10330_v5 = vadd.f32 %v8098_v25, %v1721_v54  ;;  %v8101_v21 = vpop.f32.mrf.mxu0 }
 0x16f   : > { %v8051_v29 = vpop.f32.mrf.mxu1 }
 0x170   : > { %12870 = vst [vmem:[#allocation45_spill] sm:$0xff] %v10330_v5  ;;  %v1723_v53 = vadd.f32 %v8051_v29, %v10220_v44  ;;  %v10333_v19 = vpop.f32.mrf.mxu0 }
 0x171   : > { %12871 = vst [vmem:[#allocation46_spill] sm:$0xff] %v10333_v19  ;;  %v10335_v48 = vpop.f32.mrf.mxu1  ;;  %v6875_v19 = vld [vmem:[%s12560_s5 + $0x28] sm:$0xff] }
 0x172   : > { %12872 = vst [vmem:[#allocation47_spill] sm:$0xff] %v10335_v48  ;;  %v10337_v61 = vadd.f32 %v8101_v21, %v1723_v53  ;;  %v8104_v51 = vpop.f32.mrf.mxu0 }
 0x173   : > { %v8054_v14 = vpop.f32.mrf.mxu1 }
 0x174   : > { %12873 = vst [vmem:[#allocation48_spill] sm:$0xff] %v10337_v61  ;;  %v1725_v17 = vadd.f32 %v8054_v14, %v10232_v47  ;;  %v10340_v23 = vpop.f32.mrf.mxu0 }
 0x175   : > { %12874 = vst [vmem:[#allocation49_spill] sm:$0xff] %v10340_v23  ;;  %v10342_v58 = vpop.f32.mrf.mxu1 }
 0x176   : > { %12875 = vst [vmem:[#allocation50_spill] sm:$0xff] %v10342_v58  ;;  %v10344_v25 = vadd.f32 %v8104_v51, %v1725_v17  ;;  %v10346_v54 = vpop.f32.mrf.mxu0  ;;  %v6877_v17 = vld [vmem:[%s12560_s5 + $0x38] sm:$0xff] }
 0x177   : > { %v10348_v5 = vpop.f32.mrf.mxu1  ;;  %8361 = vmatprep.subr.mxu0 %v6877_v17 }
 0x178   : > { %12876 = vst [vmem:[#allocation51_spill] sm:$0xff] %v10344_v25  ;;  %v10350_v44 = vpop.f32.mrf.mxu0  ;;  %v6876_v25 = vld [vmem:[%s12560_s5 + $0x30] sm:$0xff]  ;;  %8362 = vmatpush3.msra.mxu0 %v6877_v17 }
 0x179   : > { %v10352_v29 = vpop.f32.mrf.mxu1  ;;  %8363 = vmatprep.subr.mxu0 %v6876_v25 }
 0x17a   : > { %v10354_v21 = vpop.f32.mrf.mxu0  ;;  %8364 = vmatpush3.msra.mxu0 %v6876_v25 }
 0x17b   : > { %v10356_v53 = vpop.f32.mrf.mxu1  ;;  %8365 = vmatprep.subr.mxu0 %v6875_v19 }
 0x17c   : > { %v10358_v61 = vpop.f32.mrf.mxu0  ;;  %8366 = vmatpush3.msra.mxu0 %v6875_v19 }
 0x17d   : > { %v10360_v47 = vpop.f32.mrf.mxu1  ;;  %8367 = vmatprep.subr.mxu0 %v6874_v63 }
 0x17e   : > { %v10362_v14 = vpop.f32.mrf.mxu0  ;;  %8368 = vmatpush3.msra.mxu0 %v6874_v63 }
 0x17f   : > { %v10364_v51 = vpop.f32.mrf.mxu1 }
 0x180   : > { %v10372_v23 = vpop.f32.mrf.mxu0 }
 0x181   : > { %v10374_v58 = vpop.f32.mrf.mxu1 }
 0x182   : > { %v10379_v48 = vpop.f32.mrf.mxu0 }
 0x183   : > { %v10381_v50 = vpop.f32.mrf.mxu1 }
 0x184   : > { %v10386_v59 = vpop.f32.mrf.mxu0 }
 0x185   : > { %v10388_v31 = vpop.f32.mrf.mxu1 }
 0x186   : > { %v10390_v17 = vpop.f32.mrf.mxu0 }
 0x187   : > { %v10392_v42 = vpop.f32.mrf.mxu1 }
 0x188   : > { %v10394_v26 = vpop.f32.mrf.mxu0 }
 0x189   : > { %v10396_v57 = vpop.f32.mrf.mxu1 }
 0x18a   : > { %v10398_v25 = vpop.f32.mrf.mxu0 }
 0x18b   : > { %12877 = vst [vmem:[#allocation52_spill] sm:$0xff] %v10398_v25  ;;  %v10400_v37 = vpop.f32.mrf.mxu1 }
 0x18c   : > { %v10402_v22 = vpop.f32.mrf.mxu0 }
 0x18d   : > { %12878 = vst [vmem:[#allocation53_spill] sm:$0xff] %v10402_v22  ;;  %v10404_v40 = vpop.f32.mrf.mxu1 }
 0x18e   : > { %v10406_v30 = vpop.f32.mrf.mxu0 }
 0x18f   : > { %12879 = vst [vmem:[#allocation54_spill] sm:$0xff] %v10406_v30  ;;  %v10408_v19 = vpop.f32.mrf.mxu1 }
 0x190   : > { %12880 = vst [vmem:[#allocation55_spill] sm:$0xff] %v10408_v19  ;;  %v10410_v4 = vpop.f32.mrf.mxu0 }
 0x191   : > { %12881 = vst [vmem:[#allocation56_spill] sm:$0xff] %v10410_v4  ;;  %v10412_v46 = vpop.f32.mrf.mxu1 }
 0x192   : > { %12882 = vst [vmem:[#allocation57_spill] sm:$0xff] %v10412_v46  ;;  %v10414_v63 = vpop.f32.mrf.mxu0 }
 0x193   : > { %12883 = vst [vmem:[#allocation58_spill] sm:$0xff] %v10414_v63  ;;  %v10416_v20 = vpop.f32.mrf.mxu1 }
 0x194   : > { %12884 = vst [vmem:[#allocation59_spill] sm:$0xff] %v10416_v20  ;;  %v10418_v34 = vpop.f32.mrf.mxu0 }
 0x195   : > { %12885 = vst [vmem:[#allocation60_spill] sm:$0xff] %v10418_v34  ;;  %v10420_v1 = vpop.f32.mrf.mxu1 }
 0x196   : > { %12886 = vst [vmem:[#allocation61_spill] sm:$0xff] %v10420_v1  ;;  %v10422_v25 = vpop.f32.mrf.mxu0 }
 0x197   : > { %12887 = vst [vmem:[#allocation62_spill] sm:$0xff] %v10422_v25  ;;  %v10424_v22 = vpop.f32.mrf.mxu1 }
 0x198   : > { %12888 = vst [vmem:[#allocation63_spill] sm:$0xff] %v10424_v22  ;;  %v10426_v9 = vpop.f32.mrf.mxu0 }
 0x199   : > { %12889 = vst [vmem:[#allocation64_spill] sm:$0xff] %v10426_v9  ;;  %v10428_v30 = vpop.f32.mrf.mxu1 }
 0x19a   : > { %12890 = vst [vmem:[#allocation65_spill] sm:$0xff] %v10428_v30  ;;  %v10430_v19 = vpop.f32.mrf.mxu0 }
 0x19b   : > { %12891 = vst [vmem:[#allocation66_spill] sm:$0xff] %v10430_v19  ;;  %v10432_v4 = vpop.f32.mrf.mxu1 }
 0x19c   : > { %12892 = vst [vmem:[#allocation67_spill] sm:$0xff] %v10432_v4  ;;  %v10434_v46 = vpop.f32.mrf.mxu0 }
 0x19d   : > { %12893 = vst [vmem:[#allocation68_spill] sm:$0xff] %v10434_v46  ;;  %v10436_v63 = vpop.f32.mrf.mxu1 }
 0x19e   : > { %12894 = vst [vmem:[#allocation69_spill] sm:$0xff] %v10436_v63  ;;  %v10438_v20 = vpop.f32.mrf.mxu0 }
 0x19f   : > { %12895 = vst [vmem:[#allocation70_spill] sm:$0xff] %v10438_v20  ;;  %v10440_v34 = vpop.f32.mrf.mxu1 }
 0x1a0   : > { %12896 = vst [vmem:[#allocation71_spill] sm:$0xff] %v10440_v34  ;;  %v10442_v1 = vpop.f32.mrf.mxu0 }
 0x1a1   : > { %12897 = vst [vmem:[#allocation72_spill] sm:$0xff] %v10442_v1  ;;  %v10444_v25 = vpop.f32.mrf.mxu1 }
 0x1a2   : > { %12898 = vst [vmem:[#allocation73_spill] sm:$0xff] %v10444_v25  ;;  %v10446_v22 = vpop.f32.mrf.mxu0 }
 0x1a3   : > { %12899 = vst [vmem:[#allocation74_spill] sm:$0xff] %v10446_v22  ;;  %v10448_v9 = vpop.f32.mrf.mxu1 }
 0x1a4   : > { %v10450_v30 = vpop.f32.mrf.mxu0 }
 0x1a5   : > { %12900 = vst [vmem:[#allocation75_spill] sm:$0xff] %v10450_v30  ;;  %v10452_v19 = vpop.f32.mrf.mxu1  ;;  %v1694_v30 = vadd.f32 %v10237_v43, %v10007_v10 }
 0x1a6   : > { %12901 = vst [vmem:[#allocation76_spill] sm:$0xff] %v10452_v19  ;;  %v10454_v4 = vpop.f32.mrf.mxu0 }
 0x1a7   : > { %12902 = vst [vmem:[#allocation77_spill] sm:$0xff] %v10454_v4  ;;  %v10456_v46 = vpop.f32.mrf.mxu1 }
 0x1a8   : > { %12903 = vst [vmem:[#allocation78_spill] sm:$0xff] %v10456_v46  ;;  %v10458_v63 = vpop.f32.mrf.mxu0 }
 0x1a9   : > { %12904 = vst [vmem:[#allocation79_spill] sm:$0xff] %v10458_v63  ;;  %v10460_v20 = vpop.f32.mrf.mxu1 }
 0x1aa   : > { %12905 = vst [vmem:[#allocation80_spill] sm:$0xff] %v10460_v20  ;;  %v10462_v34 = vpop.f32.mrf.mxu0  ;;  %v1966_v20 = vadd.f32 %v10235_v32, %v1694_v30  ;;  %v2240_v32 = vadd.f32 %v10356_v53, %v10246_v36 }
 0x1ab   : > { %12906 = vst [vmem:[#allocation81_spill] sm:$0xff] %v10462_v34  ;;  %v10464_v1 = vpop.f32.mrf.mxu1  ;;  %v1696_v34 = vadd.f32 %v10244_v15, %v10021_v49 }
 0x1ac   : > { %12907 = vst [vmem:[#allocation82_spill] sm:$0xff] %v10464_v1  ;;  %v10466_v25 = vpop.f32.mrf.mxu0  ;;  %v2237_v10 = vadd.f32 %v10352_v29, %v1966_v20 }
 0x1ad   : > { %12908 = vst [vmem:[#allocation83_spill] sm:$0xff] %v10466_v25  ;;  %v10468_v22 = vpop.f32.mrf.mxu1  ;;  %v2238_v25 = vadd.f32 %v10348_v5, %v10239_v27  ;;  %v1968_v30 = vadd.f32 %v10242_v8, %v1696_v34  ;;  %v2242_v34 = vadd.f32 %v10364_v51, %v10253_v55 }
 0x1ae   : > { %12909 = vst [vmem:[#allocation84_spill] sm:$0xff] %v10468_v22  ;;  %v10472_v19 = vpop.f32.mrf.mxu0  ;;  %v2505_v5 = vadd.f32 %v10350_v44, %v2237_v10 }
 0x1af   : > { %12910 = vst [vmem:[#allocation85_spill] sm:$0xff] %v10472_v19  ;;  %v10474_v4 = vpop.f32.mrf.mxu1  ;;  %v2506_v49 = vadd.f32 %v10346_v54, %v2238_v25  ;;  %v2239_v20 = vadd.f32 %v10360_v47, %v1968_v30  ;;  %v10511_v54 = vld [vmem:[%s12557_s2] ss:$0 sm:$0xff]  ;;  %v2510_v25 = vadd.f32 %v10362_v14, %v2242_v34 }
 0x1b0   : > { %v10476_v46 = vpop.f32.mrf.mxu0 }
 0x1b1   : > { %12911 = vst [vmem:[#allocation86_spill] sm:$0xff] %v10476_v46  ;;  %v10478_v63 = vpop.f32.mrf.mxu1  ;;  %v1698_v46 = vadd.f32 %v10251_v2, %v10035_v12  ;;  %v1700_v12 = vadd.f32 %v10258_v56, %v10052_v60  ;;  %v2508_v2 = vadd.f32 %v10354_v21, %v2240_v32  ;;  %v2507_v56 = vadd.f32 %v10358_v61, %v2239_v20 }
 0x1b2   : > { %v10485_v22 = vpop.f32.mrf.mxu0 }
 0x1b3   : > { %12912 = vst [vmem:[#allocation87_spill] sm:$0xff] %v10485_v22  ;;  %v10487_v1 = vpop.f32.mrf.mxu1  ;;  %v1970_v22 = vadd.f32 %v10249_v39, %v1698_v46  ;;  %v1702_v39 = vadd.f32 %v10265_v13, %v10066_v28  ;;  %v1972_v21 = vadd.f32 %v10256_v0, %v1700_v12 }
 0x1b4   : > { %v10490_v43 = vpop.f32.mrf.mxu0 }
 0x1b5   : > { %12913 = vst [vmem:[#allocation88_spill] sm:$0xff] %v10490_v43  ;;  %v10494_v19 = vpop.f32.mrf.mxu1  ;;  %v2241_v46 = vadd.f32 %v10374_v58, %v1970_v22  ;;  %v1974_v61 = vadd.f32 %v10263_v41, %v1702_v39  ;;  %v2243_v0 = vadd.f32 %v10388_v31, %v1972_v21 }
 0x1b6   : > { %v8259_v27 = vpop.f32.mrf.mxu0 }
 0x1b7   : > { %v8209_v15 = vpop.f32.mrf.mxu1 }
 0x1b8   : > { %v2778_v29 = vadd.f32 %v8209_v15, %v2506_v49  ;;  %v2889_v43 = vpop.f32.mrf.mxu0  ;;  %v2244_v49 = vadd.f32 %v10381_v50, %v10260_v6  ;;  %v1704_v6 = vadd.f32 %v10272_v24, %v10080_v45  ;;  %v2246_v50 = vadd.f32 %v10392_v42, %v10267_v3 }
 0x1b9   : > { %v2618_v8 = vpop.f32.mrf.mxu1  ;;  %v1706_v45 = vadd.f32 %v10279_v35, %v10094_v62  ;;  %v2245_v42 = vadd.f32 %v10396_v57, %v1974_v61  ;;  %v2511_v24 = vadd.f32 %v10386_v59, %v2243_v0  ;;  %v2248_v62 = vadd.f32 %v10400_v37, %v10274_v18 }
 0x1ba   : > { %v3049_v36 = vadd.f32 %v8259_v27, %v2778_v29  ;;  %v2777_v44 = vadd.f32 %v2618_v8, %v2505_v5  ;;  %v8262_v53 = vpop.f32.mrf.mxu0 }
 0x1bb   : > { %v8212_v60 = vpop.f32.mrf.mxu1 }
 0x1bc   : > { %v3048_v55 = vadd.f32 %v2889_v43, %v2777_v44  ;;  %v2780_v47 = vadd.f32 %v8212_v60, %v2508_v2  ;;  %v2899_v51 = vpop.f32.mrf.mxu0  ;;  %v3088_v10 = vadd.f32 %v10511_v54, %v3049_v36  ;;  %v2509_v43 = vadd.f32 %v10372_v23, %v2241_v46  ;;  %v12914_v2 = vld [vmem:[#allocation5_spill] sm:$0xff] }
 0x1bd   : > { %v2628_v30 = vpop.f32.mrf.mxu1  ;;  %v2512_v23 = vadd.f32 %v10379_v48, %v2244_v49  ;;  %v973_v36 = vadd.f32 %v10118_v7, %v12914_v2  ;;  %v1976_v46 = vadd.f32 %v10270_v11, %v1704_v6  ;;  %v2514_v60 = vadd.f32 %v10390_v17, %v2246_v50  ;;  %v12922_v6 = vld [vmem:[#allocation14_spill] sm:$0xff] }
 0x1be   : > { %v3087_v28 = vadd.f32 %v10511_v54, %v3048_v55  ;;  %v3051_v13 = vadd.f32 %v8262_v53, %v2780_v47  ;;  %v2779_v22 = vadd.f32 %v2628_v30, %v2507_v56  ;;  %v8265_v58 = vpop.f32.mrf.mxu0  ;;  %v3120_v20 = vmax.f32 %v3088_v10, 0.0 }
 0x1bf   : > { %v8215_v32 = vpop.f32.mrf.mxu1  ;;  %v1978_v11 = vadd.f32 %v10277_v38, %v1706_v45  ;;  %v2513_v17 = vadd.f32 %v10394_v26, %v2245_v42  ;;  %v1708_v49 = vadd.f32 %v10286_v52, %v10111_v16  ;;  %v12917_v26 = vld [vmem:[#allocation52_spill] sm:$0xff]  ;;  %v12920_v16 = vld [vmem:[#allocation9_spill] sm:$0xff]  ;;  %v12921_v52 = vld [vmem:[#allocation42_spill] sm:$0xff] }
 0x1c0   : > { %v3119_v14 = vmax.f32 %v3087_v28, 0.0  ;;  %v3050_v27 = vadd.f32 %v2899_v51, %v2779_v22  ;;  %v2782_v15 = vadd.f32 %v8215_v32, %v2510_v25  ;;  %v2909_v5 = vpop.f32.mrf.mxu0  ;;  %v3090_v29 = vadd.f32 %v10511_v54, %v3051_v13  ;;  %v12915_v28 = vld [vmem:[#allocation6_spill] sm:$0xff]  ;;  %v12916_v13 = vld [vmem:[#allocation55_spill] sm:$0xff] }
 0x1c1   : > { %v2638_v41 = vpop.f32.mrf.mxu1  ;;  %v1442_v51 = vadd.f32 %v10114_v33, %v973_v36  ;;  %v2247_v25 = vadd.f32 %v10404_v40, %v1976_v46  ;;  %v2250_v22 = vadd.f32 %v12916_v13, %v12915_v28  ;;  %v2516_v61 = vadd.f32 %v12917_v26, %v2248_v62  ;;  %v12925_v36 = vld [vmem:[#allocation8_spill] sm:$0xff]  ;;  %v12926_v42 = vld [vmem:[#allocation54_spill] sm:$0xff]  ;;  %v12929_v62 = vld [vmem:[#allocation39_spill] sm:$0xff] }
 0x1c2   : > { %v3089_v12 = vadd.f32 %v10511_v54, %v3050_v27  ;;  %v3053_v34 = vadd.f32 %v8265_v58, %v2782_v15  ;;  %v2781_v31 = vadd.f32 %v2638_v41, %v2509_v43  ;;  %8313 = vmatprep.mubr.msk.f32.mxu1 %vm3162_vm4, %v3119_v14  ;;  %v8268_v8 = vpop.f32.mrf.mxu0  ;;  %v3122_v56 = vmax.f32 %v3090_v29, 0.0  ;;  %v12918_v14 = vld [vmem:[#allocation7_spill] sm:$0xff]  ;;  %v12919_v27 = vld [vmem:[#allocation40_spill] sm:$0xff]  ;;  %v12934_v28 = vld [vmem:[#allocation21_spill] sm:$0xff] }
 0x1c3   : > { %v8218_v3 = vpop.f32.mrf.mxu1  ;;  %8314 = vmatmul.mubr.msk.f32.vlgmr.msra.gmra.mxu1 %vm3162_vm4, %v3120_v20  ;;  %v983_v15 = vadd.f32 %v12919_v27, %v12918_v14  ;;  %v1710_v50 = vadd.f32 %v12922_v6, %v1442_v51  ;;  %v12923_v20 = vld [vmem:[#allocation57_spill] sm:$0xff]  ;;  %v1980_v45 = vadd.f32 %v12925_v36, %v1708_v49 }
 0x1c4   : > { %v3121_v48 = vmax.f32 %v3089_v12, 0.0  ;;  %v3052_v44 = vadd.f32 %v2909_v5, %v2781_v31  ;;  %v2784_v53 = vadd.f32 %v8218_v3, %v2512_v23  ;;  %v2919_v39 = vpop.f32.mrf.mxu0  ;;  %v3092_v7 = vadd.f32 %v10511_v54, %v3053_v34  ;;  %v12924_v23 = vld [vmem:[#allocation53_spill] sm:$0xff] }
 0x1c5   : > { %v2648_v55 = vpop.f32.mrf.mxu1  ;;  %v993_v5 = vadd.f32 %v12921_v52, %v12920_v16  ;;  %v2249_v29 = vadd.f32 %v12923_v20, %v1978_v11  ;;  %v2515_v12 = vadd.f32 %v12924_v23, %v2247_v25  ;;  %v2518_v3 = vadd.f32 %v12926_v42, %v2250_v22  ;;  %v12932_v11 = vld [vmem:[#allocation56_spill] sm:$0xff]  ;;  %v12933_v25 = vld [vmem:[#allocation61_spill] sm:$0xff]  ;;  %v12945_v42 = vld [vmem:[#allocation18_spill] sm:$0xff] }
 0x1c6   : > { %v3091_v35 = vadd.f32 %v10511_v54, %v3052_v44  ;;  %v3055_v57 = vadd.f32 %v8268_v8, %v2784_v53  ;;  %v2783_v47 = vadd.f32 %v2648_v55, %v2511_v24  ;;  %8316 = vmatprep.mubr.msk.f32.mxu1 %vm3162_vm4, %v3121_v48  ;;  %v8271_v59 = vpop.f32.mrf.mxu0  ;;  %v3124_v33 = vmax.f32 %v3092_v7, 0.0  ;;  %v12927_v53 = vld [vmem:[#allocation10_spill] sm:$0xff]  ;;  %v12935_v22 = vld [vmem:[#allocation16_spill] sm:$0xff]  ;;  %v12939_v16 = vld [vmem:[#allocation17_spill] sm:$0xff] }
 0x1c7   : > { %v8221_v21 = vpop.f32.mrf.mxu1  ;;  %8317 = vmatmul.mubr.msk.f32.gmra.mxu1 %vm3162_vm4, %v3122_v56  ;;  %v12941_v6 = vld [vmem:[#allocation25_spill] sm:$0xff]  ;;  %v12942_v20 = vld [vmem:[#allocation28_spill] sm:$0xff] }
 0x1c8   : > { %v3123_v10 = vmax.f32 %v3091_v35, 0.0  ;;  %v3054_v37 = vadd.f32 %v2919_v39, %v2783_v47  ;;  %v2786_v18 = vadd.f32 %v8221_v21, %v2514_v60  ;;  %v2929_v30 = vpop.f32.mrf.mxu0  ;;  %v3094_v38 = vadd.f32 %v10511_v54, %v3055_v57  ;;  %v12928_v39 = vld [vmem:[#allocation59_spill] sm:$0xff]  ;;  %v12930_v57 = vld [vmem:[#allocation41_spill] sm:$0xff] }
 0x1c9   : > { %v2658_v58 = vpop.f32.mrf.mxu1  ;;  %v2252_v46 = vadd.f32 %v12928_v39, %v12927_v53  ;;  %v1444_v35 = vadd.f32 %v12929_v62, %v983_v15  ;;  %v1446_v47 = vadd.f32 %v12930_v57, %v993_v5  ;;  %v12938_v15 = vld [vmem:[#allocation11_spill] sm:$0xff]  ;;  %v12940_v5 = vld [vmem:[#allocation13_spill] sm:$0xff] }
 0x1ca   : > { %v3093_v43 = vadd.f32 %v10511_v54, %v3054_v37  ;;  %v3057_v32 = vadd.f32 %v8271_v59, %v2786_v18  ;;  %v2785_v40 = vadd.f32 %v2658_v58, %v2513_v17  ;;  %8319 = vmatprep.mubr.msk.f32.mxu1 %vm3162_vm4, %v3123_v10  ;;  %v8274_v0 = vpop.f32.mrf.mxu0  ;;  %v3126_v24 = vmax.f32 %v3094_v38, 0.0  ;;  %v12931_v59 = vld [vmem:[#allocation12_spill] sm:$0xff]  ;;  %v12949_v57 = vld [vmem:[#allocation43_spill] sm:$0xff] }
 0x1cb   : > { %v8224_v41 = vpop.f32.mrf.mxu1  ;;  %8320 = vmatmul.mubr.msk.f32.gmra.mxu1 %vm3162_vm4, %v3124_v33  ;;  %v1982_v51 = vadd.f32 %v12931_v59, %v1710_v50  ;;  %v2517_v17 = vadd.f32 %v12932_v11, %v2249_v29  ;;  %v2251_v10 = vadd.f32 %v12933_v25, %v1980_v45  ;;  %v1712_v13 = vadd.f32 %v12934_v28, %v1444_v35  ;;  %v12936_v33 = vld [vmem:[#allocation63_spill] sm:$0xff]  ;;  %v12950_v59 = vld [vmem:[#allocation22_spill] sm:$0xff] }
 0x1cc   : > { %v3125_v34 = vmax.f32 %v3093_v43, 0.0  ;;  %v3056_v31 = vadd.f32 %v2929_v30, %v2785_v40  ;;  %v2788_v8 = vadd.f32 %v8224_v41, %v2516_v61  ;;  %v2939_v2 = vpop.f32.mrf.mxu0  ;;  %v3096_v48 = vadd.f32 %v10511_v54, %v3057_v32  ;;  %v12937_v43 = vld [vmem:[#allocation58_spill] sm:$0xff]  ;;  %v12943_v41 = vld [vmem:[#allocation65_spill] sm:$0xff] }
 0x1cd   : > { %v2668_v44 = vpop.f32.mrf.mxu1  ;;  %v2254_v38 = vadd.f32 %v12936_v33, %v12935_v22  ;;  %v2520_v32 = vadd.f32 %v12937_v43, %v2252_v46  ;;  %v1003_v52 = vadd.f32 %v12939_v16, %v12938_v15  ;;  %v1013_v50 = vadd.f32 %v12941_v6, %v12940_v5  ;;  %v12947_v46 = vld [vmem:[#allocation23_spill] sm:$0xff]  ;;  %v12951_v11 = vld [vmem:[#allocation26_spill] sm:$0xff]  ;;  %v12959_v5 = vld [vmem:[#allocation29_spill] sm:$0xff] }
 0x1ce   : > { %v3095_v60 = vadd.f32 %v10511_v54, %v3056_v31  ;;  %v3059_v56 = vadd.f32 %v8274_v0, %v2788_v8  ;;  %v2787_v7 = vadd.f32 %v2668_v44, %v2515_v12  ;;  %8322 = vmatprep.mubr.msk.f32.mxu1 %vm3162_vm4, %v3125_v34  ;;  %v8277_v55 = vpop.f32.mrf.mxu0  ;;  %v3128_v58 = vmax.f32 %v3096_v48, 0.0  ;;  %v12944_v34 = vld [vmem:[#allocation60_spill] sm:$0xff]  ;;  %v12954_v22 = vld [vmem:[#allocation15_spill] sm:$0xff] }
 0x1cf   : > { %v8227_v21 = vpop.f32.mrf.mxu1  ;;  %8323 = vmatmul.mubr.msk.f32.gmra.mxu1 %vm3162_vm4, %v3126_v24  ;;  %v1714_v29 = vadd.f32 %v12942_v20, %v1446_v47  ;;  %v2253_v23 = vadd.f32 %v12943_v41, %v1982_v51  ;;  %v2519_v31 = vadd.f32 %v12944_v34, %v2251_v10  ;;  %v12946_v24 = vld [vmem:[#allocation62_spill] sm:$0xff]  ;;  %v1448_v47 = vadd.f32 %v12949_v57, %v1003_v52  ;;  %v12958_v52 = vld [vmem:[#allocation20_spill] sm:$0xff] }
 0x1d0   : > { %v3127_v37 = vmax.f32 %v3095_v60, 0.0  ;;  %v3058_v18 = vadd.f32 %v2939_v2, %v2787_v7  ;;  %v2790_v30 = vadd.f32 %v8227_v21, %v2518_v3  ;;  %v2949_v49 = vpop.f32.mrf.mxu0  ;;  %v3098_v26 = vadd.f32 %v10511_v54, %v3059_v56  ;;  %v12948_v60 = vld [vmem:[#allocation67_spill] sm:$0xff]  ;;  %v12952_v21 = vld [vmem:[#allocation64_spill] sm:$0xff] }
 0x1d1   : > { %v2678_v61 = vpop.f32.mrf.mxu1  ;;  %v1984_v3 = vadd.f32 %v12945_v42, %v1712_v13  ;;  %v2522_v48 = vadd.f32 %v12946_v24, %v2254_v38  ;;  %v2256_v56 = vadd.f32 %v12948_v60, %v12947_v46  ;;  %v1450_v51 = vadd.f32 %v12950_v59, %v1013_v50  ;;  %v12955_v38 = vld [vmem:[#allocation30_spill] sm:$0xff]  ;;  %v12960_v50 = vld [vmem:[#allocation36_spill] sm:$0xff]  ;;  %v12965_v24 = vld [vmem:[#allocation33_spill] sm:$0xff] }
 0x1d2   : > { %v3097_v40 = vadd.f32 %v10511_v54, %v3058_v18  ;;  %v3061_v0 = vadd.f32 %v8277_v55, %v2790_v30  ;;  %v2789_v14 = vadd.f32 %v2678_v61, %v2517_v17  ;;  %8325 = vmatprep.mubr.msk.f32.mxu1 %vm3162_vm4, %v3127_v37  ;;  %v8280_v27 = vpop.f32.mrf.mxu0  ;;  %v3130_v44 = vmax.f32 %v3098_v26, 0.0  ;;  %v12953_v37 = vld [vmem:[#allocation69_spill] sm:$0xff]  ;;  %v12961_v20 = vld [vmem:[#allocation32_spill] sm:$0xff] }
 0x1d3   : > { %v8230_v12 = vpop.f32.mrf.mxu1  ;;  %8326 = vmatmul.mubr.msk.f32.gmra.mxu1 %vm3162_vm4, %v3128_v58  ;;  %v1986_v17 = vadd.f32 %v12951_v11, %v1714_v29  ;;  %v2521_v25 = vadd.f32 %v12952_v21, %v2253_v23  ;;  %v2255_v18 = vadd.f32 %v12953_v37, %v1984_v3  ;;  %v1716_v33 = vadd.f32 %v12954_v22, %v1448_v47  ;;  %v12956_v58 = vld [vmem:[#allocation71_spill] sm:$0xff]  ;;  %v12962_v41 = vld [vmem:[#allocation24_spill] sm:$0xff] }
 0x1d4   : > { %v3129_v8 = vmax.f32 %v3097_v40, 0.0  ;;  %v3060_v2 = vadd.f32 %v2949_v49, %v2789_v14  ;;  %v2792_v36 = vadd.f32 %v8230_v12, %v2520_v32  ;;  %v2959_v45 = vpop.f32.mrf.mxu0  ;;  %v3100_v53 = vadd.f32 %v10511_v54, %v3061_v0  ;;  %v12957_v40 = vld [vmem:[#allocation66_spill] sm:$0xff]  ;;  %v12963_v12 = vld [vmem:[#allocation73_spill] sm:$0xff]  ;;  %v12968_v47 = vld [vmem:[#allocation27_spill] sm:$0xff] }
 0x1d5   : > { %v2688_v39 = vpop.f32.mrf.mxu1  ;;  %v2258_v26 = vadd.f32 %v12956_v58, %v12955_v38  ;;  %v2524_v0 = vadd.f32 %v12957_v40, %v2256_v56  ;;  %v1023_v6 = vadd.f32 %v12959_v5, %v12958_v52  ;;  %v1033_v29 = vadd.f32 %v12961_v20, %v12960_v50  ;;  %v12967_v56 = vld [vmem:[#allocation19_spill] sm:$0xff]  ;;  %v12973_v22 = vld [vmem:[#allocation44_spill] sm:$0xff]  ;;  %v12974_v38 = vld [vmem:[#allocation34_spill] sm:$0xff] }
 0x1d6   : > { %v3099_v7 = vadd.f32 %v10511_v54, %v3060_v2  ;;  %v3063_v55 = vadd.f32 %v8280_v27, %v2792_v36  ;;  %v2791_v62 = vadd.f32 %v2688_v39, %v2519_v31  ;;  %8328 = vmatprep.mubr.msk.f32.mxu1 %vm3162_vm4, %v3129_v8  ;;  %v8283_v35 = vpop.f32.mrf.mxu0  ;;  %v3132_v61 = vmax.f32 %v3100_v53, 0.0  ;;  %v12964_v8 = vld [vmem:[#allocation68_spill] sm:$0xff]  ;;  %v12975_v58 = vld [vmem:[#allocation78_spill] sm:$0xff]  ;;  %v12979_v50 = vld [vmem:[#allocation47_spill] sm:$0xff] }
 0x1d7   : > { %v8233_v10 = vpop.f32.mrf.mxu1  ;;  %8329 = vmatmul.mubr.msk.f32.gmra.mxu1 %vm3162_vm4, %v3130_v44  ;;  %v1718_v23 = vadd.f32 %v12962_v41, %v1450_v51  ;;  %v2257_v34 = vadd.f32 %v12963_v12, %v1986_v17  ;;  %v2523_v2 = vadd.f32 %v12964_v8, %v2255_v18  ;;  %v12966_v44 = vld [vmem:[#allocation70_spill] sm:$0xff]  ;;  %v1452_v59 = vadd.f32 %v12968_v47, %v1023_v6  ;;  %v12969_v51 = vld [vmem:[#allocation31_spill] sm:$0xff]  ;;  %v12972_v18 = vld [vmem:[#allocation76_spill] sm:$0xff] }
 0x1d8   : > { %v3131_v30 = vmax.f32 %v3099_v7, 0.0  ;;  %v3062_v49 = vadd.f32 %v2959_v45, %v2791_v62  ;;  %v2794_v28 = vadd.f32 %v8233_v10, %v2522_v48  ;;  %v2969_v13 = vpop.f32.mrf.mxu0  ;;  %v3102_v43 = vadd.f32 %v10511_v54, %v3063_v55  ;;  %v12970_v17 = vld [vmem:[#allocation35_spill] sm:$0xff]  ;;  %v12976_v40 = vld [vmem:[#allocation74_spill] sm:$0xff]  ;;  %v12978_v5 = vld [vmem:[#allocation4_spill] sm:$0xff] }
 0x1d9   : > { %v2698_v32 = vpop.f32.mrf.mxu1  ;;  %v1988_v48 = vadd.f32 %v12965_v24, %v1716_v33  ;;  %v2526_v53 = vadd.f32 %v12966_v44, %v2258_v26  ;;  %v2260_v7 = vadd.f32 %v10448_v9, %v12967_v56  ;;  %v1454_v11 = vadd.f32 %v12969_v51, %v1033_v29  ;;  %v12977_v52 = vld [vmem:[#allocation38_spill] sm:$0xff]  ;;  %v12980_v29 = vld [vmem:[#allocation80_spill] sm:$0xff]  ;;  %v12981_v12 = vld [vmem:[#allocation75_spill] sm:$0xff] }
 0x1da   : > { %v3101_v14 = vadd.f32 %v10511_v54, %v3062_v49  ;;  %v3065_v27 = vadd.f32 %v8283_v35, %v2794_v28  ;;  %v2793_v15 = vadd.f32 %v2698_v32, %v2521_v25  ;;  %8331 = vmatprep.mubr.msk.f32.mxu1 %vm3162_vm4, %v3131_v30  ;;  %v8286_v16 = vpop.f32.mrf.mxu0  ;;  %v3134_v39 = vmax.f32 %v3102_v43, 0.0  ;;  %v12971_v25 = vld [vmem:[#allocation72_spill] sm:$0xff]  ;;  %v12987_v47 = vld [vmem:[#allocation46_spill] sm:$0xff]  ;;  %v12988_v51 = vld [vmem:[#allocation79_spill] sm:$0xff] }
 0x1db   : > { %v8236_v31 = vpop.f32.mrf.mxu1  ;;  %8332 = vmatmul.mubr.msk.f32.gmra.mxu1 %vm3162_vm4, %v3132_v61  ;;  %v1990_v21 = vadd.f32 %v12970_v17, %v1718_v23  ;;  %v2525_v10 = vadd.f32 %v12971_v25, %v2257_v34  ;;  %v2259_v9 = vadd.f32 %v12972_v18, %v1988_v48  ;;  %v1720_v33 = vadd.f32 %v12973_v22, %v1452_v59 }
 0x1dc   : > { %v3133_v36 = vmax.f32 %v3101_v14, 0.0  ;;  %v3064_v45 = vadd.f32 %v2969_v13, %v2793_v15  ;;  %v2796_v42 = vadd.f32 %v8236_v31, %v2524_v0  ;;  %v2979_v3 = vpop.f32.mrf.mxu0  ;;  %v3104_v46 = vadd.f32 %v10511_v54, %v3065_v27 }
 0x1dd   : > { %v2708_v60 = vpop.f32.mrf.mxu1  ;;  %v2262_v26 = vadd.f32 %v12975_v58, %v12974_v38  ;;  %v2528_v0 = vadd.f32 %v12976_v40, %v2260_v7  ;;  %v1043_v6 = vadd.f32 %v12978_v5, %v12977_v52  ;;  %v1722_v20 = vadd.f32 %v12979_v50, %v1454_v11  ;;  %v12992_v58 = vld [vmem:[#allocation81_spill] sm:$0xff] }
 0x1de   : > { %v3103_v55 = vadd.f32 %v10511_v54, %v3064_v45  ;;  %v3067_v62 = vadd.f32 %v8286_v16, %v2796_v42  ;;  %v2795_v35 = vadd.f32 %v2708_v60, %v2523_v2  ;;  %8334 = vmatprep.mubr.msk.f32.mxu1 %vm3162_vm4, %v3133_v36  ;;  %v8289_v57 = vpop.f32.mrf.mxu0  ;;  %v3136_v61 = vmax.f32 %v3104_v46, 0.0  ;;  %v12982_v45 = vld [vmem:[#allocation37_spill] sm:$0xff]  ;;  %v12985_v46 = vld [vmem:[#allocation82_spill] sm:$0xff] }
 0x1df   : > { %v8239_v37 = vpop.f32.mrf.mxu1  ;;  %8335 = vmatmul.mubr.msk.f32.gmra.mxu1 %vm3162_vm4, %v3134_v39  ;;  %v2261_v41 = vadd.f32 %v12980_v29, %v1990_v21  ;;  %v2527_v34 = vadd.f32 %v12981_v12, %v2259_v9  ;;  %v1992_v42 = vadd.f32 %v12982_v45, %v1720_v33  ;;  %v12984_v39 = vld [vmem:[#allocation45_spill] sm:$0xff]  ;;  %v1994_v59 = vadd.f32 %v12987_v47, %v1722_v20  ;;  %v12989_v21 = vld [vmem:[#allocation84_spill] sm:$0xff]  ;;  %v12997_v45 = vld [vmem:[#allocation86_spill] sm:$0xff] }
 0x1e0   : > { %v3135_v30 = vmax.f32 %v3103_v55, 0.0  ;;  %v3066_v49 = vadd.f32 %v2979_v3, %v2795_v35  ;;  %v2798_v28 = vadd.f32 %v8239_v37, %v2526_v53  ;;  %v2989_v13 = vpop.f32.mrf.mxu0  ;;  %v3106_v43 = vadd.f32 %v10511_v54, %v3067_v62  ;;  %v12983_v3 = vld [vmem:[#allocation77_spill] sm:$0xff]  ;;  %v12986_v35 = vld [vmem:[#allocation3_spill] sm:$0xff] }
 0x1e1   : > { %v2718_v32 = vpop.f32.mrf.mxu1  ;;  %v2530_v24 = vadd.f32 %v12983_v3, %v2262_v26  ;;  %v2264_v60 = vadd.f32 %v12985_v46, %v12984_v39  ;;  %v2529_v11 = vadd.f32 %v12988_v51, %v2261_v41  ;;  %v2263_v25 = vadd.f32 %v12989_v21, %v1992_v42  ;;  %v12995_v20 = vld [vmem:[#allocation85_spill] sm:$0xff] }
 0x1e2   : > { %v3105_v14 = vadd.f32 %v10511_v54, %v3066_v49  ;;  %v3069_v27 = vadd.f32 %v8289_v57, %v2798_v28  ;;  %v2797_v15 = vadd.f32 %v2718_v32, %v2525_v10  ;;  %8337 = vmatprep.mubr.msk.f32.mxu1 %vm3162_vm4, %v3135_v30  ;;  %v8292_v16 = vpop.f32.mrf.mxu0  ;;  %v3138_v48 = vmax.f32 %v3106_v43, 0.0  ;;  %v12990_v30 = vld [vmem:[#allocation50_spill] sm:$0xff]  ;;  %v12991_v28 = vld [vmem:[#allocation48_spill] sm:$0xff] }
 0x1e3   : > { %v8242_v23 = vpop.f32.mrf.mxu1  ;;  %8338 = vmatmul.mubr.msk.f32.gmra.mxu1 %vm3162_vm4, %v3136_v61  ;;  %v1456_v57 = vadd.f32 %v12986_v35, %v1043_v6  ;;  %v2532_v26 = vadd.f32 %v12992_v58, %v2264_v60  ;;  %v12994_v6 = vld [vmem:[#allocation49_spill] sm:$0xff] }
 0x1e4   : > { %v3137_v31 = vmax.f32 %v3105_v14, 0.0  ;;  %v3068_v8 = vadd.f32 %v2989_v13, %v2797_v15  ;;  %v2800_v2 = vadd.f32 %v8242_v23, %v2528_v0  ;;  %v2999_v36 = vpop.f32.mrf.mxu0  ;;  %v3108_v44 = vadd.f32 %v10511_v54, %v3069_v27  ;;  %v12993_v27 = vld [vmem:[#allocation83_spill] sm:$0xff] }
 0x1e5   : > { %v2728_v53 = vpop.f32.mrf.mxu1  ;;  %v1724_v49 = vadd.f32 %v12990_v30, %v1456_v57  ;;  %v2266_v13 = vadd.f32 %v10474_v4, %v12991_v28  ;;  %v2265_v0 = vadd.f32 %v10478_v63, %v1994_v59  ;;  %v2531_v4 = vadd.f32 %v12993_v27, %v2263_v25 }
 0x1e6   : > { %v3107_v56 = vadd.f32 %v10511_v54, %v3068_v8  ;;  %v3071_v7 = vadd.f32 %v8292_v16, %v2800_v2  ;;  %v2799_v55 = vadd.f32 %v2728_v53, %v2527_v34  ;;  %8340 = vmatprep.mubr.msk.f32.mxu1 %vm3162_vm4, %v3137_v31  ;;  %v8295_v62 = vpop.f32.mrf.mxu0  ;;  %v3140_v22 = vmax.f32 %v3108_v44, 0.0  ;;  %v12996_v34 = vld [vmem:[#allocation51_spill] sm:$0xff] }
 0x1e7   : > { %v8245_v17 = vpop.f32.mrf.mxu1  ;;  %8341 = vmatmul.mubr.msk.f32.gmra.mxu1 %vm3162_vm4, %v3138_v48  ;;  %v1996_v50 = vadd.f32 %v12994_v6, %v1724_v49  ;;  %v2534_v29 = vadd.f32 %v12995_v20, %v2266_v13  ;;  %v2268_v63 = vadd.f32 %v10487_v1, %v12996_v34  ;;  %v2533_v42 = vadd.f32 %v12997_v45, %v2265_v0  ;;  %v3658_v0 = vld [vmem:[%s12560_s5] sm:$0xff]  ;;  %v6944_v6 = vld [vmem:[%s12560_s5 + $0x50] sm:$0xff]  ;;  %v10809_v34 = vld [vmem:[%s12560_s5 + $0x98] sm:$0xff] }
 0x1e8   : > { %v3139_v10 = vmax.f32 %v3107_v56, 0.0  ;;  %v3070_v37 = vadd.f32 %v2999_v36, %v2799_v55  ;;  %v2802_v18 = vadd.f32 %v8245_v17, %v2530_v24  ;;  %v3009_v9 = vpop.f32.mrf.mxu0  ;;  %v3110_v33 = vadd.f32 %v10511_v54, %v3071_v7  ;;  %v12998_v56 = vld [vmem:[#allocation87_spill] sm:$0xff]  ;;  %v6942_v20 = vld [vmem:[%s12560_s5 + $0x40] sm:$0xff] }
 0x1e9   : > { %v2738_v38 = vpop.f32.mrf.mxu1  ;;  %v2267_v24 = vadd.f32 %v10494_v19, %v1996_v50  ;;  %v2536_v7 = vadd.f32 %v12998_v56, %v2268_v63  ;;  %v12999_v19 = vld [vmem:[#allocation88_spill] sm:$0xff]  ;;  %v6943_v50 = vld [vmem:[%s12560_s5 + $0x48] sm:$0xff]  ;;  %v10815_v63 = vld [vmem:[%s12559_s4] ss:$0 sm:$0xff] }
 0x1ea   : > { %v3109_v61 = vadd.f32 %v10511_v54, %v3070_v37  ;;  %v3073_v43 = vadd.f32 %v8295_v62, %v2802_v18  ;;  %v2801_v32 = vadd.f32 %v2738_v38, %v2529_v11  ;;  %8343 = vmatprep.mubr.msk.f32.mxu1 %vm3162_vm4, %v3139_v10  ;;  %v8298_v40 = vpop.f32.mrf.mxu0  ;;  %v3142_v41 = vmax.f32 %v3110_v33, 0.0 }
 0x1eb   : > { %v8248_v14 = vpop.f32.mrf.mxu1  ;;  %8344 = vmatmul.mubr.msk.f32.gmra.mxu1 %vm3162_vm4, %v3140_v22  ;;  %v2535_v59 = vadd.f32 %v12999_v19, %v2267_v24 }
 0x1ec   : > { %v3141_v15 = vmax.f32 %v3109_v61, 0.0  ;;  %v3072_v16 = vadd.f32 %v3009_v9, %v2801_v32  ;;  %v2804_v52 = vadd.f32 %v8248_v14, %v2532_v26  ;;  %v3019_v5 = vpop.f32.mrf.mxu0  ;;  %v3112_v23 = vadd.f32 %v10511_v54, %v3073_v43  ;;  %v3660_v61 = vld [vmem:[%s12560_s5 + $0x10] sm:$0xff]  ;;  %v3659_v43 = vld [vmem:[%s12560_s5 + $0x8] sm:$0xff] }
 0x1ed   : > { %v2748_v12 = vpop.f32.mrf.mxu1  ;;  %v8892_v26 = vmov 0.0  }
 0x1ee   : > { %v3111_v31 = vadd.f32 %v10511_v54, %v3072_v16  ;;  %v3075_v8 = vadd.f32 %v8298_v40, %v2804_v52  ;;  %v2803_v2 = vadd.f32 %v2748_v12, %v2531_v4  ;;  %8346 = vmatprep.mubr.msk.f32.mxu1 %vm3162_vm4, %v3141_v15  ;;  %v8301_v36 = vpop.f32.mrf.mxu0  ;;  %v3144_v46 = vmax.f32 %v3112_v23, 0.0  ;;  %3521 = vst.msk [vmem:[#allocation2 + $0x20] sm:$0xff] %vm3162_vm4, %v8892_v26  ;;  %v6979_v23 = vld [vmem:[%s12560_s5 + $0x68] sm:$0xff]  ;;  %v6978_v12 = vld [vmem:[%s12560_s5 + $0x60] sm:$0xff] }
 0x1ef   : > { %v8251_v3 = vpop.f32.mrf.mxu1  ;;  %8347 = vmatmul.mubr.msk.f32.gmra.mxu1 %vm3162_vm4, %v3142_v41  ;;  %3516 = vst.msk [vmem:[#allocation2] sm:$0xff] %vm3162_vm4, %v8892_v26  ;;  %3517 = vst.msk [vmem:[#allocation2 + $0x8] sm:$0xff] %vm3162_vm4, %v8892_v26  ;;  %v6980_v41 = vld [vmem:[%s12560_s5 + $0x70] sm:$0xff] }
 0x1f0   : > { %v3143_v48 = vmax.f32 %v3111_v31, 0.0  ;;  %v3074_v44 = vadd.f32 %v3019_v5, %v2803_v2  ;;  %v2806_v53 = vadd.f32 %v8251_v3, %v2534_v29  ;;  %v3029_v39 = vpop.f32.mrf.mxu0  ;;  %v3114_v1 = vadd.f32 %v10511_v54, %v3075_v8  ;;  %3520 = vst.msk [vmem:[#allocation2 + $0x18] sm:$0xff] %vm3162_vm4, %v8892_v26  ;;  %3523 = vst.msk [vmem:[#allocation2 + $0x30] sm:$0xff] %vm3162_vm4, %v8892_v26  ;;  %v6945_v5 = vld [vmem:[%s12560_s5 + $0x58] sm:$0xff] }
 0x1f1   : > { %v2758_v60 = vpop.f32.mrf.mxu1  ;;  %3524 = vst.msk [vmem:[#allocation2 + $0x38] sm:$0xff] %vm3162_vm4, %v8892_v26  ;;  %3526 = vst.msk [vmem:[#allocation2 + $0x48] sm:$0xff] %vm3162_vm4, %v8892_v26  ;;  %8473 = vmatprep.subr.mxu0 %v6945_v5  ;;  %v6981_v29 = vld [vmem:[%s12560_s5 + $0x78] sm:$0xff] }
 0x1f2   : > { %v3113_v55 = vadd.f32 %v10511_v54, %v3074_v44  ;;  %v3077_v62 = vadd.f32 %v8301_v36, %v2806_v53  ;;  %v2805_v35 = vadd.f32 %v2758_v60, %v2533_v42  ;;  %8349 = vmatprep.mubr.msk.f32.mxu1 %vm3162_vm4, %v3143_v48  ;;  %v8304_v57 = vpop.f32.mrf.mxu0  ;;  %v3146_v21 = vmax.f32 %v3114_v1, 0.0  ;;  %3527 = vst.msk [vmem:[#allocation2 + $0x50] sm:$0xff] %vm3162_vm4, %v8892_v26  ;;  %v10822_v3 = vld [vmem:[%s12560_s5 + $0xb8] sm:$0xff] }
 0x1f3   : > { %v8254_v47 = vpop.f32.mrf.mxu1  ;;  %8350 = vmatmul.mubr.msk.f32.gmra.mxu1 %vm3162_vm4, %v3144_v46  ;;  %3529 = vst.msk [vmem:[#allocation2 + $0x60] sm:$0xff] %vm3162_vm4, %v8892_v26  ;;  %3530 = vst.msk [vmem:[#allocation2 + $0x68] sm:$0xff] %vm3162_vm4, %v8892_v26 }
 0x1f4   : > { %v3145_v51 = vmax.f32 %v3113_v55, 0.0  ;;  %v3076_v11 = vadd.f32 %v3029_v39, %v2805_v35  ;;  %v2808_v17 = vadd.f32 %v8254_v47, %v2536_v7  ;;  %v3116_v25 = vadd.f32 %v10511_v54, %v3077_v62  ;;  %v3039_v37 = vpop.f32.mrf.mxu0  ;;  %3532 = vst.msk [vmem:[#allocation2 + $0x78] sm:$0xff] %vm3162_vm4, %v8892_v26  ;;  %3533 = vst.msk [vmem:[#allocation2 + $0x80] sm:$0xff] %vm3162_vm4, %v8892_v26 }
 0x1f5   : > { %v2768_v10 = vpop.f32.mrf.mxu1  ;;  %3535 = vst.msk [vmem:[#allocation2 + $0x90] sm:$0xff] %vm3162_vm4, %v8892_v26  ;;  %3536 = vst.msk [vmem:[#allocation2 + $0x98] sm:$0xff] %vm3162_vm4, %v8892_v26 }
 0x1f6   : > { %v3115_v18 = vadd.f32 %v10511_v54, %v3076_v11  ;;  %v2807_v9 = vadd.f32 %v2768_v10, %v2535_v59  ;;  %v3079_v30 = vadd.f32 %v8304_v57, %v2808_v17  ;;  %8352 = vmatprep.mubr.msk.f32.mxu1 %vm3162_vm4, %v3145_v51  ;;  %v3148_v13 = vmax.f32 %v3116_v25, 0.0  ;;  %3538 = vst.msk [vmem:[#allocation2 + $0xa8] sm:$0xff] %vm3162_vm4, %v8892_v26  ;;  %v10762_v32 = vld [vmem:[#allocation2] sm:$0xff]  ;;  %v10764_v40 = vld [vmem:[#allocation2 + $0x8] sm:$0xff] }
 0x1f7   : > { %8353 = vmatmul.mubr.msk.f32.gmra.mxu1 %vm3162_vm4, %v3146_v21  ;;  %3539 = vst.msk [vmem:[#allocation2 + $0xb0] sm:$0xff] %vm3162_vm4, %v8892_v26  ;;  %3541 = vst.msk [vmem:[#allocation2 + $0xc0] sm:$0xff] %vm3162_vm4, %v8892_v26  ;;  %v3710_v14 = vrot.slane %v10762_v32, 1  ;;  %v3711_v27 = vrot.slane %v10764_v40, 1 }
 0x1f8   : > { %v3147_v49 = vmax.f32 %v3115_v18, 0.0  ;;  %v3078_v28 = vadd.f32 %v3039_v37, %v2807_v9  ;;  %v3118_v22 = vadd.f32 %v10511_v54, %v3079_v30  ;;  %3542 = vst.msk [vmem:[#allocation2 + $0xc8] sm:$0xff] %vm3162_vm4, %v8892_v26  ;;  %3544 = vst.msk [vmem:[#allocation2 + $0xd8] sm:$0xff] %vm3162_vm4, %v8892_v26 }
 0x1f9   : > { %3545 = vst.msk [vmem:[#allocation2 + $0xe0] sm:$0xff] %vm3162_vm4, %v8892_v26  ;;  %3547 = vst.msk [vmem:[#allocation2 + $0xf0] sm:$0xff] %vm3162_vm4, %v8892_v26  ;;  %v3712_v16 = vsel %vm382_vm1, %v3710_v14, %v3711_v27 }
 0x1fa   : > { %v3117_v33 = vadd.f32 %v10511_v54, %v3078_v28  ;;  %8355 = vmatprep.mubr.msk.f32.mxu1 %vm3162_vm4, %v3147_v49  ;;  %v3150_v58 = vmax.f32 %v3118_v22, 0.0  ;;  %3548 = vst.msk [vmem:[#allocation2 + $0xf8] sm:$0xff] %vm3162_vm4, %v8892_v26  ;;  %3550 = vst.msk [vmem:[#allocation2 + $0x108] sm:$0xff] %vm3162_vm4, %v8892_v26  ;;  %v3661_v54 = vld [vmem:[%s12560_s5 + $0x18] sm:$0xff]  ;;  %8369 = vmatprep.mubr.msk.f32.mxu0 %vm3162_vm4, %v3712_v16 }
 0x1fb   : > { %8356 = vmatmul.mubr.msk.f32.gmra.mxu1 %vm3162_vm4, %v3148_v13  ;;  %3551 = vst.msk [vmem:[#allocation2 + $0x110] sm:$0xff] %vm3162_vm4, %v8892_v26  ;;  %3553 = vst.msk [vmem:[#allocation2 + $0x120] sm:$0xff] %vm3162_vm4, %v8892_v26  ;;  %8417 = vmatprep.subr.mxu1 %v3661_v54 }
 0x1fc   : > { %v3149_v38 = vmax.f32 %v3117_v33, 0.0  ;;  %3554 = vst.msk [vmem:[#allocation2 + $0x128] sm:$0xff] %vm3162_vm4, %v8892_v26  ;;  %3556 = vst.msk [vmem:[#allocation2 + $0x138] sm:$0xff] %vm3162_vm4, %v8892_v26  ;;  %8418 = vmatpush3.msra.mxu1 %v3661_v54 }
 0x1fd   : > { %3557 = vst.msk [vmem:[#allocation2 + $0x140] sm:$0xff] %vm3162_vm4, %v8892_v26  ;;  %3559 = vst.msk [vmem:[#allocation2 + $0x150] sm:$0xff] %vm3162_vm4, %v8892_v26  ;;  %8419 = vmatprep.subr.mxu1 %v3660_v61 }
 0x1fe   : > { %8358 = vmatprep.mubr.msk.f32.mxu1 %vm3162_vm4, %v3149_v38  ;;  %3560 = vst.msk [vmem:[#allocation2 + $0x158] sm:$0xff] %vm3162_vm4, %v8892_v26  ;;  %3562 = vst.msk [vmem:[#allocation2 + $0x168] sm:$0xff] %vm3162_vm4, %v8892_v26  ;;  %8420 = vmatpush3.msra.mxu1 %v3660_v61 }
 0x1ff   : > { %8359 = vmatmul.mubr.msk.f32.gmra.mxu1 %vm3162_vm4, %v3150_v58  ;;  %3563 = vst.msk [vmem:[#allocation2 + $0x170] sm:$0xff] %vm3162_vm4, %v8892_v26  ;;  %3565 = vst.msk [vmem:[#allocation2 + $0x180] sm:$0xff] %vm3162_vm4, %v8892_v26  ;;  %8421 = vmatprep.subr.mxu1 %v3659_v43 }
 0x200   : > { %3566 = vst.msk [vmem:[#allocation2 + $0x188] sm:$0xff] %vm3162_vm4, %v8892_v26  ;;  %3568 = vst.msk [vmem:[#allocation2 + $0x198] sm:$0xff] %vm3162_vm4, %v8892_v26  ;;  %8422 = vmatpush3.msra.mxu1 %v3659_v43  ;;  %8425 = vmatprep.mubr.msk.f32.mxu1 %vm3162_vm4, %v10762_v32 }
 0x201   : > { %3569 = vst.msk [vmem:[#allocation2 + $0x1a0] sm:$0xff] %vm3162_vm4, %v8892_v26  ;;  %8423 = vmatprep.subr.mxu1 %v3658_v0 }
 0x202   : > { %3522 = vst.msk [vmem:[#allocation2 + $0x28] sm:$0x3] %vm3518_vm5, %v8892_v26  ;;  %3519 = vst.msk [vmem:[#allocation2 + $0x10] sm:$0x3] %vm3518_vm5, %v8892_v26  ;;  %8424 = vmatpush3.msra.mxu1 %v3658_v0 }
 0x203   : > { %3525 = vst.msk [vmem:[#allocation2 + $0x40] sm:$0x3] %vm3518_vm5, %v8892_v26  ;;  %3528 = vst.msk [vmem:[#allocation2 + $0x58] sm:$0x3] %vm3518_vm5, %v8892_v26  ;;  %8426 = vmatmul.mubr.msk.f32.vlgmr.msra.gmra.mxu1 %vm3162_vm4, %v10764_v40  ;;  %8529 = vmatprep.subr.mxu1 %v6981_v29 }
 0x204   : > { %3531 = vst.msk [vmem:[#allocation2 + $0x70] sm:$0x3] %vm3518_vm5, %v8892_v26  ;;  %3534 = vst.msk [vmem:[#allocation2 + $0x88] sm:$0x3] %vm3518_vm5, %v8892_v26  ;;  %8530 = vmatpush3.msra.mxu1 %v6981_v29 }
 0x205   : > { %3537 = vst.msk [vmem:[#allocation2 + $0xa0] sm:$0x3] %vm3518_vm5, %v8892_v26  ;;  %3540 = vst.msk [vmem:[#allocation2 + $0xb8] sm:$0x3] %vm3518_vm5, %v8892_v26  ;;  %8531 = vmatprep.subr.mxu1 %v6980_v41 }
 0x206   : > { %3543 = vst.msk [vmem:[#allocation2 + $0xd0] sm:$0x3] %vm3518_vm5, %v8892_v26  ;;  %3546 = vst.msk [vmem:[#allocation2 + $0xe8] sm:$0x3] %vm3518_vm5, %v8892_v26  ;;  %8532 = vmatpush3.msra.mxu1 %v6980_v41 }
 0x207   : > { %3549 = vst.msk [vmem:[#allocation2 + $0x100] sm:$0x3] %vm3518_vm5, %v8892_v26  ;;  %3552 = vst.msk [vmem:[#allocation2 + $0x118] sm:$0x3] %vm3518_vm5, %v8892_v26  ;;  %8533 = vmatprep.subr.mxu1 %v6979_v23 }
 0x208   : > { %3555 = vst.msk [vmem:[#allocation2 + $0x130] sm:$0x3] %vm3518_vm5, %v8892_v26  ;;  %3558 = vst.msk [vmem:[#allocation2 + $0x148] sm:$0x3] %vm3518_vm5, %v8892_v26  ;;  %8534 = vmatpush3.msra.mxu1 %v6979_v23 }
 0x209   : > { %3561 = vst.msk [vmem:[#allocation2 + $0x160] sm:$0x3] %vm3518_vm5, %v8892_v26  ;;  %3564 = vst.msk [vmem:[#allocation2 + $0x178] sm:$0x3] %vm3518_vm5, %v8892_v26  ;;  %v10773_v4 = vld [vmem:[#allocation2 + $0x10] sm:$0x3]  ;;  %8535 = vmatprep.subr.mxu1 %v6978_v12 }
 0x20a   : > { %3567 = vst.msk [vmem:[#allocation2 + $0x190] sm:$0x3] %vm3518_vm5, %v8892_v26  ;;  %3570 = vst.msk [vmem:[#allocation2 + $0x1a8] sm:$0x3] %vm3518_vm5, %v8892_v26  ;;  %v3713_v15 = vrot.slane %v10773_v4, 1  ;;  %8536 = vmatpush3.msra.mxu1 %v6978_v12 }
 0x20b   : > { %8641 = vmatprep.subr.mxu1 %v10822_v3 }
 0x20c   : > { %v3714_v52 = vsel %vm382_vm1, %v3711_v27, %v3713_v15 }
 0x20d   : > { %8370 = vmatmul.mubr.msk.f32.vlgmr.msra.gmra.mxu0 %vm3162_vm4, %v3714_v52 }
 0x20e   : > { %8474 = vmatpush3.msra.mxu0 %v6945_v5 }
 0x20f   : > { %8475 = vmatprep.subr.mxu0 %v6944_v6 }
 0x210   : > { %8476 = vmatpush3.msra.mxu0 %v6944_v6 }
 0x211   : > { %8477 = vmatprep.subr.mxu0 %v6943_v50 }
 0x212   : > { %8478 = vmatpush3.msra.mxu0 %v6943_v50 }
 0x213   : > { %8479 = vmatprep.subr.mxu0 %v6942_v20 }
 0x214   : > { %8480 = vmatpush3.msra.mxu0 %v6942_v20 }
 0x215   : > { %8585 = vmatprep.subr.mxu0 %v10809_v34 }
 0x283   : > { %v8315_v31 = vpop.f32.mrf.mxu1 }
 0x284   : > { %v3331_v8 = vadd.f32 %v8315_v31, %v10815_v63 }
 0x285   : > { %v3325_v2 = vpop.f32.mrf.mxu1 }
 0x286   : > { %v3485_v36 = vmax.f32 %v3331_v8, 0.0  ;;  %v3326_v45 = vadd.f32 %v10815_v63, %v3325_v2 }
 0x287   : > { %v8318_v42 = vpop.f32.mrf.mxu1 }
 0x288   : > { %3573 = vst.msk [vmem:[#allocation2 + $0x21] sm:$0xff] %vm3162_vm4, %v3485_v36  ;;  %v3484_v24 = vmax.f32 %v3326_v45, 0.0  ;;  %v3341_v48 = vadd.f32 %v8318_v42, %v10815_v63 }
 0x289   : > { %v3335_v44 = vpop.f32.mrf.mxu1 }
 0x28a   : > { %3572 = vst.msk [vmem:[#allocation2 + $0x19] sm:$0xff] %vm3162_vm4, %v3484_v24  ;;  %v3487_v53 = vmax.f32 %v3341_v48, 0.0  ;;  %v3336_v39 = vadd.f32 %v10815_v63, %v3335_v44 }
 0x28b   : > { %v8321_v46 = vpop.f32.mrf.mxu1 }
 0x28c   : > { %3575 = vst.msk [vmem:[#allocation2 + $0x39] sm:$0xff] %vm3162_vm4, %v3487_v53  ;;  %v3486_v1 = vmax.f32 %v3336_v39, 0.0  ;;  %v3351_v60 = vadd.f32 %v8321_v46, %v10815_v63 }
 0x28d   : > { %v3345_v56 = vpop.f32.mrf.mxu1 }
 0x28e   : > { %3574 = vst.msk [vmem:[#allocation2 + $0x31] sm:$0xff] %vm3162_vm4, %v3486_v1  ;;  %v3489_v7 = vmax.f32 %v3351_v60, 0.0  ;;  %v3346_v55 = vadd.f32 %v10815_v63, %v3345_v56 }
 0x28f   : > { %v8324_v62 = vpop.f32.mrf.mxu1  ;;  %v10835_v47 = vld [vmem:[#allocation2 + $0x28] sm:$0x3] }
 0x290   : > { %3577 = vst.msk [vmem:[#allocation2 + $0x51] sm:$0xff] %vm3162_vm4, %v3489_v7  ;;  %v3488_v35 = vmax.f32 %v3346_v55, 0.0  ;;  %v3361_v57 = vadd.f32 %v8324_v62, %v10815_v63  ;;  %v3718_v37 = vrot.slane %v10835_v47, 1 }
 0x291   : > { %v3355_v19 = vpop.f32.mrf.mxu1  ;;  %v10837_v59 = vld [vmem:[#allocation2 + $0x18] sm:$0xff]  ;;  %v10839_v51 = vld [vmem:[#allocation2 + $0x20] sm:$0xff] }
 0x292   : > { %3576 = vst.msk [vmem:[#allocation2 + $0x49] sm:$0xff] %vm3162_vm4, %v3488_v35  ;;  %v3491_v11 = vmax.f32 %v3361_v57, 0.0  ;;  %v3356_v17 = vadd.f32 %v10815_v63, %v3355_v19  ;;  %v3715_v21 = vrot.slane %v10837_v59, 1  ;;  %8428 = vmatprep.mubr.msk.f32.mxu1 %vm3162_vm4, %v10837_v59  ;;  %v3716_v10 = vrot.slane %v10839_v51, 1 }
 0x293   : > { %v8327_v25 = vpop.f32.mrf.mxu1  ;;  %8429 = vmatmul.mubr.msk.f32.gmra.mxu1 %vm3162_vm4, %v10839_v51  ;;  %v10850_v18 = vld [vmem:[#allocation2 + $0x40] sm:$0x3] }
 0x294   : > { %3579 = vst.msk [vmem:[#allocation2 + $0x69] sm:$0xff] %vm3162_vm4, %v3491_v11  ;;  %v3490_v9 = vmax.f32 %v3356_v17, 0.0  ;;  %v3371_v30 = vadd.f32 %v8327_v25, %v10815_v63  ;;  %v10855_v28 = vsel %vm382_vm1, %v3715_v21, %v3716_v10  ;;  %v10858_v13 = vsel %vm382_vm1, %v3716_v10, %v3718_v37 }
 0x295   : > { %v3365_v49 = vpop.f32.mrf.mxu1  ;;  %v10860_v22 = vld [vmem:[#allocation2 + $0x30] sm:$0xff]  ;;  %v10862_v33 = vld [vmem:[#allocation2 + $0x38] sm:$0xff]  ;;  %v3723_v38 = vrot.slane %v10850_v18, 1  ;;  %8372 = vmatprep.mubr.msk.f32.mxu0 %vm3162_vm4, %v10855_v28 }
 0x296   : > { %3578 = vst.msk [vmem:[#allocation2 + $0x61] sm:$0xff] %vm3162_vm4, %v3490_v9  ;;  %v3493_v58 = vmax.f32 %v3371_v30, 0.0  ;;  %v3366_v26 = vadd.f32 %v10815_v63, %v3365_v49  ;;  %8431 = vmatprep.mubr.msk.f32.mxu1 %vm3162_vm4, %v10860_v22  ;;  %v3720_v54 = vrot.slane %v10860_v22, 1  ;;  %v3721_v61 = vrot.slane %v10862_v33, 1  ;;  %8373 = vmatmul.mubr.msk.f32.gmra.mxu0 %vm3162_vm4, %v10858_v13 }
 0x297   : > { %v8330_v43 = vpop.f32.mrf.mxu1  ;;  %8432 = vmatmul.mubr.msk.f32.gmra.mxu1 %vm3162_vm4, %v10862_v33  ;;  %v10877_v0 = vld [vmem:[#allocation2 + $0x58] sm:$0x3] }
 0x298   : > { %3581 = vst.msk [vmem:[#allocation2 + $0x81] sm:$0xff] %vm3162_vm4, %v3493_v58  ;;  %v3492_v14 = vmax.f32 %v3366_v26, 0.0  ;;  %v3381_v27 = vadd.f32 %v8330_v43, %v10815_v63  ;;  %v10882_v15 = vsel %vm382_vm1, %v3720_v54, %v3721_v61  ;;  %v10885_v16 = vsel %vm382_vm1, %v3721_v61, %v3723_v38 }
 0x299   : > { %v3375_v52 = vpop.f32.mrf.mxu1  ;;  %8375 = vmatprep.mubr.msk.f32.mxu0 %vm3162_vm4, %v10882_v15  ;;  %v10889_v5 = vld [vmem:[#allocation2 + $0x48] sm:$0xff]  ;;  %v10891_v6 = vld [vmem:[#allocation2 + $0x50] sm:$0xff]  ;;  %v3728_v50 = vrot.slane %v10877_v0, 1 }
 0x29a   : > { %3580 = vst.msk [vmem:[#allocation2 + $0x79] sm:$0xff] %vm3162_vm4, %v3492_v14  ;;  %v3495_v20 = vmax.f32 %v3381_v27, 0.0  ;;  %v3376_v29 = vadd.f32 %v10815_v63, %v3375_v52  ;;  %8434 = vmatprep.mubr.msk.f32.mxu1 %vm3162_vm4, %v10889_v5  ;;  %v3725_v41 = vrot.slane %v10889_v5, 1  ;;  %v3726_v23 = vrot.slane %v10891_v6, 1  ;;  %8376 = vmatmul.mubr.msk.f32.gmra.mxu0 %vm3162_vm4, %v10885_v16 }
 0x29b   : > { %v8333_v12 = vpop.f32.mrf.mxu1  ;;  %8435 = vmatmul.mubr.msk.f32.gmra.mxu1 %vm3162_vm4, %v10891_v6  ;;  %v10904_v31 = vld [vmem:[#allocation2 + $0x70] sm:$0x3] }
 0x29c   : > { %3583 = vst.msk [vmem:[#allocation2 + $0x99] sm:$0xff] %vm3162_vm4, %v3495_v20  ;;  %v3494_v8 = vmax.f32 %v3376_v29, 0.0  ;;  %v3391_v2 = vadd.f32 %v8333_v12, %v10815_v63  ;;  %v10909_v36 = vsel %vm382_vm1, %v3725_v41, %v3726_v23  ;;  %v10912_v45 = vsel %vm382_vm1, %v3726_v23, %v3728_v50 }
 0x29d   : > { %v3385_v42 = vpop.f32.mrf.mxu1  ;;  %8378 = vmatprep.mubr.msk.f32.mxu0 %vm3162_vm4, %v10909_v36  ;;  %v10916_v24 = vld [vmem:[#allocation2 + $0x60] sm:$0xff]  ;;  %v10918_v48 = vld [vmem:[#allocation2 + $0x68] sm:$0xff]  ;;  %v3733_v44 = vrot.slane %v10904_v31, 1 }
 0x29e   : > { %3582 = vst.msk [vmem:[#allocation2 + $0x91] sm:$0xff] %vm3162_vm4, %v3494_v8  ;;  %v3497_v53 = vmax.f32 %v3391_v2, 0.0  ;;  %v3386_v39 = vadd.f32 %v10815_v63, %v3385_v42  ;;  %8437 = vmatprep.mubr.msk.f32.mxu1 %vm3162_vm4, %v10916_v24  ;;  %v3730_v46 = vrot.slane %v10916_v24, 1  ;;  %v3731_v1 = vrot.slane %v10918_v48, 1  ;;  %8379 = vmatmul.mubr.msk.f32.gmra.mxu0 %vm3162_vm4, %v10912_v45 }
 0x29f   : > { %v8336_v60 = vpop.f32.mrf.mxu1  ;;  %8438 = vmatmul.mubr.msk.f32.gmra.mxu1 %vm3162_vm4, %v10918_v48  ;;  %v10931_v56 = vld [vmem:[#allocation2 + $0x88] sm:$0x3] }
 0x2a0   : > { %3585 = vst.msk [vmem:[#allocation2 + $0xb1] sm:$0xff] %vm3162_vm4, %v3497_v53  ;;  %v3496_v7 = vmax.f32 %v3386_v39, 0.0  ;;  %v3401_v55 = vadd.f32 %v8336_v60, %v10815_v63  ;;  %v10936_v62 = vsel %vm382_vm1, %v3730_v46, %v3731_v1  ;;  %v10939_v35 = vsel %vm382_vm1, %v3731_v1, %v3733_v44 }
 0x2a1   : > { %13000 = vst [vmem:[#allocation5_spill] sm:$0xff] %v10936_v62  ;;  %13001 = vst [vmem:[#allocation6_spill] sm:$0xff] %v10939_v35  ;;  %v3395_v57 = vpop.f32.mrf.mxu1  ;;  %8381 = vmatprep.mubr.msk.f32.mxu0 %vm3162_vm4, %v10936_v62  ;;  %v10943_v19 = vld [vmem:[#allocation2 + $0x78] sm:$0xff]  ;;  %v10945_v11 = vld [vmem:[#allocation2 + $0x80] sm:$0xff]  ;;  %v3738_v17 = vrot.slane %v10931_v56, 1 }
 0x2a2   : > { %3584 = vst.msk [vmem:[#allocation2 + $0xa9] sm:$0xff] %vm3162_vm4, %v3496_v7  ;;  %v3499_v21 = vmax.f32 %v3401_v55, 0.0  ;;  %v3396_v25 = vadd.f32 %v10815_v63, %v3395_v57  ;;  %8440 = vmatprep.mubr.msk.f32.mxu1 %vm3162_vm4, %v10943_v19  ;;  %v3735_v10 = vrot.slane %v10943_v19, 1  ;;  %v3736_v37 = vrot.slane %v10945_v11, 1  ;;  %8382 = vmatmul.mubr.msk.f32.gmra.mxu0 %vm3162_vm4, %v10939_v35 }
 0x2a3   : > { %v8339_v9 = vpop.f32.mrf.mxu1  ;;  %8441 = vmatmul.mubr.msk.f32.gmra.mxu1 %vm3162_vm4, %v10945_v11  ;;  %v10958_v30 = vld [vmem:[#allocation2 + $0xa0] sm:$0x3] }
 0x2a4   : > { %3587 = vst.msk [vmem:[#allocation2 + $0xc9] sm:$0xff] %vm3162_vm4, %v3499_v21  ;;  %v3498_v49 = vmax.f32 %v3396_v25, 0.0  ;;  %v3411_v38 = vadd.f32 %v8339_v9, %v10815_v63  ;;  %v10963_v58 = vsel %vm382_vm1, %v3735_v10, %v3736_v37  ;;  %v10966_v26 = vsel %vm382_vm1, %v3736_v37, %v3738_v17 }
 0x2a5   : > { %13002 = vst [vmem:[#allocation55_spill] sm:$0xff] %v10963_v58  ;;  %13003 = vst [vmem:[#allocation52_spill] sm:$0xff] %v10966_v26  ;;  %v3405_v54 = vpop.f32.mrf.mxu1  ;;  %8384 = vmatprep.mubr.msk.f32.mxu0 %vm3162_vm4, %v10963_v58  ;;  %v10970_v61 = vld [vmem:[#allocation2 + $0x90] sm:$0xff]  ;;  %v10972_v43 = vld [vmem:[#allocation2 + $0x98] sm:$0xff]  ;;  %v3743_v14 = vrot.slane %v10958_v30, 1 }
 0x2a6   : > { %3586 = vst.msk [vmem:[#allocation2 + $0xc1] sm:$0xff] %vm3162_vm4, %v3498_v49  ;;  %v3501_v27 = vmax.f32 %v3411_v38, 0.0  ;;  %v3406_v52 = vadd.f32 %v10815_v63, %v3405_v54  ;;  %8443 = vmatprep.mubr.msk.f32.mxu1 %vm3162_vm4, %v10970_v61  ;;  %v3740_v50 = vrot.slane %v10970_v61, 1  ;;  %v3741_v20 = vrot.slane %v10972_v43, 1  ;;  %8385 = vmatmul.mubr.msk.f32.gmra.mxu0 %vm3162_vm4, %v10966_v26 }
 0x2a7   : > { %v8342_v29 = vpop.f32.mrf.mxu1  ;;  %8444 = vmatmul.mubr.msk.f32.gmra.mxu1 %vm3162_vm4, %v10972_v43  ;;  %v10985_v41 = vld [vmem:[#allocation2 + $0xb8] sm:$0x3] }
 0x2a8   : > { %3589 = vst.msk [vmem:[#allocation2 + $0xe1] sm:$0xff] %vm3162_vm4, %v3501_v27  ;;  %v3500_v23 = vmax.f32 %v3406_v52, 0.0  ;;  %v3421_v12 = vadd.f32 %v8342_v29, %v10815_v63  ;;  %v10990_v8 = vsel %vm382_vm1, %v3740_v50, %v3741_v20  ;;  %v10993_v2 = vsel %vm382_vm1, %v3741_v20, %v3743_v14 }
 0x2a9   : > { %13004 = vst [vmem:[#allocation7_spill] sm:$0xff] %v10990_v8  ;;  %13005 = vst [vmem:[#allocation40_spill] sm:$0xff] %v10993_v2  ;;  %v3415_v42 = vpop.f32.mrf.mxu1  ;;  %8387 = vmatprep.mubr.msk.f32.mxu0 %vm3162_vm4, %v10990_v8  ;;  %v10997_v44 = vld [vmem:[#allocation2 + $0xa8] sm:$0xff]  ;;  %v10999_v53 = vld [vmem:[#allocation2 + $0xb0] sm:$0xff]  ;;  %v3748_v39 = vrot.slane %v10985_v41, 1 }
 0x2aa   : > { %3588 = vst.msk [vmem:[#allocation2 + $0xd9] sm:$0xff] %vm3162_vm4, %v3500_v23  ;;  %v3503_v46 = vmax.f32 %v3421_v12, 0.0  ;;  %v3416_v1 = vadd.f32 %v10815_v63, %v3415_v42  ;;  %8446 = vmatprep.mubr.msk.f32.mxu1 %vm3162_vm4, %v10997_v44  ;;  %v3745_v60 = vrot.slane %v10997_v44, 1  ;;  %v3746_v7 = vrot.slane %v10999_v53, 1  ;;  %8388 = vmatmul.mubr.msk.f32.gmra.mxu0 %vm3162_vm4, %v10993_v2 }
 0x2ab   : > { %v8345_v55 = vpop.f32.mrf.mxu1  ;;  %8447 = vmatmul.mubr.msk.f32.gmra.mxu1 %vm3162_vm4, %v10999_v53  ;;  %v11012_v57 = vld [vmem:[#allocation2 + $0xd0] sm:$0x3] }
 0x2ac   : > { %3591 = vst.msk [vmem:[#allocation2 + $0xf9] sm:$0xff] %vm3162_vm4, %v3503_v46  ;;  %v3502_v17 = vmax.f32 %v3416_v1, 0.0  ;;  %v3431_v21 = vadd.f32 %v8345_v55, %v10815_v63  ;;  %v11017_v25 = vsel %vm382_vm1, %v3745_v60, %v3746_v7  ;;  %v11020_v10 = vsel %vm382_vm1, %v3746_v7, %v3748_v39 }
 0x2ad   : > { %13006 = vst [vmem:[#allocation9_spill] sm:$0xff] %v11017_v25  ;;  %13007 = vst [vmem:[#allocation42_spill] sm:$0xff] %v11020_v10  ;;  %v3425_v37 = vpop.f32.mrf.mxu1  ;;  %8390 = vmatprep.mubr.msk.f32.mxu0 %vm3162_vm4, %v11017_v25  ;;  %v11024_v9 = vld [vmem:[#allocation2 + $0xc0] sm:$0xff]  ;;  %v11026_v49 = vld [vmem:[#allocation2 + $0xc8] sm:$0xff]  ;;  %v3753_v38 = vrot.slane %v11012_v57, 1 }
 0x2ae   : > { %3590 = vst.msk [vmem:[#allocation2 + $0xf1] sm:$0xff] %vm3162_vm4, %v3502_v17  ;;  %v3505_v54 = vmax.f32 %v3431_v21, 0.0  ;;  %v3426_v14 = vadd.f32 %v10815_v63, %v3425_v37  ;;  %8449 = vmatprep.mubr.msk.f32.mxu1 %vm3162_vm4, %v11024_v9  ;;  %v3750_v27 = vrot.slane %v11024_v9, 1  ;;  %v3751_v52 = vrot.slane %v11026_v49, 1  ;;  %8391 = vmatmul.mubr.msk.f32.gmra.mxu0 %vm3162_vm4, %v11020_v10 }
 0x2af   : > { %v8348_v50 = vpop.f32.mrf.mxu1  ;;  %8450 = vmatmul.mubr.msk.f32.gmra.mxu1 %vm3162_vm4, %v11026_v49  ;;  %v11039_v20 = vld [vmem:[#allocation2 + $0xe8] sm:$0x3] }
 0x2b0   : > { %3593 = vst.msk [vmem:[#allocation2 + $0x111] sm:$0xff] %vm3162_vm4, %v3505_v54  ;;  %v3504_v29 = vmax.f32 %v3426_v14, 0.0  ;;  %v3441_v23 = vadd.f32 %v8348_v50, %v10815_v63  ;;  %v11044_v12 = vsel %vm382_vm1, %v3750_v27, %v3751_v52  ;;  %v11047_v42 = vsel %vm382_vm1, %v3751_v52, %v3753_v38 }
 0x2b1   : > { %13008 = vst [vmem:[#allocation14_spill] sm:$0xff] %v11044_v12  ;;  %13009 = vst [vmem:[#allocation57_spill] sm:$0xff] %v11047_v42  ;;  %v3435_v39 = vpop.f32.mrf.mxu1  ;;  %8393 = vmatprep.mubr.msk.f32.mxu0 %vm3162_vm4, %v11044_v12  ;;  %v11051_v46 = vld [vmem:[#allocation2 + $0xd8] sm:$0xff]  ;;  %v11053_v1 = vld [vmem:[#allocation2 + $0xe0] sm:$0xff]  ;;  %v3758_v60 = vrot.slane %v11039_v20, 1 }
 0x2b2   : > { %3592 = vst.msk [vmem:[#allocation2 + $0x109] sm:$0xff] %vm3162_vm4, %v3504_v29  ;;  %v3507_v7 = vmax.f32 %v3441_v23, 0.0  ;;  %v3436_v55 = vadd.f32 %v10815_v63, %v3435_v39  ;;  %8452 = vmatprep.mubr.msk.f32.mxu1 %vm3162_vm4, %v11051_v46  ;;  %v3755_v17 = vrot.slane %v11051_v46, 1  ;;  %v3756_v21 = vrot.slane %v11053_v1, 1  ;;  %8394 = vmatmul.mubr.msk.f32.gmra.mxu0 %vm3162_vm4, %v11047_v42 }
 0x2b3   : > { %v8351_v37 = vpop.f32.mrf.mxu1  ;;  %8453 = vmatmul.mubr.msk.f32.gmra.mxu1 %vm3162_vm4, %v11053_v1  ;;  %v11066_v38 = vld [vmem:[#allocation2 + $0x100] sm:$0x3] }
 0x2b4   : > { %3595 = vst.msk [vmem:[#allocation2 + $0x129] sm:$0xff] %vm3162_vm4, %v3507_v7  ;;  %v3506_v54 = vmax.f32 %v3436_v55, 0.0  ;;  %v3451_v14 = vadd.f32 %v8351_v37, %v10815_v63  ;;  %v11071_v27 = vsel %vm382_vm1, %v3755_v17, %v3756_v21  ;;  %v11074_v52 = vsel %vm382_vm1, %v3756_v21, %v3758_v60 }
 0x2b5   : > { %13010 = vst [vmem:[#allocation53_spill] sm:$0xff] %v11071_v27  ;;  %13011 = vst [vmem:[#allocation8_spill] sm:$0xff] %v11074_v52  ;;  %v3445_v50 = vpop.f32.mrf.mxu1  ;;  %8396 = vmatprep.mubr.msk.f32.mxu0 %vm3162_vm4, %v11071_v27  ;;  %v11078_v29 = vld [vmem:[#allocation2 + $0xf0] sm:$0xff]  ;;  %v11080_v23 = vld [vmem:[#allocation2 + $0xf8] sm:$0xff]  ;;  %v3763_v39 = vrot.slane %v11066_v38, 1 }
 0x2b6   : > { %3594 = vst.msk [vmem:[#allocation2 + $0x121] sm:$0xff] %vm3162_vm4, %v3506_v54  ;;  %v3509_v7 = vmax.f32 %v3451_v14, 0.0  ;;  %v3446_v55 = vadd.f32 %v10815_v63, %v3445_v50  ;;  %8455 = vmatprep.mubr.msk.f32.mxu1 %vm3162_vm4, %v11078_v29  ;;  %v3760_v60 = vrot.slane %v11078_v29, 1  ;;  %v3761_v17 = vrot.slane %v11080_v23, 1  ;;  %8397 = vmatmul.mubr.msk.f32.gmra.mxu0 %vm3162_vm4, %v11074_v52 }
 0x2b7   : > { %v8354_v21 = vpop.f32.mrf.mxu1  ;;  %8456 = vmatmul.mubr.msk.f32.gmra.mxu1 %vm3162_vm4, %v11080_v23  ;;  %v11093_v37 = vld [vmem:[#allocation2 + $0x118] sm:$0x3] }
 0x2b8   : > { %3597 = vst.msk [vmem:[#allocation2 + $0x141] sm:$0xff] %vm3162_vm4, %v3509_v7  ;;  %v3508_v54 = vmax.f32 %v3446_v55, 0.0  ;;  %v3461_v14 = vadd.f32 %v8354_v21, %v10815_v63  ;;  %v11098_v50 = vsel %vm382_vm1, %v3760_v60, %v3761_v17  ;;  %v11101_v27 = vsel %vm382_vm1, %v3761_v17, %v3763_v39 }
 0x2b9   : > { %13012 = vst [vmem:[#allocation54_spill] sm:$0xff] %v11098_v50  ;;  %13013 = vst [vmem:[#allocation10_spill] sm:$0xff] %v11101_v27  ;;  %v3455_v42 = vpop.f32.mrf.mxu1  ;;  %8399 = vmatprep.mubr.msk.f32.mxu0 %vm3162_vm4, %v11098_v50  ;;  %v11105_v52 = vld [vmem:[#allocation2 + $0x108] sm:$0xff]  ;;  %v11107_v12 = vld [vmem:[#allocation2 + $0x110] sm:$0xff]  ;;  %v3768_v10 = vrot.slane %v11093_v37, 1 }
 0x2ba   : > { %3596 = vst.msk [vmem:[#allocation2 + $0x139] sm:$0xff] %vm3162_vm4, %v3508_v54  ;;  %v3511_v7 = vmax.f32 %v3461_v14, 0.0  ;;  %v3456_v55 = vadd.f32 %v10815_v63, %v3455_v42  ;;  %8458 = vmatprep.mubr.msk.f32.mxu1 %vm3162_vm4, %v11105_v52  ;;  %v3765_v39 = vrot.slane %v11105_v52, 1  ;;  %v3766_v60 = vrot.slane %v11107_v12, 1  ;;  %8400 = vmatmul.mubr.msk.f32.gmra.mxu0 %vm3162_vm4, %v11101_v27 }
 0x2bb   : > { %v8357_v17 = vpop.f32.mrf.mxu1  ;;  %8459 = vmatmul.mubr.msk.f32.gmra.mxu1 %vm3162_vm4, %v11107_v12  ;;  %v11120_v21 = vld [vmem:[#allocation2 + $0x130] sm:$0x3] }
 0x2bc   : > { %3599 = vst.msk [vmem:[#allocation2 + $0x159] sm:$0xff] %vm3162_vm4, %v3511_v7  ;;  %v3510_v54 = vmax.f32 %v3456_v55, 0.0  ;;  %v3471_v42 = vadd.f32 %v8357_v17, %v10815_v63  ;;  %v11125_v14 = vsel %vm382_vm1, %v3765_v39, %v3766_v60  ;;  %v11128_v50 = vsel %vm382_vm1, %v3766_v60, %v3768_v10 }
 0x2bd   : > { %13014 = vst [vmem:[#allocation59_spill] sm:$0xff] %v11125_v14  ;;  %13015 = vst [vmem:[#allocation39_spill] sm:$0xff] %v11128_v50  ;;  %v3465_v25 = vpop.f32.mrf.mxu1  ;;  %8402 = vmatprep.mubr.msk.f32.mxu0 %vm3162_vm4, %v11125_v14  ;;  %v11132_v27 = vld [vmem:[#allocation2 + $0x120] sm:$0xff]  ;;  %v11134_v2 = vld [vmem:[#allocation2 + $0x128] sm:$0xff]  ;;  %v3773_v8 = vrot.slane %v11120_v21, 1 }
 0x2be   : > { %3598 = vst.msk [vmem:[#allocation2 + $0x151] sm:$0xff] %vm3162_vm4, %v3510_v54  ;;  %v3513_v7 = vmax.f32 %v3471_v42, 0.0  ;;  %v3466_v55 = vadd.f32 %v10815_v63, %v3465_v25  ;;  %8461 = vmatprep.mubr.msk.f32.mxu1 %vm3162_vm4, %v11132_v27  ;;  %v3770_v10 = vrot.slane %v11132_v27, 1  ;;  %v3771_v39 = vrot.slane %v11134_v2, 1  ;;  %8403 = vmatmul.mubr.msk.f32.gmra.mxu0 %vm3162_vm4, %v11128_v50 }
 0x2bf   : > { %v8360_v60 = vpop.f32.mrf.mxu1  ;;  %8462 = vmatmul.mubr.msk.f32.gmra.mxu1 %vm3162_vm4, %v11134_v2  ;;  %v11147_v17 = vld [vmem:[#allocation2 + $0x148] sm:$0x3] }
 0x2c0   : > { %3601 = vst.msk [vmem:[#allocation2 + $0x171] sm:$0xff] %vm3162_vm4, %v3513_v7  ;;  %v3512_v54 = vmax.f32 %v3466_v55, 0.0  ;;  %v3481_v25 = vadd.f32 %v8360_v60, %v10815_v63  ;;  %v11152_v42 = vsel %vm382_vm1, %v3770_v10, %v3771_v39  ;;  %v11155_v14 = vsel %vm382_vm1, %v3771_v39, %v3773_v8 }
 0x2c1   : > { %13016 = vst [vmem:[#allocation41_spill] sm:$0xff] %v11152_v42  ;;  %13017 = vst [vmem:[#allocation12_spill] sm:$0xff] %v11155_v14  ;;  %v3475_v26 = vpop.f32.mrf.mxu1  ;;  %8405 = vmatprep.mubr.msk.f32.mxu0 %vm3162_vm4, %v11152_v42  ;;  %v11159_v50 = vld [vmem:[#allocation2 + $0x138] sm:$0xff]  ;;  %v11161_v58 = vld [vmem:[#allocation2 + $0x140] sm:$0xff]  ;;  %v3778_v35 = vrot.slane %v11147_v17, 1 }
 0x2c2   : > { %13018 = vst [vmem:[#allocation56_spill] sm:$0xff] %v11161_v58  ;;  %3600 = vst.msk [vmem:[#allocation2 + $0x169] sm:$0xff] %vm3162_vm4, %v3512_v54  ;;  %v3515_v7 = vmax.f32 %v3481_v25, 0.0  ;;  %v3476_v55 = vadd.f32 %v10815_v63, %v3475_v26  ;;  %8464 = vmatprep.mubr.msk.f32.mxu1 %vm3162_vm4, %v11159_v50  ;;  %v3775_v8 = vrot.slane %v11159_v50, 1  ;;  %v3776_v10 = vrot.slane %v11161_v58, 1  ;;  %8406 = vmatmul.mubr.msk.f32.gmra.mxu0 %vm3162_vm4, %v11155_v14 }
 0x2c3   : > { %8465 = vmatmul.mubr.msk.f32.gmra.mxu1 %vm3162_vm4, %v11161_v58  ;;  %v11174_v39 = vld [vmem:[#allocation2 + $0x160] sm:$0x3] }
 0x2c4   : > { %3603 = vst.msk [vmem:[#allocation2 + $0x189] sm:$0xff] %vm3162_vm4, %v3515_v7  ;;  %v3514_v60 = vmax.f32 %v3476_v55, 0.0  ;;  %v11178_v63 = vsel %vm382_vm1, %v3775_v8, %v3776_v10  ;;  %v11181_v26 = vsel %vm382_vm1, %v3776_v10, %v3778_v35  ;;  %v3783_v8 = vrot.slane %v11174_v39, 1 }
 0x2c5   : > { %13019 = vst [vmem:[#allocation61_spill] sm:$0xff] %v11178_v63  ;;  %13020 = vst [vmem:[#allocation21_spill] sm:$0xff] %v11181_v26  ;;  %8408 = vmatprep.mubr.msk.f32.mxu0 %vm3162_vm4, %v11178_v63  ;;  %v11185_v54 = vld [vmem:[#allocation2 + $0x150] sm:$0xff]  ;;  %v11187_v25 = vld [vmem:[#allocation2 + $0x158] sm:$0xff]  ;;  %v4373_v63 = vrot.slane %v10762_v32, 2 }
 0x2c6   : > { %13021 = vst [vmem:[#allocation16_spill] sm:$0xff] %v11185_v54  ;;  %13022 = vst [vmem:[#allocation63_spill] sm:$0xff] %v11187_v25  ;;  %8467 = vmatprep.mubr.msk.f32.mxu1 %vm3162_vm4, %v11185_v54  ;;  %v3780_v7 = vrot.slane %v11185_v54, 1  ;;  %v3781_v55 = vrot.slane %v11187_v25, 1  ;;  %8409 = vmatmul.mubr.msk.f32.gmra.mxu0 %vm3162_vm4, %v11181_v26  ;;  %v4374_v26 = vrot.slane %v10764_v40, 2 }
 0x2c7   : > { %3602 = vst.msk [vmem:[#allocation2 + $0x181] sm:$0xff] %vm3162_vm4, %v3514_v60  ;;  %8468 = vmatmul.mubr.msk.f32.gmra.mxu1 %vm3162_vm4, %v11187_v25  ;;  %v11199_v35 = vld [vmem:[#allocation2 + $0x178] sm:$0x3] }
 0x2c8   : > { %v11202_v10 = vsel %vm382_vm1, %v3780_v7, %v3781_v55  ;;  %v11205_v60 = vsel %vm382_vm1, %v3781_v55, %v3783_v8  ;;  %v3788_v55 = vrot.slane %v11199_v35, 1  ;;  %v4376_v8 = vrot.slane %v10773_v4, 2 }
 0x2c9   : > { %13023 = vst [vmem:[#allocation58_spill] sm:$0xff] %v11202_v10  ;;  %13024 = vst [vmem:[#allocation11_spill] sm:$0xff] %v11205_v60  ;;  %8411 = vmatprep.mubr.msk.f32.mxu0 %vm3162_vm4, %v11202_v10  ;;  %v11210_v14 = vld [vmem:[#allocation2 + $0x168] sm:$0xff]  ;;  %v11212_v42 = vld [vmem:[#allocation2 + $0x170] sm:$0xff]  ;;  %v4375_v10 = vsel %vm1051_vm3, %v4373_v63, %v4374_v26 }
 0x2ca   : > { %8470 = vmatprep.mubr.msk.f32.mxu1 %vm3162_vm4, %v11210_v14  ;;  %v3785_v7 = vrot.slane %v11210_v14, 1  ;;  %v3786_v62 = vrot.slane %v11212_v42, 1  ;;  %8412 = vmatmul.mubr.msk.f32.gmra.mxu0 %vm3162_vm4, %v11205_v60  ;;  %v4378_v60 = vrot.slane %v10837_v59, 2  ;;  %v4377_v4 = vsel %vm1051_vm3, %v4374_v26, %v4376_v8 }
 0x2cb   : > { %8471 = vmatmul.mubr.msk.f32.gmra.mxu1 %vm3162_vm4, %v11212_v42  ;;  %v4383_v26 = vrot.slane %v10860_v22, 2  ;;  %v4389_v8 = vrot.slane %v10891_v6, 2 }
 0x2cc   : > { %8537 = vmatprep.mubr.msk.f32.mxu1 %vm3162_vm4, %v10837_v59  ;;  %v11227_v32 = vsel %vm382_vm1, %v3785_v7, %v3786_v62  ;;  %v11230_v40 = vsel %vm382_vm1, %v3786_v62, %v3788_v55  ;;  %v4379_v7 = vrot.slane %v10839_v51, 2  ;;  %v7052_v62 = vld [vmem:[%s12560_s5 + $0xb0] sm:$0xff]  ;;  %v8427_v59 = vpop.f32.mrf.mxu1 }
 0x2cd   : > { %13025 = vst [vmem:[#allocation17_spill] sm:$0xff] %v11230_v40  ;;  %8414 = vmatprep.mubr.msk.f32.mxu0 %vm3162_vm4, %v11227_v32  ;;  %v8371_v63 = vpop.f32.mrf.mxu0 }
 0x2ce   : > { %8415 = vmatmul.mubr.msk.f32.gmra.mxu0 %vm3162_vm4, %v11230_v40  ;;  %v11250_v55 = vadd.f32 %v8427_v59, %v8371_v63  ;;  %v11257_v40 = vsel %vm1051_vm3, %v4378_v60, %v4379_v7  ;;  %v4394_v59 = vrot.slane %v10918_v48, 2  ;;  %v4391_v63 = vrot.slane %v10877_v0, 2 }
 0x2cf   : > { %8538 = vmatmul.mubr.msk.f32.vlgmr.msra.gmra.mxu1 %vm3162_vm4, %v10839_v51  ;;  %8481 = vmatprep.mubr.msk.f32.mxu0 %vm3162_vm4, %v4375_v10  ;;  %v7016_v51 = vld [vmem:[%s12560_s5 + $0x90] sm:$0xff]  ;;  %v4384_v10 = vrot.slane %v10862_v33, 2 }
 0x2d0   : > { %8540 = vmatprep.mubr.msk.f32.mxu1 %vm3162_vm4, %v10860_v22  ;;  %8642 = vmatpush3.msra.mxu1 %v10822_v3  ;;  %13026 = vst [vmem:[#allocation13_spill] sm:$0xff] %v11250_v55  ;;  %v4381_v3 = vrot.slane %v10835_v47, 2  ;;  %v7015_v22 = vld [vmem:[%s12560_s5 + $0x88] sm:$0xff]  ;;  %v4439_v55 = vrot.slane %v11161_v58, 2 }
 0x2d1   : > { %8643 = vmatprep.subr.mxu1 %v7052_v62  ;;  %v11281_v47 = vsel %vm1051_vm3, %v4383_v26, %v4384_v10  ;;  %v4398_v26 = vrot.slane %v10943_v19, 2 }
 0x2d2   : > { %8482 = vmatmul.mubr.msk.f32.vlgmr.msra.gmra.mxu0 %vm3162_vm4, %v4377_v4  ;;  %v11270_v60 = vsel %vm1051_vm3, %v4379_v7, %v4381_v3  ;;  %8644 = vmatpush3.msra.mxu1 %v7052_v62  ;;  %v4386_v7 = vrot.slane %v10850_v18, 2  ;;  %v4393_v4 = vrot.slane %v10916_v24, 2  ;;  %v4396_v3 = vrot.slane %v10904_v31, 2 }
 0x2d3   : > { %8541 = vmatmul.mubr.msk.f32.gmra.mxu1 %vm3162_vm4, %v10862_v33  ;;  %8586 = vmatpush3.msra.mxu0 %v10809_v34  ;;  %v7051_v34 = vld [vmem:[%s12560_s5 + $0xa8] sm:$0xff]  ;;  %v4388_v33 = vrot.slane %v10889_v5, 2  ;;  %v4404_v31 = vrot.slane %v10972_v43, 2 }
 0x2d4   : > { %8484 = vmatprep.mubr.msk.f32.mxu0 %vm3162_vm4, %v11257_v40  ;;  %8543 = vmatprep.mubr.msk.f32.mxu1 %vm3162_vm4, %v10889_v5  ;;  %v11293_v62 = vsel %vm1051_vm3, %v4384_v10, %v4386_v7  ;;  %v7014_v5 = vld [vmem:[%s12560_s5 + $0x80] sm:$0xff]  ;;  %v11331_v0 = vsel %vm1051_vm3, %v4393_v4, %v4394_v59  ;;  %v4399_v10 = vrot.slane %v10945_v11, 2 }
 0x2d5   : > { %8587 = vmatprep.subr.mxu0 %v7016_v51  ;;  %8645 = vmatprep.subr.mxu1 %v7051_v34  ;;  %v11304_v18 = vsel %vm1051_vm3, %v4388_v33, %v4389_v8  ;;  %v4401_v33 = vrot.slane %v10931_v56, 2  ;;  %v4406_v56 = vrot.slane %v10958_v30, 2  ;;  %v4411_v30 = vrot.slane %v10985_v41, 2 }
 0x2d6   : > { %8588 = vmatpush3.msra.mxu0 %v7016_v51  ;;  %8646 = vmatpush3.msra.mxu1 %v7051_v34  ;;  %v11316_v51 = vsel %vm1051_vm3, %v4389_v8, %v4391_v63  ;;  %v4403_v34 = vrot.slane %v10970_v61, 2  ;;  %v4413_v63 = vrot.slane %v11024_v9, 2  ;;  %v4416_v41 = vrot.slane %v11012_v57, 2 }
 0x2d7   : > { %8485 = vmatmul.mubr.msk.f32.gmra.mxu0 %vm3162_vm4, %v11270_v60  ;;  %8544 = vmatmul.mubr.msk.f32.gmra.mxu1 %vm3162_vm4, %v10891_v6  ;;  %v7050_v6 = vld [vmem:[%s12560_s5 + $0xa0] sm:$0xff]  ;;  %v11362_v8 = vsel %vm1051_vm3, %v4399_v10, %v4401_v33  ;;  %v11379_v4 = vsel %vm1051_vm3, %v4404_v31, %v4406_v56  ;;  %v4424_v56 = vrot.slane %v11080_v23, 2  ;;  %v4421_v57 = vrot.slane %v11039_v20, 2 }
 0x2d8   : > { %8487 = vmatprep.mubr.msk.f32.mxu0 %vm3162_vm4, %v11281_v47  ;;  %8546 = vmatprep.mubr.msk.f32.mxu1 %vm3162_vm4, %v10916_v24  ;;  %v11321_v24 = vld [vmem:[%s12560_s5 + $0xd8] sm:$0xff]  ;;  %13029 = vst [vmem:[#allocation65_spill] sm:$0xff] %v11362_v8  ;;  %v11367_v7 = vsel %vm1051_vm3, %v4403_v34, %v4404_v31  ;;  %13031 = vst [vmem:[#allocation18_spill] sm:$0xff] %v11379_v4  ;;  %v4418_v34 = vrot.slane %v11051_v46, 2  ;;  %v4419_v31 = vrot.slane %v11053_v1, 2  ;;  %v4426_v20 = vrot.slane %v11066_v38, 2 }
 0x2d9   : > { %8589 = vmatprep.subr.mxu0 %v7015_v22  ;;  %8647 = vmatprep.subr.mxu1 %v7050_v6  ;;  %13030 = vst [vmem:[#allocation60_spill] sm:$0xff] %v11367_v7  ;;  %v4431_v38 = vrot.slane %v11093_v37, 2  ;;  %v4436_v37 = vrot.slane %v11120_v21, 2  ;;  %v4441_v21 = vrot.slane %v11147_v17, 2  ;;  %v4446_v17 = vrot.slane %v11174_v39, 2 }
 0x2da   : > { %8590 = vmatpush3.msra.mxu0 %v7015_v22  ;;  %8648 = vmatpush3.msra.mxu1 %v7050_v6  ;;  %v11345_v22 = vsel %vm1051_vm3, %v4394_v59, %v4396_v3  ;;  %v4409_v6 = vrot.slane %v10999_v53, 2 }
 0x2db   : > { %8488 = vmatmul.mubr.msk.f32.gmra.mxu0 %vm3162_vm4, %v11293_v62  ;;  %8547 = vmatmul.mubr.msk.f32.gmra.mxu1 %vm3162_vm4, %v10918_v48  ;;  %v11326_v48 = vld [vmem:[%s12560_s5 + $0xf8] sm:$0xff]  ;;  %13027 = vst [vmem:[#allocation25_spill] sm:$0xff] %v11345_v22 }
 0x2dc   : > { %8490 = vmatprep.mubr.msk.f32.mxu0 %vm3162_vm4, %v11304_v18  ;;  %8549 = vmatprep.mubr.msk.f32.mxu1 %vm3162_vm4, %v10943_v19 }
 0x2dd   : > { %8591 = vmatprep.subr.mxu0 %v7014_v5  ;;  %8753 = vmatprep.subr.mxu1 %v11326_v48 }
 0x2de   : > { %8592 = vmatpush3.msra.mxu0 %v7014_v5  ;;  %v4408_v5 = vrot.slane %v10997_v44, 2 }
 0x2df   : > { %8491 = vmatmul.mubr.msk.f32.gmra.mxu0 %vm3162_vm4, %v11316_v51  ;;  %8550 = vmatmul.mubr.msk.f32.gmra.mxu1 %vm3162_vm4, %v10945_v11  ;;  %v11350_v11 = vsel %vm1051_vm3, %v4398_v26, %v4399_v10  ;;  %v4414_v26 = vrot.slane %v11026_v49, 2  ;;  %v11396_v10 = vsel %vm1051_vm3, %v4409_v6, %v4411_v30  ;;  %v4428_v30 = vrot.slane %v11105_v52, 2 }
 0x2e0   : > { %8493 = vmatprep.mubr.msk.f32.mxu0 %vm3162_vm4, %v11331_v0  ;;  %8552 = vmatprep.mubr.msk.f32.mxu1 %vm3162_vm4, %v10970_v61  ;;  %13028 = vst [vmem:[#allocation28_spill] sm:$0xff] %v11350_v11  ;;  %v11384_v59 = vsel %vm1051_vm3, %v4408_v5, %v4409_v6  ;;  %13033 = vst [vmem:[#allocation23_spill] sm:$0xff] %v11396_v10  ;;  %v11418_v5 = vsel %vm1051_vm3, %v4418_v34, %v4419_v31  ;;  %v4423_v6 = vrot.slane %v11078_v29, 2 }
 0x2e1   : > { %8697 = vmatprep.subr.mxu0 %v11321_v24  ;;  %13032 = vst [vmem:[#allocation62_spill] sm:$0xff] %v11384_v59  ;;  %v11401_v3 = vsel %vm1051_vm3, %v4413_v63, %v4414_v26  ;;  %v11413_v33 = vsel %vm1051_vm3, %v4414_v26, %v4416_v41  ;;  %13036 = vst [vmem:[#allocation22_spill] sm:$0xff] %v11418_v5  ;;  %v11430_v63 = vsel %vm1051_vm3, %v4419_v31, %v4421_v57 }
 0x2e2   : > { %13034 = vst [vmem:[#allocation67_spill] sm:$0xff] %v11401_v3  ;;  %13035 = vst [vmem:[#allocation43_spill] sm:$0xff] %v11413_v33  ;;  %v11435_v26 = vsel %vm1051_vm3, %v4423_v6, %v4424_v56  ;;  %v4429_v34 = vrot.slane %v11107_v12, 2  ;;  %v11447_v31 = vsel %vm1051_vm3, %v4424_v56, %v4426_v20  ;;  %v4433_v6 = vrot.slane %v11132_v27, 2 }
 0x2e3   : > { %8494 = vmatmul.mubr.msk.f32.gmra.mxu0 %vm3162_vm4, %v11345_v22  ;;  %8553 = vmatmul.mubr.msk.f32.gmra.mxu1 %vm3162_vm4, %v10972_v43  ;;  %13037 = vst [vmem:[#allocation26_spill] sm:$0xff] %v11430_v63  ;;  %13038 = vst [vmem:[#allocation64_spill] sm:$0xff] %v11435_v26  ;;  %v4434_v57 = vrot.slane %v11134_v2, 2  ;;  %v4438_v20 = vrot.slane %v11159_v50, 2 }
 0x2e4   : > { %8496 = vmatprep.mubr.msk.f32.mxu0 %vm3162_vm4, %v11350_v11  ;;  %8555 = vmatprep.mubr.msk.f32.mxu1 %vm3162_vm4, %v10997_v44  ;;  %13039 = vst [vmem:[#allocation69_spill] sm:$0xff] %v11447_v31  ;;  %v11452_v41 = vsel %vm1051_vm3, %v4428_v30, %v4429_v34  ;;  %v11464_v56 = vsel %vm1051_vm3, %v4429_v34, %v4431_v38  ;;  %v4443_v38 = vrot.slane %v11185_v54, 2 }
 0x2e5   : > { %13040 = vst [vmem:[#allocation15_spill] sm:$0xff] %v11452_v41  ;;  %13041 = vst [vmem:[#allocation30_spill] sm:$0xff] %v11464_v56  ;;  %v11469_v30 = vsel %vm1051_vm3, %v4433_v6, %v4434_v57  ;;  %v11481_v34 = vsel %vm1051_vm3, %v4434_v57, %v4436_v37  ;;  %v11486_v6 = vsel %vm1051_vm3, %v4438_v20, %v4439_v55  ;;  %v11507_v37 = vld [vmem:[#allocation2 + $0x180] sm:$0xff] }
 0x2e6   : > { %13042 = vst [vmem:[#allocation71_spill] sm:$0xff] %v11469_v30  ;;  %13043 = vst [vmem:[#allocation66_spill] sm:$0xff] %v11481_v34  ;;  %v11498_v57 = vsel %vm1051_vm3, %v4439_v55, %v4441_v21 }
 0x2e7   : > { %8497 = vmatmul.mubr.msk.f32.gmra.mxu0 %vm3162_vm4, %v11362_v8  ;;  %8556 = vmatmul.mubr.msk.f32.gmra.mxu1 %vm3162_vm4, %v10999_v53  ;;  %13044 = vst [vmem:[#allocation20_spill] sm:$0xff] %v11486_v6  ;;  %13045 = vst [vmem:[#allocation29_spill] sm:$0xff] %v11498_v57 }
 0x2e8   : > { %8499 = vmatprep.mubr.msk.f32.mxu0 %vm3162_vm4, %v11367_v7  ;;  %8558 = vmatprep.mubr.msk.f32.mxu1 %vm3162_vm4, %v11024_v9 }
 0x2eb   : > { %8500 = vmatmul.mubr.msk.f32.gmra.mxu0 %vm3162_vm4, %v11379_v4  ;;  %8559 = vmatmul.mubr.msk.f32.gmra.mxu1 %vm3162_vm4, %v11026_v49 }
 0x2ec   : > { %8502 = vmatprep.mubr.msk.f32.mxu0 %vm3162_vm4, %v11384_v59  ;;  %8561 = vmatprep.mubr.msk.f32.mxu1 %vm3162_vm4, %v11051_v46 }
 0x2ef   : > { %8503 = vmatmul.mubr.msk.f32.gmra.mxu0 %vm3162_vm4, %v11396_v10  ;;  %8562 = vmatmul.mubr.msk.f32.gmra.mxu1 %vm3162_vm4, %v11053_v1 }
 0x2f0   : > { %8505 = vmatprep.mubr.msk.f32.mxu0 %vm3162_vm4, %v11401_v3  ;;  %8564 = vmatprep.mubr.msk.f32.mxu1 %vm3162_vm4, %v11078_v29 }
 0x2f3   : > { %8506 = vmatmul.mubr.msk.f32.gmra.mxu0 %vm3162_vm4, %v11413_v33  ;;  %8565 = vmatmul.mubr.msk.f32.gmra.mxu1 %vm3162_vm4, %v11080_v23 }
 0x2f4   : > { %8508 = vmatprep.mubr.msk.f32.mxu0 %vm3162_vm4, %v11418_v5  ;;  %8567 = vmatprep.mubr.msk.f32.mxu1 %vm3162_vm4, %v11105_v52 }
 0x2f7   : > { %8509 = vmatmul.mubr.msk.f32.gmra.mxu0 %vm3162_vm4, %v11430_v63  ;;  %8568 = vmatmul.mubr.msk.f32.gmra.mxu1 %vm3162_vm4, %v11107_v12 }
 0x2f8   : > { %8511 = vmatprep.mubr.msk.f32.mxu0 %vm3162_vm4, %v11435_v26  ;;  %8570 = vmatprep.mubr.msk.f32.mxu1 %vm3162_vm4, %v11132_v27 }
 0x2fb   : > { %8512 = vmatmul.mubr.msk.f32.gmra.mxu0 %vm3162_vm4, %v11447_v31  ;;  %8571 = vmatmul.mubr.msk.f32.gmra.mxu1 %vm3162_vm4, %v11134_v2 }
 0x2fc   : > { %8514 = vmatprep.mubr.msk.f32.mxu0 %vm3162_vm4, %v11452_v41  ;;  %8573 = vmatprep.mubr.msk.f32.mxu1 %vm3162_vm4, %v11159_v50 }
 0x2ff   : > { %8515 = vmatmul.mubr.msk.f32.gmra.mxu0 %vm3162_vm4, %v11464_v56  ;;  %8574 = vmatmul.mubr.msk.f32.gmra.mxu1 %vm3162_vm4, %v11161_v58  ;;  %v4444_v58 = vrot.slane %v11187_v25, 2 }
 0x300   : > { %8517 = vmatprep.mubr.msk.f32.mxu0 %vm3162_vm4, %v11469_v30  ;;  %8576 = vmatprep.mubr.msk.f32.mxu1 %vm3162_vm4, %v11185_v54  ;;  %v4449_v54 = vrot.slane %v11212_v42, 2 }
 0x301   : > { %v11503_v20 = vsel %vm1051_vm3, %v4443_v38, %v4444_v58  ;;  %v11517_v55 = vsel %vm1051_vm3, %v4444_v58, %v4446_v17  ;;  %v11519_v38 = vld [vmem:[#allocation2 + $0x188] sm:$0xff]  ;;  %v4451_v58 = vrot.slane %v11199_v35, 2  ;;  %v7086_v35 = vld [vmem:[%s12560_s5 + $0xc0] sm:$0xff]  ;;  %v13052_v17 = vld [vmem:[#allocation55_spill] sm:$0xff] }
 0x302   : > { %13046 = vst [vmem:[#allocation36_spill] sm:$0xff] %v11503_v20  ;;  %13047 = vst [vmem:[#allocation32_spill] sm:$0xff] %v11517_v55 }
 0x303   : > { %8518 = vmatmul.mubr.msk.f32.gmra.mxu0 %vm3162_vm4, %v11481_v34  ;;  %8577 = vmatmul.mubr.msk.f32.gmra.mxu1 %vm3162_vm4, %v11187_v25  ;;  %v4448_v25 = vrot.slane %v11210_v14, 2  ;;  %v11534_v39 = vsel %vm1051_vm3, %v4449_v54, %v4451_v58  ;;  %v13053_v58 = vld [vmem:[#allocation52_spill] sm:$0xff] }
 0x304   : > { %8520 = vmatprep.mubr.msk.f32.mxu0 %vm3162_vm4, %v11486_v6  ;;  %8579 = vmatprep.mubr.msk.f32.mxu1 %vm3162_vm4, %v11210_v14  ;;  %13049 = vst [vmem:[#allocation73_spill] sm:$0xff] %v11534_v39 }
 0x305   : > { %v11524_v21 = vsel %vm1051_vm3, %v4448_v25, %v4449_v54  ;;  %v7124_v25 = vld [vmem:[%s12560_s5 + $0xf0] sm:$0xff] }
 0x306   : > { %13048 = vst [vmem:[#allocation24_spill] sm:$0xff] %v11524_v21  ;;  %v7088_v54 = vld [vmem:[%s12560_s5 + $0xd0] sm:$0xff] }
 0x307   : > { %8521 = vmatmul.mubr.msk.f32.gmra.mxu0 %vm3162_vm4, %v11498_v57  ;;  %8580 = vmatmul.mubr.msk.f32.gmra.mxu1 %vm3162_vm4, %v11212_v42 }
 0x308   : > { %8523 = vmatprep.mubr.msk.f32.mxu0 %vm3162_vm4, %v11503_v20  ;;  %8582 = vmatprep.mubr.msk.f32.mxu1 %vm3162_vm4, %v11507_v37 }
 0x30b   : > { %8524 = vmatmul.mubr.msk.f32.gmra.mxu0 %vm3162_vm4, %v11517_v55  ;;  %8583 = vmatmul.mubr.msk.f32.gmra.mxu1 %vm3162_vm4, %v11519_v38 }
 0x30c   : > { %8526 = vmatprep.mubr.msk.f32.mxu0 %vm3162_vm4, %v11524_v21  ;;  %8649 = vmatprep.mubr.msk.f32.mxu1 %vm3162_vm4, %v11257_v40  ;;  %v7122_v40 = vld [vmem:[%s12560_s5 + $0xe0] sm:$0xff] }
 0x30f   : > { %8527 = vmatmul.mubr.msk.f32.gmra.mxu0 %vm3162_vm4, %v11534_v39  ;;  %8650 = vmatmul.mubr.msk.f32.vlgmr.msra.gmra.mxu1 %vm3162_vm4, %v11270_v60  ;;  %v13050_v60 = vld [vmem:[#allocation5_spill] sm:$0xff] }
 0x310   : > { %8593 = vmatprep.mubr.msk.f32.mxu0 %vm3162_vm4, %v10855_v28  ;;  %8652 = vmatprep.mubr.msk.f32.mxu1 %vm3162_vm4, %v11281_v47  ;;  %v7087_v28 = vld [vmem:[%s12560_s5 + $0xc8] sm:$0xff] }
 0x311   : > { %8754 = vmatpush3.msra.mxu1 %v11326_v48  ;;  %v13051_v48 = vld [vmem:[#allocation6_spill] sm:$0xff] }
 0x312   : > { %8755 = vmatprep.subr.mxu1 %v7124_v25 }
 0x313   : > { %8594 = vmatmul.mubr.msk.f32.vlgmr.msra.gmra.mxu0 %vm3162_vm4, %v10858_v13  ;;  %8653 = vmatmul.mubr.msk.f32.gmra.mxu1 %vm3162_vm4, %v11293_v62  ;;  %v7123_v13 = vld [vmem:[%s12560_s5 + $0xe8] sm:$0xff] }
 0x314   : > { %8698 = vmatpush3.msra.mxu0 %v11321_v24  ;;  %8596 = vmatprep.mubr.msk.f32.mxu0 %vm3162_vm4, %v10882_v15  ;;  %v11591_v24 = vld [vmem:[%s12560_s5 + $0x118] sm:$0xff] }
 0x315   : > { %8655 = vmatprep.mubr.msk.f32.mxu1 %vm3162_vm4, %v11304_v18  ;;  %8699 = vmatprep.subr.mxu0 %v7088_v54 }
 0x316   : > { %8700 = vmatpush3.msra.mxu0 %v7088_v54  ;;  %8756 = vmatpush3.msra.mxu1 %v7124_v25  ;;  %v13054_v25 = vld [vmem:[#allocation7_spill] sm:$0xff]  ;;  %v13055_v54 = vld [vmem:[#allocation40_spill] sm:$0xff] }
 0x317   : > { %8597 = vmatmul.mubr.msk.f32.gmra.mxu0 %vm3162_vm4, %v10885_v16  ;;  %8656 = vmatmul.mubr.msk.f32.gmra.mxu1 %vm3162_vm4, %v11316_v51 }
 0x318   : > { %8599 = vmatprep.mubr.msk.f32.mxu0 %vm3162_vm4, %v10909_v36  ;;  %8658 = vmatprep.mubr.msk.f32.mxu1 %vm3162_vm4, %v11331_v0 }
 0x319   : > { %8701 = vmatprep.subr.mxu0 %v7087_v28  ;;  %8757 = vmatprep.subr.mxu1 %v7123_v13 }
 0x31a   : > { %8702 = vmatpush3.msra.mxu0 %v7087_v28  ;;  %8758 = vmatpush3.msra.mxu1 %v7123_v13  ;;  %v13056_v28 = vld [vmem:[#allocation9_spill] sm:$0xff]  ;;  %v13057_v13 = vld [vmem:[#allocation42_spill] sm:$0xff] }
 0x31b   : > { %8600 = vmatmul.mubr.msk.f32.gmra.mxu0 %vm3162_vm4, %v10912_v45  ;;  %8659 = vmatmul.mubr.msk.f32.gmra.mxu1 %vm3162_vm4, %v11345_v22 }
 0x31c   : > { %8602 = vmatprep.mubr.msk.f32.mxu0 %vm3162_vm4, %v13050_v60  ;;  %8661 = vmatprep.mubr.msk.f32.mxu1 %vm3162_vm4, %v11350_v11  ;;  %v13074_v11 = vld [vmem:[#allocation17_spill] sm:$0xff] }
 0x31d   : > { %8703 = vmatprep.subr.mxu0 %v7086_v35  ;;  %8759 = vmatprep.subr.mxu1 %v7122_v40 }
 0x31e   : > { %8704 = vmatpush3.msra.mxu0 %v7086_v35  ;;  %8760 = vmatpush3.msra.mxu1 %v7122_v40  ;;  %v13058_v35 = vld [vmem:[#allocation14_spill] sm:$0xff]  ;;  %v13059_v40 = vld [vmem:[#allocation57_spill] sm:$0xff] }
 0x31f   : > { %8603 = vmatmul.mubr.msk.f32.gmra.mxu0 %vm3162_vm4, %v13051_v48  ;;  %8662 = vmatmul.mubr.msk.f32.gmra.mxu1 %vm3162_vm4, %v11362_v8 }
 0x320   : > { %8605 = vmatprep.mubr.msk.f32.mxu0 %vm3162_vm4, %v13052_v17  ;;  %8664 = vmatprep.mubr.msk.f32.mxu1 %vm3162_vm4, %v11367_v7 }
 0x321   : > { %8809 = vmatprep.subr.mxu0 %v11591_v24 }
 0x323   : > { %8606 = vmatmul.mubr.msk.f32.gmra.mxu0 %vm3162_vm4, %v13053_v58  ;;  %8665 = vmatmul.mubr.msk.f32.gmra.mxu1 %vm3162_vm4, %v11379_v4  ;;  %v5048_v4 = vrot.slane %v11507_v37, 1 }
 0x324   : > { %8608 = vmatprep.mubr.msk.f32.mxu0 %vm3162_vm4, %v13054_v25  ;;  %8667 = vmatprep.mubr.msk.f32.mxu1 %vm3162_vm4, %v11384_v59  ;;  %v13070_v59 = vld [vmem:[#allocation58_spill] sm:$0xff] }
 0x327   : > { %8609 = vmatmul.mubr.msk.f32.gmra.mxu0 %vm3162_vm4, %v13055_v54  ;;  %8668 = vmatmul.mubr.msk.f32.gmra.mxu1 %vm3162_vm4, %v11396_v10  ;;  %v13060_v10 = vld [vmem:[#allocation53_spill] sm:$0xff] }
 0x328   : > { %8611 = vmatprep.mubr.msk.f32.mxu0 %vm3162_vm4, %v13056_v28  ;;  %8670 = vmatprep.mubr.msk.f32.mxu1 %vm3162_vm4, %v11401_v3  ;;  %v13061_v3 = vld [vmem:[#allocation8_spill] sm:$0xff] }
 0x32b   : > { %8612 = vmatmul.mubr.msk.f32.gmra.mxu0 %vm3162_vm4, %v13057_v13  ;;  %8671 = vmatmul.mubr.msk.f32.gmra.mxu1 %vm3162_vm4, %v11413_v33  ;;  %v13062_v33 = vld [vmem:[#allocation54_spill] sm:$0xff] }
 0x32c   : > { %8614 = vmatprep.mubr.msk.f32.mxu0 %vm3162_vm4, %v13058_v35  ;;  %8673 = vmatprep.mubr.msk.f32.mxu1 %vm3162_vm4, %v11418_v5  ;;  %v13063_v5 = vld [vmem:[#allocation10_spill] sm:$0xff] }
 0x32f   : > { %8615 = vmatmul.mubr.msk.f32.gmra.mxu0 %vm3162_vm4, %v13059_v40  ;;  %8674 = vmatmul.mubr.msk.f32.gmra.mxu1 %vm3162_vm4, %v11430_v63  ;;  %v13064_v63 = vld [vmem:[#allocation59_spill] sm:$0xff] }
 0x330   : > { %8617 = vmatprep.mubr.msk.f32.mxu0 %vm3162_vm4, %v13060_v10  ;;  %8676 = vmatprep.mubr.msk.f32.mxu1 %vm3162_vm4, %v11435_v26  ;;  %v13065_v26 = vld [vmem:[#allocation39_spill] sm:$0xff] }
 0x333   : > { %8618 = vmatmul.mubr.msk.f32.gmra.mxu0 %vm3162_vm4, %v13061_v3  ;;  %8677 = vmatmul.mubr.msk.f32.gmra.mxu1 %vm3162_vm4, %v11447_v31  ;;  %v13066_v31 = vld [vmem:[#allocation41_spill] sm:$0xff] }
 0x334   : > { %8620 = vmatprep.mubr.msk.f32.mxu0 %vm3162_vm4, %v13062_v33  ;;  %8679 = vmatprep.mubr.msk.f32.mxu1 %vm3162_vm4, %v11452_v41  ;;  %v13067_v41 = vld [vmem:[#allocation12_spill] sm:$0xff] }
 0x337   : > { %8621 = vmatmul.mubr.msk.f32.gmra.mxu0 %vm3162_vm4, %v13063_v5  ;;  %8680 = vmatmul.mubr.msk.f32.gmra.mxu1 %vm3162_vm4, %v11464_v56  ;;  %v13068_v56 = vld [vmem:[#allocation61_spill] sm:$0xff] }
 0x338   : > { %8623 = vmatprep.mubr.msk.f32.mxu0 %vm3162_vm4, %v13064_v63  ;;  %8682 = vmatprep.mubr.msk.f32.mxu1 %vm3162_vm4, %v11469_v30  ;;  %v13069_v30 = vld [vmem:[#allocation21_spill] sm:$0xff] }
 0x33b   : > { %8624 = vmatmul.mubr.msk.f32.gmra.mxu0 %vm3162_vm4, %v13065_v26  ;;  %8683 = vmatmul.mubr.msk.f32.gmra.mxu1 %vm3162_vm4, %v11481_v34  ;;  %v5319_v34 = vrot.slane %v11507_v37, 2 }
 0x33c   : > { %8626 = vmatprep.mubr.msk.f32.mxu0 %vm3162_vm4, %v13066_v31  ;;  %8685 = vmatprep.mubr.msk.f32.mxu1 %vm3162_vm4, %v11486_v6  ;;  %v5320_v6 = vrot.slane %v11519_v38, 2 }
 0x33e   : > { %v11682_v7 = vsel %vm1051_vm3, %v5319_v34, %v5320_v6 }
 0x33f   : > { %8627 = vmatmul.mubr.msk.f32.gmra.mxu0 %vm3162_vm4, %v13067_v41  ;;  %8686 = vmatmul.mubr.msk.f32.gmra.mxu1 %vm3162_vm4, %v11498_v57  ;;  %v3654_v57 = vld [vmem:[#allocation2 + $0x190] sm:$0x3]  ;;  %13072 = vst [vmem:[#allocation68_spill] sm:$0xff] %v11682_v7 }
 0x340   : > { %8629 = vmatprep.mubr.msk.f32.mxu0 %vm3162_vm4, %v13068_v56  ;;  %8688 = vmatprep.mubr.msk.f32.mxu1 %vm3162_vm4, %v11503_v20  ;;  %v13071_v20 = vld [vmem:[#allocation11_spill] sm:$0xff]  ;;  %v5051_v34 = vrot.slane %v3654_v57, 1 }
 0x343   : > { %8630 = vmatmul.mubr.msk.f32.gmra.mxu0 %vm3162_vm4, %v13069_v30  ;;  %8689 = vmatmul.mubr.msk.f32.gmra.mxu1 %vm3162_vm4, %v11517_v55  ;;  %v5049_v55 = vrot.slane %v11519_v38, 1 }
 0x344   : > { %8632 = vmatprep.mubr.msk.f32.mxu0 %vm3162_vm4, %v13070_v59  ;;  %8691 = vmatprep.mubr.msk.f32.mxu1 %vm3162_vm4, %v11524_v21  ;;  %v5322_v21 = vrot.slane %v3654_v57, 2  ;;  %v8878_v57 = vld [vmem:[#allocation2 + $0x38] sm:$0xff] }
 0x346   : > { %v11690_v8 = vsel %vm1051_vm3, %v5320_v6, %v5322_v21  ;;  %v8877_v6 = vld [vmem:[#allocation2 + $0x30] sm:$0xff]  ;;  %v11723_v21 = vpop.f32.mrf.mxu0 }
 0x347   : > { %8633 = vmatmul.mubr.msk.f32.gmra.mxu0 %vm3162_vm4, %v13071_v20  ;;  %8692 = vmatmul.mubr.msk.f32.gmra.mxu1 %vm3162_vm4, %v11534_v39  ;;  %13073 = vst [vmem:[#allocation33_spill] sm:$0xff] %v11690_v8  ;;  %v11695_v39 = vsel %vm382_vm1, %v5048_v4, %v5049_v55  ;;  %v11710_v4 = vpop.f32.mrf.mxu1 }
 0x348   : > { %8635 = vmatprep.mubr.msk.f32.mxu0 %vm3162_vm4, %v11227_v32  ;;  %8694 = vmatprep.mubr.msk.f32.mxu1 %vm3162_vm4, %v11682_v7  ;;  %v11704_v7 = vsel %vm382_vm1, %v5049_v55, %v5051_v34  ;;  %v7159_v34 = vld [vmem:[%s12560_s5 + $0x108] sm:$0xff] }
 0x34b   : > { %8636 = vmatmul.mubr.msk.f32.gmra.mxu0 %vm3162_vm4, %v13074_v11  ;;  %8695 = vmatmul.mubr.msk.f32.gmra.mxu1 %vm3162_vm4, %v11690_v8 }
 0x34c   : > { %8638 = vmatprep.mubr.msk.f32.mxu0 %vm3162_vm4, %v11695_v39  ;;  %8761 = vmatprep.mubr.msk.f32.mxu1 %vm3162_vm4, %v10882_v15  ;;  %v7160_v15 = vld [vmem:[%s12560_s5 + $0x110] sm:$0xff] }
 0x34f   : > { %8639 = vmatmul.mubr.msk.f32.gmra.mxu0 %vm3162_vm4, %v11704_v7  ;;  %8762 = vmatmul.mubr.msk.f32.vlgmr.msra.gmra.mxu1 %vm3162_vm4, %v10885_v16  ;;  %v8879_v16 = vld [vmem:[#allocation2 + $0x48] sm:$0xff] }
 0x350   : > { %8705 = vmatprep.mubr.msk.f32.mxu0 %vm3162_vm4, %v8877_v6  ;;  %8764 = vmatprep.mubr.msk.f32.mxu1 %vm3162_vm4, %v10909_v36 }
 0x353   : > { %8706 = vmatmul.mubr.msk.f32.vlgmr.msra.gmra.mxu0 %vm3162_vm4, %v8878_v57  ;;  %v8430_v55 = vpop.f32.mrf.mxu1  ;;  %8765 = vmatmul.mubr.msk.f32.gmra.mxu1 %vm3162_vm4, %v10912_v45  ;;  %v8880_v57 = vld [vmem:[#allocation2 + $0x50] sm:$0xff] }
 0x354   : > { %8810 = vmatpush3.msra.mxu0 %v11591_v24  ;;  %8708 = vmatprep.mubr.msk.f32.mxu0 %vm3162_vm4, %v8879_v16  ;;  %v8881_v16 = vld [vmem:[#allocation2 + $0x60] sm:$0xff] }
 0x355   : > { %8767 = vmatprep.mubr.msk.f32.mxu1 %vm3162_vm4, %v13050_v60  ;;  %v4224_v36 = vpop.f32.mrf.mxu1  ;;  %8811 = vmatprep.subr.mxu0 %v7160_v15 }
 0x356   : > { %8812 = vmatpush3.msra.mxu0 %v7160_v15  ;;  %v8374_v6 = vpop.f32.mrf.mxu0 }
 0x357   : > { %8709 = vmatmul.mubr.msk.f32.gmra.mxu0 %vm3162_vm4, %v8880_v57  ;;  %v8433_v45 = vpop.f32.mrf.mxu1  ;;  %8768 = vmatmul.mubr.msk.f32.gmra.mxu1 %vm3162_vm4, %v13051_v48  ;;  %v11733_v24 = vadd.f32 %v8430_v55, %v8374_v6  ;;  %v7158_v57 = vld [vmem:[%s12560_s5 + $0x100] sm:$0xff]  ;;  %v8882_v48 = vld [vmem:[#allocation2 + $0x68] sm:$0xff] }
 0x358   : > { %8711 = vmatprep.mubr.msk.f32.mxu0 %vm3162_vm4, %v8881_v16  ;;  %8770 = vmatprep.mubr.msk.f32.mxu1 %vm3162_vm4, %v13052_v17  ;;  %v3935_v60 = vpop.f32.mrf.mxu0 }
 0x359   : > { %v4234_v15 = vpop.f32.mrf.mxu1  ;;  %8813 = vmatprep.subr.mxu0 %v7159_v34  ;;  %v11738_v8 = vadd.f32 %v4224_v36, %v3935_v60  ;;  %v8883_v60 = vld [vmem:[#allocation2 + $0x80] sm:$0xff] }
 0x35a   : > { %8814 = vmatpush3.msra.mxu0 %v7159_v34  ;;  %v8377_v22 = vpop.f32.mrf.mxu0 }
 0x35b   : > { %8712 = vmatmul.mubr.msk.f32.gmra.mxu0 %vm3162_vm4, %v8882_v48  ;;  %v8436_v55 = vpop.f32.mrf.mxu1  ;;  %8771 = vmatmul.mubr.msk.f32.gmra.mxu1 %vm3162_vm4, %v13053_v58  ;;  %v11746_v6 = vadd.f32 %v8433_v45, %v8377_v22 }
 0x35c   : > { %8714 = vmatprep.mubr.msk.f32.mxu0 %vm3162_vm4, %v10943_v19  ;;  %8773 = vmatprep.mubr.msk.f32.mxu1 %vm3162_vm4, %v13054_v25  ;;  %v3945_v17 = vpop.f32.mrf.mxu0 }
 0x35d   : > { %v4244_v36 = vpop.f32.mrf.mxu1  ;;  %8815 = vmatprep.subr.mxu0 %v7158_v57  ;;  %v11752_v34 = vadd.f32 %v4234_v15, %v3945_v17 }
 0x35e   : > { %8816 = vmatpush3.msra.mxu0 %v7158_v57  ;;  %v8380_v16 = vpop.f32.mrf.mxu0 }
 0x35f   : > { %8715 = vmatmul.mubr.msk.f32.gmra.mxu0 %vm3162_vm4, %v8883_v60  ;;  %v8439_v48 = vpop.f32.mrf.mxu1  ;;  %8774 = vmatmul.mubr.msk.f32.gmra.mxu1 %vm3162_vm4, %v13055_v54  ;;  %v11757_v22 = vadd.f32 %v8436_v55, %v8380_v16 }
 0x360   : > { %8717 = vmatprep.mubr.msk.f32.mxu0 %vm3162_vm4, %v10970_v61  ;;  %8776 = vmatprep.mubr.msk.f32.mxu1 %vm3162_vm4, %v13056_v28  ;;  %v3955_v19 = vpop.f32.mrf.mxu0 }
 0x361   : > { %v4254_v58 = vpop.f32.mrf.mxu1  ;;  %v11763_v25 = vadd.f32 %v4244_v36, %v3955_v19 }
 0x362   : > { %v8383_v45 = vpop.f32.mrf.mxu0 }
 0x363   : > { %8718 = vmatmul.mubr.msk.f32.gmra.mxu0 %vm3162_vm4, %v10972_v43  ;;  %v8442_v15 = vpop.f32.mrf.mxu1  ;;  %8777 = vmatmul.mubr.msk.f32.gmra.mxu1 %vm3162_vm4, %v13057_v13  ;;  %v11769_v54 = vadd.f32 %v8439_v48, %v8383_v45 }
 0x364   : > { %8720 = vmatprep.mubr.msk.f32.mxu0 %vm3162_vm4, %v10997_v44  ;;  %8779 = vmatprep.mubr.msk.f32.mxu1 %vm3162_vm4, %v13058_v35  ;;  %v3965_v61 = vpop.f32.mrf.mxu0 }
 0x365   : > { %v4264_v28 = vpop.f32.mrf.mxu1  ;;  %v11775_v57 = vadd.f32 %v4254_v58, %v3965_v61 }
 0x366   : > { %v8386_v55 = vpop.f32.mrf.mxu0 }
 0x367   : > { %8721 = vmatmul.mubr.msk.f32.gmra.mxu0 %vm3162_vm4, %v10999_v53  ;;  %v8445_v43 = vpop.f32.mrf.mxu1  ;;  %8780 = vmatmul.mubr.msk.f32.gmra.mxu1 %vm3162_vm4, %v13059_v40  ;;  %v11781_v13 = vadd.f32 %v8442_v15, %v8386_v55  ;;  %v11849_v55 = vld [vmem:[#allocation2 + $0x198] sm:$0xff] }
 0x368   : > { %8723 = vmatprep.mubr.msk.f32.mxu0 %vm3162_vm4, %v11024_v9  ;;  %8782 = vmatprep.mubr.msk.f32.mxu1 %vm3162_vm4, %v13060_v10  ;;  %v3975_v44 = vpop.f32.mrf.mxu0 }
 0x369   : > { %v4274_v35 = vpop.f32.mrf.mxu1  ;;  %v11787_v17 = vadd.f32 %v4264_v28, %v3975_v44  ;;  %v13075_v44 = vld [vmem:[#allocation56_spill] sm:$0xff] }
 0x36a   : > { %v8389_v36 = vpop.f32.mrf.mxu0 }
 0x36b   : > { %8724 = vmatmul.mubr.msk.f32.gmra.mxu0 %vm3162_vm4, %v11026_v49  ;;  %v8448_v53 = vpop.f32.mrf.mxu1  ;;  %8783 = vmatmul.mubr.msk.f32.gmra.mxu1 %vm3162_vm4, %v13061_v3  ;;  %v11793_v40 = vadd.f32 %v8445_v43, %v8389_v36  ;;  %v11851_v43 = vld [vmem:[#allocation2 + $0x1a0] sm:$0xff] }
 0x36c   : > { %8726 = vmatprep.mubr.msk.f32.mxu0 %vm3162_vm4, %v11051_v46  ;;  %8785 = vmatprep.mubr.msk.f32.mxu1 %vm3162_vm4, %v13062_v33  ;;  %v3985_v9 = vpop.f32.mrf.mxu0 }
 0x36d   : > { %v4284_v10 = vpop.f32.mrf.mxu1  ;;  %v11799_v16 = vadd.f32 %v4274_v35, %v3985_v9  ;;  %v13076_v35 = vld [vmem:[#allocation16_spill] sm:$0xff]  ;;  %v5860_v9 = vrot.slane %v11851_v43, 1 }
 0x36e   : > { %v8392_v60 = vpop.f32.mrf.mxu0 }
 0x36f   : > { %8727 = vmatmul.mubr.msk.f32.gmra.mxu0 %vm3162_vm4, %v11053_v1  ;;  %v8451_v49 = vpop.f32.mrf.mxu1  ;;  %8786 = vmatmul.mubr.msk.f32.gmra.mxu1 %vm3162_vm4, %v13063_v5  ;;  %v11805_v3 = vadd.f32 %v8448_v53, %v8392_v60  ;;  %v5859_v53 = vrot.slane %v11849_v55, 1 }
 0x370   : > { %8729 = vmatprep.mubr.msk.f32.mxu0 %vm3162_vm4, %v11078_v29  ;;  %8788 = vmatprep.mubr.msk.f32.mxu1 %vm3162_vm4, %v13064_v63  ;;  %v3995_v46 = vpop.f32.mrf.mxu0 }
 0x371   : > { %v4294_v33 = vpop.f32.mrf.mxu1  ;;  %v11811_v48 = vadd.f32 %v4284_v10, %v3995_v46  ;;  %v11865_v10 = vld [vmem:[#allocation2 + $0x1a8] sm:$0x3] }
 0x372   : > { %v8395_v19 = vpop.f32.mrf.mxu0 }
 0x373   : > { %8730 = vmatmul.mubr.msk.f32.gmra.mxu0 %vm3162_vm4, %v11080_v23  ;;  %v8454_v1 = vpop.f32.mrf.mxu1  ;;  %8789 = vmatmul.mubr.msk.f32.gmra.mxu1 %vm3162_vm4, %v13065_v26  ;;  %v11817_v5 = vadd.f32 %v8451_v49, %v8395_v19 }
 0x374   : > { %8732 = vmatprep.mubr.msk.f32.mxu0 %vm3162_vm4, %v11105_v52  ;;  %8791 = vmatprep.mubr.msk.f32.mxu1 %vm3162_vm4, %v13066_v31  ;;  %v4005_v29 = vpop.f32.mrf.mxu0 }
 0x375   : > { %v4304_v63 = vpop.f32.mrf.mxu1  ;;  %v11823_v58 = vadd.f32 %v4294_v33, %v4005_v29  ;;  %v5861_v29 = vsel %vm382_vm1, %v5859_v53, %v5860_v9  ;;  %v4215_v53 = vadd.f32 %v11710_v4, %v11723_v21 }
 0x376   : > { %v8398_v45 = vpop.f32.mrf.mxu0 }
 0x377   : > { %8733 = vmatmul.mubr.msk.f32.gmra.mxu0 %vm3162_vm4, %v11107_v12  ;;  %v8457_v23 = vpop.f32.mrf.mxu1  ;;  %8792 = vmatmul.mubr.msk.f32.gmra.mxu1 %vm3162_vm4, %v13067_v41  ;;  %v11829_v26 = vadd.f32 %v8454_v1, %v8398_v45 }
 0x378   : > { %8735 = vmatprep.mubr.msk.f32.mxu0 %vm3162_vm4, %v11132_v27  ;;  %8794 = vmatprep.mubr.msk.f32.mxu1 %vm3162_vm4, %v13068_v56  ;;  %v4015_v52 = vpop.f32.mrf.mxu0 }
 0x379   : > { %v4314_v31 = vpop.f32.mrf.mxu1  ;;  %v11835_v15 = vadd.f32 %v4304_v63, %v4015_v52 }
 0x37a   : > { %v8401_v61 = vpop.f32.mrf.mxu0 }
 0x37b   : > { %8736 = vmatmul.mubr.msk.f32.gmra.mxu0 %vm3162_vm4, %v11134_v2  ;;  %v8460_v12 = vpop.f32.mrf.mxu1  ;;  %8795 = vmatmul.mubr.msk.f32.gmra.mxu1 %vm3162_vm4, %v13069_v30  ;;  %v11841_v41 = vadd.f32 %v8457_v23, %v8401_v61 }
 0x37c   : > { %8738 = vmatprep.mubr.msk.f32.mxu0 %vm3162_vm4, %v11159_v50  ;;  %8797 = vmatprep.mubr.msk.f32.mxu1 %vm3162_vm4, %v13070_v59  ;;  %v4025_v27 = vpop.f32.mrf.mxu0 }
 0x37d   : > { %v4324_v56 = vpop.f32.mrf.mxu1  ;;  %v11847_v28 = vadd.f32 %v4314_v31, %v4025_v27 }
 0x37e   : > { %v8404_v2 = vpop.f32.mrf.mxu0 }
 0x37f   : > { %8739 = vmatmul.mubr.msk.f32.gmra.mxu0 %vm3162_vm4, %v13075_v44  ;;  %v8463_v30 = vpop.f32.mrf.mxu1  ;;  %8798 = vmatmul.mubr.msk.f32.gmra.mxu1 %vm3162_vm4, %v13071_v20  ;;  %v11857_v50 = vadd.f32 %v8460_v12, %v8404_v2  ;;  %v13077_v20 = vld [vmem:[#allocation63_spill] sm:$0xff] }
 0x380   : > { %8741 = vmatprep.mubr.msk.f32.mxu0 %vm3162_vm4, %v13076_v35  ;;  %8800 = vmatprep.mubr.msk.f32.mxu1 %vm3162_vm4, %v11227_v32  ;;  %v4035_v59 = vpop.f32.mrf.mxu0  ;;  %v5862_v32 = vrot.slane %v11865_v10, 1 }
 0x381   : > { %v4334_v36 = vpop.f32.mrf.mxu1  ;;  %v11867_v60 = vadd.f32 %v4324_v56, %v4035_v59 }
 0x382   : > { %v8407_v49 = vpop.f32.mrf.mxu0 }
 0x383   : > { %8742 = vmatmul.mubr.msk.f32.gmra.mxu0 %vm3162_vm4, %v13077_v20  ;;  %v8466_v46 = vpop.f32.mrf.mxu1  ;;  %8801 = vmatmul.mubr.msk.f32.gmra.mxu1 %vm3162_vm4, %v13074_v11  ;;  %v11873_v33 = vadd.f32 %v8463_v30, %v8407_v49 }
 0x384   : > { %8744 = vmatprep.mubr.msk.f32.mxu0 %vm3162_vm4, %v11210_v14  ;;  %8803 = vmatprep.mubr.msk.f32.mxu1 %vm3162_vm4, %v11695_v39  ;;  %v4045_v19 = vpop.f32.mrf.mxu0  ;;  %v5863_v39 = vsel %vm382_vm1, %v5860_v9, %v5862_v32  ;;  %v13078_v9 = vld [vmem:[#allocation13_spill] sm:$0xff] }
 0x385   : > { %v4344_v1 = vpop.f32.mrf.mxu1  ;;  %v11881_v63 = vadd.f32 %v4334_v36, %v4045_v19 }
 0x386   : > { %v8410_v45 = vpop.f32.mrf.mxu0 }
 0x387   : > { %8745 = vmatmul.mubr.msk.f32.gmra.mxu0 %vm3162_vm4, %v11212_v42  ;;  %v8469_v11 = vpop.f32.mrf.mxu1  ;;  %8804 = vmatmul.mubr.msk.f32.gmra.mxu1 %vm3162_vm4, %v11704_v7  ;;  %v11887_v14 = vadd.f32 %v8466_v46, %v8410_v45 }
 0x388   : > { %8747 = vmatprep.mubr.msk.f32.mxu0 %vm3162_vm4, %v11507_v37  ;;  %8806 = vmatprep.mubr.msk.f32.mxu1 %vm3162_vm4, %v5861_v29  ;;  %v4055_v23 = vpop.f32.mrf.mxu0 }
 0x389   : > { %v4354_v52 = vpop.f32.mrf.mxu1  ;;  %v11893_v31 = vadd.f32 %v4344_v1, %v4055_v23 }
 0x38a   : > { %v8413_v61 = vpop.f32.mrf.mxu0 }
 0x38b   : > { %8748 = vmatmul.mubr.msk.f32.gmra.mxu0 %vm3162_vm4, %v11519_v38  ;;  %v8472_v42 = vpop.f32.mrf.mxu1  ;;  %8807 = vmatmul.mubr.msk.f32.gmra.mxu1 %vm3162_vm4, %v5863_v39  ;;  %v11898_v7 = vadd.f32 %v8469_v11, %v8413_v61  ;;  %v13079_v39 = vld [vmem:[#allocation25_spill] sm:$0xff] }
 0x38c   : > { %8750 = vmatprep.mubr.msk.f32.mxu0 %vm3162_vm4, %v11849_v55  ;;  %v4065_v37 = vpop.f32.mrf.mxu0 }
 0x38d   : > { %v4364_v12 = vpop.f32.mrf.mxu1  ;;  %v11902_v27 = vadd.f32 %v4354_v52, %v4065_v37  ;;  %v13080_v52 = vld [vmem:[#allocation28_spill] sm:$0xff] }
 0x38e   : > { %v8416_v56 = vpop.f32.mrf.mxu0 }
 0x38f   : > { %8751 = vmatmul.mubr.msk.f32.gmra.mxu0 %vm3162_vm4, %v11851_v43  ;;  %v8539_v2 = vpop.f32.mrf.mxu1  ;;  %v11906_v44 = vadd.f32 %v8472_v42, %v8416_v56 }
 0x390   : > { %8817 = vmatprep.mubr.msk.f32.mxu0 %vm3162_vm4, %v11281_v47  ;;  %v4075_v38 = vpop.f32.mrf.mxu0 }
 0x391   : > { %v4856_v30 = vpop.f32.mrf.mxu1  ;;  %v11910_v35 = vadd.f32 %v4364_v12, %v4075_v38  ;;  %v13081_v12 = vld [vmem:[#allocation65_spill] sm:$0xff]  ;;  %v13082_v38 = vld [vmem:[#allocation60_spill] sm:$0xff] }
 0x392   : > { %v8483_v59 = vpop.f32.mrf.mxu0 }
 0x393   : > { %8818 = vmatmul.mubr.msk.f32.vlgmr.msra.gmra.mxu0 %vm3162_vm4, %v11293_v62  ;;  %v8542_v36 = vpop.f32.mrf.mxu1  ;;  %v4748_v49 = vadd.f32 %v8483_v59, %v13078_v9  ;;  %v13083_v9 = vld [vmem:[#allocation18_spill] sm:$0xff] }
 0x394   : > { %8820 = vmatprep.mubr.msk.f32.mxu0 %vm3162_vm4, %v11304_v18  ;;  %v4588_v20 = vpop.f32.mrf.mxu0 }
 0x395   : > { %v4866_v46 = vpop.f32.mrf.mxu1  ;;  %v4747_v47 = vadd.f32 %v4588_v20, %v4215_v53  ;;  %v11919_v32 = vadd.f32 %v8539_v2, %v4748_v49 }
 0x397   : > { %v8486_v19 = vpop.f32.mrf.mxu0  ;;  %8821 = vmatmul.mubr.msk.f32.gmra.mxu0 %vm3162_vm4, %v11316_v51  ;;  %v8545_v1 = vpop.f32.mrf.mxu1  ;;  %v11926_v4 = vadd.f32 %v4856_v30, %v4747_v47 }
 0x398   : > { %v4750_v62 = vadd.f32 %v8486_v19, %v11733_v24  ;;  %8823 = vmatprep.mubr.msk.f32.mxu0 %vm3162_vm4, %v11331_v0 }
 0x399   : > { %v4598_v21 = vpop.f32.mrf.mxu0  ;;  %v4876_v29 = vpop.f32.mrf.mxu1 }
 0x39a   : > { %v4749_v18 = vadd.f32 %v4598_v21, %v11738_v8  ;;  %v11929_v45 = vadd.f32 %v8542_v36, %v4750_v62  ;;  %v13085_v21 = vld [vmem:[#allocation23_spill] sm:$0xff] }
 0x39b   : > { %v8489_v11 = vpop.f32.mrf.mxu0  ;;  %8824 = vmatmul.mubr.msk.f32.gmra.mxu0 %vm3162_vm4, %v13079_v39  ;;  %v8548_v23 = vpop.f32.mrf.mxu1 }
 0x39c   : > { %v4752_v51 = vadd.f32 %v8489_v11, %v11746_v6  ;;  %8826 = vmatprep.mubr.msk.f32.mxu0 %vm3162_vm4, %v13080_v52  ;;  %v11936_v24 = vadd.f32 %v4866_v46, %v4749_v18  ;;  %v13084_v46 = vld [vmem:[#allocation62_spill] sm:$0xff]  ;;  %v13086_v11 = vld [vmem:[#allocation67_spill] sm:$0xff] }
 0x39d   : > { %v4608_v0 = vpop.f32.mrf.mxu0  ;;  %v4886_v61 = vpop.f32.mrf.mxu1 }
 0x39e   : > { %v4751_v42 = vadd.f32 %v4608_v0, %v11752_v34  ;;  %v11939_v37 = vadd.f32 %v8545_v1, %v4752_v51  ;;  %v13087_v0 = vld [vmem:[#allocation43_spill] sm:$0xff] }
 0x39f   : > { %v8492_v8 = vpop.f32.mrf.mxu0  ;;  %8827 = vmatmul.mubr.msk.f32.gmra.mxu0 %vm3162_vm4, %v13081_v12  ;;  %v8551_v56 = vpop.f32.mrf.mxu1 }
 0x3a0   : > { %v4754_v2 = vadd.f32 %v8492_v8, %v11757_v22  ;;  %8829 = vmatprep.mubr.msk.f32.mxu0 %vm3162_vm4, %v13082_v38  ;;  %v11946_v6 = vadd.f32 %v4876_v29, %v4751_v42  ;;  %v13088_v8 = vld [vmem:[#allocation22_spill] sm:$0xff] }
 0x3a1   : > { %v4618_v30 = vpop.f32.mrf.mxu0  ;;  %v4896_v59 = vpop.f32.mrf.mxu1 }
 0x3a2   : > { %v4753_v36 = vadd.f32 %v4618_v30, %v11763_v25  ;;  %v11949_v53 = vadd.f32 %v8548_v23, %v4754_v2  ;;  %v13089_v30 = vld [vmem:[#allocation26_spill] sm:$0xff] }
 0x3a3   : > { %v8495_v34 = vpop.f32.mrf.mxu0  ;;  %8830 = vmatmul.mubr.msk.f32.gmra.mxu0 %vm3162_vm4, %v13083_v9  ;;  %v8554_v49 = vpop.f32.mrf.mxu1 }
 0x3a4   : > { %v4756_v20 = vadd.f32 %v8495_v34, %v11769_v54  ;;  %8832 = vmatprep.mubr.msk.f32.mxu0 %vm3162_vm4, %v13084_v46  ;;  %v11956_v22 = vadd.f32 %v4886_v61, %v4753_v36  ;;  %v13090_v34 = vld [vmem:[#allocation64_spill] sm:$0xff] }
 0x3a5   : > { %v4628_v47 = vpop.f32.mrf.mxu0  ;;  %v4906_v19 = vpop.f32.mrf.mxu1 }
 0x3a6   : > { %v4755_v1 = vadd.f32 %v4628_v47, %v11775_v57  ;;  %v11959_v62 = vadd.f32 %v8551_v56, %v4756_v20  ;;  %v13091_v47 = vld [vmem:[#allocation69_spill] sm:$0xff] }
 0x3a7   : > { %v8498_v25 = vpop.f32.mrf.mxu0  ;;  %8833 = vmatmul.mubr.msk.f32.gmra.mxu0 %vm3162_vm4, %v13085_v21  ;;  %v8557_v29 = vpop.f32.mrf.mxu1 }
 0x3a8   : > { %v4758_v18 = vadd.f32 %v8498_v25, %v11781_v13  ;;  %8835 = vmatprep.mubr.msk.f32.mxu0 %vm3162_vm4, %v13086_v11  ;;  %v11966_v54 = vadd.f32 %v4896_v59, %v4755_v1  ;;  %v13092_v25 = vld [vmem:[#allocation15_spill] sm:$0xff] }
 0x3a9   : > { %v4638_v39 = vpop.f32.mrf.mxu0  ;;  %v4916_v23 = vpop.f32.mrf.mxu1 }
 0x3aa   : > { %v4757_v51 = vadd.f32 %v4638_v39, %v11787_v17  ;;  %v11969_v52 = vadd.f32 %v8554_v49, %v4758_v18  ;;  %v13093_v39 = vld [vmem:[#allocation30_spill] sm:$0xff] }
 0x3ab   : > { %v8501_v57 = vpop.f32.mrf.mxu0  ;;  %8836 = vmatmul.mubr.msk.f32.gmra.mxu0 %vm3162_vm4, %v13087_v0  ;;  %v8560_v61 = vpop.f32.mrf.mxu1 }
 0x3ac   : > { %v4760_v42 = vadd.f32 %v8501_v57, %v11793_v40  ;;  %8838 = vmatprep.mubr.msk.f32.mxu0 %vm3162_vm4, %v13088_v8  ;;  %v11976_v13 = vadd.f32 %v4906_v19, %v4757_v51  ;;  %v13094_v57 = vld [vmem:[#allocation71_spill] sm:$0xff] }
 0x3ad   : > { %v4648_v12 = vpop.f32.mrf.mxu0  ;;  %v4926_v56 = vpop.f32.mrf.mxu1 }
 0x3ae   : > { %v4759_v2 = vadd.f32 %v4648_v12, %v11799_v16  ;;  %v11979_v38 = vadd.f32 %v8557_v29, %v4760_v42  ;;  %v13095_v12 = vld [vmem:[#allocation66_spill] sm:$0xff] }
 0x3af   : > { %v8504_v17 = vpop.f32.mrf.mxu0  ;;  %8839 = vmatmul.mubr.msk.f32.gmra.mxu0 %vm3162_vm4, %v13089_v30  ;;  %v8563_v59 = vpop.f32.mrf.mxu1 }
 0x3b0   : > { %v4762_v36 = vadd.f32 %v8504_v17, %v11805_v3  ;;  %8841 = vmatprep.mubr.msk.f32.mxu0 %vm3162_vm4, %v13090_v34  ;;  %v11986_v40 = vadd.f32 %v4916_v23, %v4759_v2  ;;  %v13096_v17 = vld [vmem:[#allocation20_spill] sm:$0xff] }
 0x3b1   : > { %v4658_v9 = vpop.f32.mrf.mxu0  ;;  %v4936_v49 = vpop.f32.mrf.mxu1 }
 0x3b2   : > { %v4761_v20 = vadd.f32 %v4658_v9, %v11811_v48  ;;  %v11989_v46 = vadd.f32 %v8560_v61, %v4762_v36  ;;  %v13097_v9 = vld [vmem:[#allocation29_spill] sm:$0xff] }
 0x3b3   : > { %v8507_v16 = vpop.f32.mrf.mxu0  ;;  %8842 = vmatmul.mubr.msk.f32.gmra.mxu0 %vm3162_vm4, %v13091_v47  ;;  %v8566_v19 = vpop.f32.mrf.mxu1 }
 0x3b4   : > { %v4764_v1 = vadd.f32 %v8507_v16, %v11817_v5  ;;  %8844 = vmatprep.mubr.msk.f32.mxu0 %vm3162_vm4, %v13092_v25  ;;  %v11996_v3 = vadd.f32 %v4926_v56, %v4761_v20  ;;  %v13098_v16 = vld [vmem:[#allocation36_spill] sm:$0xff] }
 0x3b5   : > { %v4668_v21 = vpop.f32.mrf.mxu0  ;;  %v4946_v29 = vpop.f32.mrf.mxu1 }
 0x3b6   : > { %v4763_v18 = vadd.f32 %v4668_v21, %v11823_v58  ;;  %v11999_v11 = vadd.f32 %v8563_v59, %v4764_v1  ;;  %v13099_v21 = vld [vmem:[#allocation32_spill] sm:$0xff] }
 0x3b7   : > { %v8510_v48 = vpop.f32.mrf.mxu0  ;;  %8845 = vmatmul.mubr.msk.f32.gmra.mxu0 %vm3162_vm4, %v13093_v39  ;;  %v8569_v23 = vpop.f32.mrf.mxu1  ;;  %v6130_v39 = vrot.slane %v11849_v55, 2  ;;  %v6133_v55 = vrot.slane %v11865_v10, 2 }
 0x3b8   : > { %v4766_v51 = vadd.f32 %v8510_v48, %v11829_v26  ;;  %8847 = vmatprep.mubr.msk.f32.mxu0 %vm3162_vm4, %v13094_v57  ;;  %v12006_v5 = vadd.f32 %v4936_v49, %v4763_v18  ;;  %v13100_v48 = vld [vmem:[#allocation24_spill] sm:$0xff] }
 0x3b9   : > { %v4678_v0 = vpop.f32.mrf.mxu0  ;;  %v4956_v61 = vpop.f32.mrf.mxu1 }
 0x3ba   : > { %v4765_v42 = vadd.f32 %v4678_v0, %v11835_v15  ;;  %v12009_v8 = vadd.f32 %v8566_v19, %v4766_v51 }
 0x3bb   : > { %v8513_v58 = vpop.f32.mrf.mxu0  ;;  %8848 = vmatmul.mubr.msk.f32.gmra.mxu0 %vm3162_vm4, %v13095_v12  ;;  %v8572_v56 = vpop.f32.mrf.mxu1  ;;  %v13102_v12 = vld [vmem:[#allocation68_spill] sm:$0xff] }
 0x3bc   : > { %v4768_v2 = vadd.f32 %v8513_v58, %v11841_v41  ;;  %8850 = vmatprep.mubr.msk.f32.mxu0 %vm3162_vm4, %v13096_v17  ;;  %v12016_v26 = vadd.f32 %v4946_v29, %v4765_v42  ;;  %v13101_v42 = vld [vmem:[#allocation73_spill] sm:$0xff] }
 0x3bd   : > { %v4688_v30 = vpop.f32.mrf.mxu0  ;;  %v4966_v59 = vpop.f32.mrf.mxu1 }
 0x3be   : > { %v4767_v36 = vadd.f32 %v4688_v30, %v11847_v28  ;;  %v12019_v34 = vadd.f32 %v8569_v23, %v4768_v2 }
 0x3bf   : > { %v8516_v15 = vpop.f32.mrf.mxu0  ;;  %8851 = vmatmul.mubr.msk.f32.gmra.mxu0 %vm3162_vm4, %v13097_v9  ;;  %v8575_v49 = vpop.f32.mrf.mxu1 }
 0x3c0   : > { %v4770_v20 = vadd.f32 %v8516_v15, %v11857_v50  ;;  %8853 = vmatprep.mubr.msk.f32.mxu0 %vm3162_vm4, %v13098_v16  ;;  %v12026_v41 = vadd.f32 %v4956_v61, %v4767_v36  ;;  %v13103_v36 = vld [vmem:[#allocation33_spill] sm:$0xff] }
 0x3c1   : > { %v4698_v47 = vpop.f32.mrf.mxu0  ;;  %v4976_v19 = vpop.f32.mrf.mxu1 }
 0x3c2   : > { %v4769_v1 = vadd.f32 %v4698_v47, %v11867_v60  ;;  %v12029_v25 = vadd.f32 %v8572_v56, %v4770_v20  ;;  %v6131_v60 = vrot.slane %v11851_v43, 2 }
 0x3c3   : > { %v8519_v28 = vpop.f32.mrf.mxu0  ;;  %8854 = vmatmul.mubr.msk.f32.gmra.mxu0 %vm3162_vm4, %v13099_v21  ;;  %v8578_v29 = vpop.f32.mrf.mxu1 }
 0x3c4   : > { %v4772_v18 = vadd.f32 %v8519_v28, %v11873_v33  ;;  %8856 = vmatprep.mubr.msk.f32.mxu0 %vm3162_vm4, %v13100_v48  ;;  %v12036_v50 = vadd.f32 %v4966_v59, %v4769_v1  ;;  %v6134_v10 = vsel %vm1051_vm3, %v6131_v60, %v6133_v55 }
 0x3c5   : > { %v4708_v23 = vpop.f32.mrf.mxu0  ;;  %v4986_v51 = vpop.f32.mrf.mxu1 }
 0x3c6   : > { %v4771_v57 = vadd.f32 %v4708_v23, %v11881_v63  ;;  %v12041_v0 = vadd.f32 %v8575_v49, %v4772_v18  ;;  %v6132_v63 = vsel %vm1051_vm3, %v6130_v39, %v6131_v60 }
 0x3c7   : > { %v8522_v61 = vpop.f32.mrf.mxu0  ;;  %8857 = vmatmul.mubr.msk.f32.gmra.mxu0 %vm3162_vm4, %v13101_v42  ;;  %v8581_v33 = vpop.f32.mrf.mxu1 }
 0x3c8   : > { %v4774_v58 = vadd.f32 %v8522_v61, %v11887_v14  ;;  %8859 = vmatprep.mubr.msk.f32.mxu0 %vm3162_vm4, %v13102_v12  ;;  %v12049_v56 = vadd.f32 %v4976_v19, %v4771_v57 }
 0x3c9   : > { %v4718_v2 = vpop.f32.mrf.mxu0  ;;  %v4996_v43 = vpop.f32.mrf.mxu1 }
 0x3ca   : > { %v4773_v17 = vadd.f32 %v4718_v2, %v11893_v31  ;;  %v12053_v30 = vadd.f32 %v8578_v29, %v4774_v58 }
 0x3cb   : > { %v8525_v59 = vpop.f32.mrf.mxu0  ;;  %8860 = vmatmul.mubr.msk.f32.gmra.mxu0 %vm3162_vm4, %v13103_v36  ;;  %v8584_v14 = vpop.f32.mrf.mxu1 }
 0x3cc   : > { %v4776_v15 = vadd.f32 %v8525_v59, %v11898_v7  ;;  %8862 = vmatprep.mubr.msk.f32.mxu0 %vm3162_vm4, %v6132_v63  ;;  %v12060_v9 = vadd.f32 %v4986_v51, %v4773_v17 }
 0x3cd   : > { %v4728_v49 = vpop.f32.mrf.mxu0  ;;  %v5006_v20 = vpop.f32.mrf.mxu1 }
 0x3ce   : > { %v4775_v16 = vadd.f32 %v4728_v49, %v11902_v27  ;;  %v12063_v31 = vadd.f32 %v8581_v33, %v4776_v15 }
 0x3cf   : > { %v8528_v47 = vpop.f32.mrf.mxu0  ;;  %8863 = vmatmul.mubr.msk.f32.gmra.mxu0 %vm3162_vm4, %v6134_v10  ;;  %v12066_v19 = vpop.f32.mrf.mxu1 }
 0x3d0   : > { %v4778_v1 = vadd.f32 %v8528_v47, %v11906_v44  ;;  %v12069_v7 = vadd.f32 %v4996_v43, %v4775_v16 }
 0x3d1   : > { %v4738_v28 = vpop.f32.mrf.mxu0  ;;  %v12071_v21 = vpop.f32.mrf.mxu1 }
 0x3d2   : > { %v4777_v29 = vadd.f32 %v4738_v28, %v11910_v35  ;;  %v12074_v18 = vadd.f32 %v8584_v14, %v4778_v1 }
 0x3d3   : > { %v8595_v48 = vpop.f32.mrf.mxu0  ;;  %v12076_v27 = vpop.f32.mrf.mxu1 }
 0x3d4   : > { %v12079_v39 = vadd.f32 %v8595_v48, %v11919_v32  ;;  %v12081_v23 = vadd.f32 %v5006_v20, %v4777_v29 }
 0x3d5   : > { %v5128_v51 = vpop.f32.mrf.mxu0  ;;  %v12083_v60 = vpop.f32.mrf.mxu1 }
 0x3d6   : > { %v12086_v44 = vadd.f32 %v5128_v51, %v11926_v4 }
 0x3d7   : > { %v8598_v57 = vpop.f32.mrf.mxu0  ;;  %v12088_v61 = vpop.f32.mrf.mxu1 }
 0x3d8   : > { %v12091_v35 = vadd.f32 %v8598_v57, %v11929_v45 }
 0x3d9   : > { %v5138_v42 = vpop.f32.mrf.mxu0  ;;  %v12093_v33 = vpop.f32.mrf.mxu1 }
 0x3da   : > { %v12096_v32 = vadd.f32 %v5138_v42, %v11936_v24 }
 0x3db   : > { %v8601_v58 = vpop.f32.mrf.mxu0  ;;  %v12098_v12 = vpop.f32.mrf.mxu1 }
 0x3dc   : > { %v12101_v55 = vadd.f32 %v8601_v58, %v11939_v37 }
 0x3dd   : > { %v5148_v4 = vpop.f32.mrf.mxu0  ;;  %v12103_v2 = vpop.f32.mrf.mxu1 }
 0x3de   : > { %v12106_v43 = vadd.f32 %v5148_v4, %v11946_v6 }
 0x3df   : > { %v8604_v45 = vpop.f32.mrf.mxu0  ;;  %v12108_v63 = vpop.f32.mrf.mxu1 }
 0x3e0   : > { %v12111_v17 = vadd.f32 %v8604_v45, %v11949_v53 }
 0x3e1   : > { %v5158_v24 = vpop.f32.mrf.mxu0  ;;  %v12113_v59 = vpop.f32.mrf.mxu1 }
 0x3e2   : > { %v12116_v36 = vadd.f32 %v5158_v24, %v11956_v22 }
 0x3e3   : > { %v8607_v37 = vpop.f32.mrf.mxu0  ;;  %v12118_v14 = vpop.f32.mrf.mxu1 }
 0x3e4   : > { %v12121_v15 = vadd.f32 %v8607_v37, %v11959_v62 }
 0x3e5   : > { %v5168_v6 = vpop.f32.mrf.mxu0  ;;  %v12123_v10 = vpop.f32.mrf.mxu1 }
 0x3e6   : > { %v12126_v49 = vadd.f32 %v5168_v6, %v11966_v54 }
 0x3e7   : > { %v8610_v53 = vpop.f32.mrf.mxu0  ;;  %v12128_v20 = vpop.f32.mrf.mxu1 }
 0x3e8   : > { %v12131_v16 = vadd.f32 %v8610_v53, %v11969_v52 }
 0x3e9   : > { %v5178_v22 = vpop.f32.mrf.mxu0  ;;  %v12133_v47 = vpop.f32.mrf.mxu1 }
 0x3ea   : > { %v12136_v1 = vadd.f32 %v5178_v22, %v11976_v13 }
 0x3eb   : > { %v8613_v62 = vpop.f32.mrf.mxu0  ;;  %v12138_v28 = vpop.f32.mrf.mxu1 }
 0x3ec   : > { %v12141_v29 = vadd.f32 %v8613_v62, %v11979_v38 }
 0x3ed   : > { %v5188_v54 = vpop.f32.mrf.mxu0  ;;  %v12143_v48 = vpop.f32.mrf.mxu1 }
 0x3ee   : > { %13104 = vst [vmem:[#allocation70_spill] sm:$0xff] %v12143_v48  ;;  %v12146_v51 = vadd.f32 %v5188_v54, %v11986_v40 }
 0x3ef   : > { %v8616_v52 = vpop.f32.mrf.mxu0  ;;  %v12148_v57 = vpop.f32.mrf.mxu1 }
 0x3f0   : > { %13105 = vst [vmem:[#allocation19_spill] sm:$0xff] %v12148_v57  ;;  %v12151_v42 = vadd.f32 %v8616_v52, %v11989_v46 }
 0x3f1   : > { %v5198_v13 = vpop.f32.mrf.mxu0  ;;  %v12153_v58 = vpop.f32.mrf.mxu1 }
 0x3f2   : > { %13106 = vst [vmem:[#allocation27_spill] sm:$0xff] %v12153_v58  ;;  %v12156_v4 = vadd.f32 %v5198_v13, %v11996_v3 }
 0x3f3   : > { %v8619_v38 = vpop.f32.mrf.mxu0  ;;  %v12158_v45 = vpop.f32.mrf.mxu1 }
 0x3f4   : > { %13107 = vst [vmem:[#allocation31_spill] sm:$0xff] %v12156_v4  ;;  %13108 = vst [vmem:[#allocation35_spill] sm:$0xff] %v12158_v45  ;;  %v12161_v24 = vadd.f32 %v8619_v38, %v11999_v11 }
 0x3f5   : > { %v5208_v40 = vpop.f32.mrf.mxu0  ;;  %v12163_v37 = vpop.f32.mrf.mxu1 }
 0x3f6   : > { %13109 = vst [vmem:[#allocation72_spill] sm:$0xff] %v12161_v24  ;;  %13110 = vst [vmem:[#allocation76_spill] sm:$0xff] %v12163_v37  ;;  %v12166_v6 = vadd.f32 %v5208_v40, %v12006_v5 }
 0x3f7   : > { %v8622_v46 = vpop.f32.mrf.mxu0  ;;  %v12168_v53 = vpop.f32.mrf.mxu1 }
 0x3f8   : > { %13111 = vst [vmem:[#allocation44_spill] sm:$0xff] %v12166_v6  ;;  %13112 = vst [vmem:[#allocation34_spill] sm:$0xff] %v12168_v53  ;;  %v12171_v22 = vadd.f32 %v8622_v46, %v12009_v8 }
 0x3f9   : > { %v5218_v3 = vpop.f32.mrf.mxu0  ;;  %v12173_v62 = vpop.f32.mrf.mxu1 }
 0x3fa   : > { %13113 = vst [vmem:[#allocation78_spill] sm:$0xff] %v12171_v22  ;;  %13114 = vst [vmem:[#allocation74_spill] sm:$0xff] %v12173_v62  ;;  %v12176_v54 = vadd.f32 %v5218_v3, %v12016_v26 }
 0x3fb   : > { %v8625_v11 = vpop.f32.mrf.mxu0  ;;  %v12178_v52 = vpop.f32.mrf.mxu1 }
 0x3fc   : > { %13115 = vst [vmem:[#allocation38_spill] sm:$0xff] %v12176_v54  ;;  %13116 = vst [vmem:[#allocation4_spill] sm:$0xff] %v12178_v52  ;;  %v12181_v13 = vadd.f32 %v8625_v11, %v12019_v34 }
 0x3fd   : > { %v5228_v5 = vpop.f32.mrf.mxu0  ;;  %v12183_v38 = vpop.f32.mrf.mxu1 }
 0x3fe   : > { %13117 = vst [vmem:[#allocation47_spill] sm:$0xff] %v12181_v13  ;;  %13118 = vst [vmem:[#allocation80_spill] sm:$0xff] %v12183_v38  ;;  %v12186_v40 = vadd.f32 %v5228_v5, %v12026_v41 }
 0x3ff   : > { %v8628_v8 = vpop.f32.mrf.mxu0  ;;  %v12188_v46 = vpop.f32.mrf.mxu1 }
 0x400   : > { %13119 = vst [vmem:[#allocation75_spill] sm:$0xff] %v12186_v40  ;;  %13120 = vst [vmem:[#allocation37_spill] sm:$0xff] %v12188_v46  ;;  %v12191_v62 = vadd.f32 %v8628_v8, %v12029_v25 }
 0x401   : > { %v5238_v26 = vpop.f32.mrf.mxu0  ;;  %v12193_v3 = vpop.f32.mrf.mxu1 }
 0x402   : > { %13121 = vst [vmem:[#allocation77_spill] sm:$0xff] %v12191_v62  ;;  %13122 = vst [vmem:[#allocation45_spill] sm:$0xff] %v12193_v3  ;;  %v12196_v52 = vadd.f32 %v5238_v26, %v12036_v50 }
 0x403   : > { %v8631_v34 = vpop.f32.mrf.mxu0  ;;  %v12198_v11 = vpop.f32.mrf.mxu1 }
 0x404   : > { %13123 = vst [vmem:[#allocation82_spill] sm:$0xff] %v12196_v52  ;;  %13124 = vst [vmem:[#allocation3_spill] sm:$0xff] %v12198_v11  ;;  %v12201_v38 = vadd.f32 %v8631_v34, %v12041_v0 }
 0x405   : > { %v5248_v41 = vpop.f32.mrf.mxu0  ;;  %v12203_v5 = vpop.f32.mrf.mxu1 }
 0x406   : > { %13125 = vst [vmem:[#allocation46_spill] sm:$0xff] %v12201_v38  ;;  %13126 = vst [vmem:[#allocation79_spill] sm:$0xff] %v12203_v5  ;;  %v12206_v46 = vadd.f32 %v5248_v41, %v12049_v56 }
 0x407   : > { %v8634_v25 = vpop.f32.mrf.mxu0  ;;  %v12208_v8 = vpop.f32.mrf.mxu1 }
 0x408   : > { %13127 = vst [vmem:[#allocation84_spill] sm:$0xff] %v12206_v46  ;;  %13128 = vst [vmem:[#allocation50_spill] sm:$0xff] %v12208_v8  ;;  %v12211_v3 = vadd.f32 %v8634_v25, %v12053_v30 }
 0x409   : > { %v5258_v50 = vpop.f32.mrf.mxu0  ;;  %v12213_v26 = vpop.f32.mrf.mxu1 }
 0x40a   : > { %13129 = vst [vmem:[#allocation48_spill] sm:$0xff] %v12211_v3  ;;  %13130 = vst [vmem:[#allocation81_spill] sm:$0xff] %v12213_v26  ;;  %v12216_v11 = vadd.f32 %v5258_v50, %v12060_v9 }
 0x40b   : > { %v8637_v0 = vpop.f32.mrf.mxu0  ;;  %v12218_v34 = vpop.f32.mrf.mxu1 }
 0x40c   : > { %13131 = vst [vmem:[#allocation83_spill] sm:$0xff] %v12216_v11  ;;  %13132 = vst [vmem:[#allocation49_spill] sm:$0xff] %v12218_v34  ;;  %v12221_v5 = vadd.f32 %v8637_v0, %v12063_v31 }
 0x40d   : > { %v5268_v56 = vpop.f32.mrf.mxu0  ;;  %v12226_v8 = vpop.f32.mrf.mxu1 }
 0x40e   : > { %13133 = vst [vmem:[#allocation85_spill] sm:$0xff] %v12221_v5  ;;  %v12224_v41 = vadd.f32 %v5268_v56, %v12069_v7  ;;  %13135 = vst [vmem:[#allocation86_spill] sm:$0xff] %v12226_v8 }
 0x40f   : > { %v8640_v30 = vpop.f32.mrf.mxu0  ;;  %v8763_v50 = vpop.f32.mrf.mxu1 }
 0x410   : > { %13134 = vst [vmem:[#allocation51_spill] sm:$0xff] %v12224_v41  ;;  %v12229_v25 = vadd.f32 %v8640_v30, %v12074_v18 }
 0x411   : > { %v5278_v26 = vpop.f32.mrf.mxu0  ;;  %v5939_v3 = vpop.f32.mrf.mxu1 }
 0x412   : > { %13136 = vst [vmem:[#allocation87_spill] sm:$0xff] %v12229_v25  ;;  %v12232_v9 = vadd.f32 %v5278_v26, %v12081_v23 }
 0x413   : > { %v8707_v11 = vpop.f32.mrf.mxu0  ;;  %v12234_v5 = vpop.f32.mrf.mxu1 }
 0x414   : > { %13137 = vst [vmem:[#allocation88_spill] sm:$0xff] %v12232_v9 }
 0x415   : > { %v5667_v34 = vpop.f32.mrf.mxu0  ;;  %v12238_v8 = vpop.f32.mrf.mxu1 }
 0x417   : > { %v8710_v31 = vpop.f32.mrf.mxu0  ;;  %v12244_v30 = vpop.f32.mrf.mxu1 }
 0x419   : > { %v5677_v0 = vpop.f32.mrf.mxu0  ;;  %v12250_v9 = vpop.f32.mrf.mxu1 }
 0x41b   : > { %v8713_v7 = vpop.f32.mrf.mxu0  ;;  %v12256_v38 = vpop.f32.mrf.mxu1 }
 0x41d   : > { %v12236_v56 = vpop.f32.mrf.mxu0  ;;  %v12262_v40 = vpop.f32.mrf.mxu1 }
 0x41f   : > { %v12240_v41 = vpop.f32.mrf.mxu0  ;;  %v12268_v37 = vpop.f32.mrf.mxu1 }
 0x421   : > { %v12242_v18 = vpop.f32.mrf.mxu0  ;;  %v12274_v22 = vpop.f32.mrf.mxu1 }
 0x423   : > { %v12246_v23 = vpop.f32.mrf.mxu0  ;;  %v12280_v57 = vpop.f32.mrf.mxu1 }
 0x425   : > { %v12248_v26 = vpop.f32.mrf.mxu0 }
 0x427   : > { %v12252_v25 = vpop.f32.mrf.mxu0 }
 0x429   : > { %v12254_v46 = vpop.f32.mrf.mxu0 }
 0x42b   : > { %v12258_v52 = vpop.f32.mrf.mxu0 }
 0x42d   : > { %v12260_v62 = vpop.f32.mrf.mxu0 }
 0x42e   : > { %13138 = vst [vmem:[#allocation5_spill] sm:$0xff] %v12260_v62 }
 0x42f   : > { %v12264_v53 = vpop.f32.mrf.mxu0 }
 0x430   : > { %13139 = vst [vmem:[#allocation6_spill] sm:$0xff] %v12264_v53  ;;  %v12286_v53 = vpop.f32.mrf.mxu1 }
 0x431   : > { %v12266_v13 = vpop.f32.mrf.mxu0  ;;  %13147 = vst [vmem:[#allocation57_spill] sm:$0xff] %v12286_v53 }
 0x432   : > { %13140 = vst [vmem:[#allocation55_spill] sm:$0xff] %v12266_v13 }
 0x433   : > { %v12270_v54 = vpop.f32.mrf.mxu0 }
 0x434   : > { %13141 = vst [vmem:[#allocation52_spill] sm:$0xff] %v12270_v54  ;;  %v12292_v54 = vpop.f32.mrf.mxu1 }
 0x435   : > { %v12272_v45 = vpop.f32.mrf.mxu0  ;;  %13150 = vst [vmem:[#allocation54_spill] sm:$0xff] %v12292_v54 }
 0x436   : > { %13142 = vst [vmem:[#allocation7_spill] sm:$0xff] %v12272_v45 }
 0x437   : > { %v12276_v58 = vpop.f32.mrf.mxu0 }
 0x438   : > { %13143 = vst [vmem:[#allocation40_spill] sm:$0xff] %v12276_v58  ;;  %v12298_v58 = vpop.f32.mrf.mxu1 }
 0x439   : > { %v12278_v6 = vpop.f32.mrf.mxu0  ;;  %13153 = vst [vmem:[#allocation39_spill] sm:$0xff] %v12298_v58 }
 0x43a   : > { %13144 = vst [vmem:[#allocation9_spill] sm:$0xff] %v12278_v6 }
 0x43b   : > { %v12282_v24 = vpop.f32.mrf.mxu0 }
 0x43c   : > { %13145 = vst [vmem:[#allocation42_spill] sm:$0xff] %v12282_v24 }
 0x43d   : > { %v12284_v48 = vpop.f32.mrf.mxu0 }
 0x43e   : > { %13146 = vst [vmem:[#allocation14_spill] sm:$0xff] %v12284_v48  ;;  %v12304_v48 = vpop.f32.mrf.mxu1 }
 0x43f   : > { %v12288_v13 = vpop.f32.mrf.mxu0  ;;  %13156 = vst [vmem:[#allocation61_spill] sm:$0xff] %v12304_v48 }
 0x440   : > { %13148 = vst [vmem:[#allocation53_spill] sm:$0xff] %v12288_v13 }
 0x441   : > { %v12290_v4 = vpop.f32.mrf.mxu0 }
 0x442   : > { %13149 = vst [vmem:[#allocation8_spill] sm:$0xff] %v12290_v4  ;;  %v5559_v4 = vadd.f32 %v12066_v19, %v12079_v39  ;;  %v5560_v19 = vadd.f32 %v12083_v60, %v12096_v32 }
 0x443   : > { %v12294_v45 = vpop.f32.mrf.mxu0 }
 0x444   : > { %13151 = vst [vmem:[#allocation10_spill] sm:$0xff] %v12294_v45  ;;  %v5827_v54 = vadd.f32 %v8707_v11, %v5559_v4  ;;  %v12314_v45 = vpop.f32.mrf.mxu1 }
 0x445   : > { %v12296_v62 = vpop.f32.mrf.mxu0 }
 0x446   : > { %13152 = vst [vmem:[#allocation59_spill] sm:$0xff] %v12296_v62  ;;  %v5558_v62 = vadd.f32 %v12071_v21, %v12086_v44  ;;  %v6099_v39 = vadd.f32 %v8763_v50, %v5827_v54  ;;  %v12325_v4 = vpop.f32.mrf.mxu1  ;;  %v12330_v21 = vld [vmem:[%s12561_s6] ss:$0 sm:$0xff]  ;;  %v5828_v44 = vadd.f32 %v5677_v0, %v5560_v19  ;;  %v5564_v0 = vadd.f32 %v12103_v2, %v12116_v36 }
 0x447   : > { %v12300_v6 = vpop.f32.mrf.mxu0 }
 0x448   : > { %13154 = vst [vmem:[#allocation41_spill] sm:$0xff] %v12300_v6  ;;  %v5826_v6 = vadd.f32 %v5667_v34, %v5558_v62 }
 0x449   : > { %v12302_v24 = vpop.f32.mrf.mxu0 }
 0x44a   : > { %13155 = vst [vmem:[#allocation12_spill] sm:$0xff] %v12302_v24  ;;  %v5561_v24 = vadd.f32 %v12076_v27, %v12091_v35  ;;  %v5563_v27 = vadd.f32 %v12088_v61, %v12101_v55  ;;  %v6098_v62 = vadd.f32 %v5939_v3, %v5826_v6  ;;  %v5565_v61 = vadd.f32 %v12098_v12, %v12111_v17  ;;  %v12345_v55 = vpop.f32.mrf.mxu1 }
 0x44b   : > { %v12306_v53 = vpop.f32.mrf.mxu0 }
 0x44c   : > { %13157 = vst [vmem:[#allocation21_spill] sm:$0xff] %v12306_v53  ;;  %v5829_v53 = vadd.f32 %v8710_v31, %v5561_v24  ;;  %v5562_v24 = vadd.f32 %v12093_v33, %v12106_v43  ;;  %v5831_v32 = vadd.f32 %v8713_v7, %v5563_v27  ;;  %v6100_v31 = vadd.f32 %v12238_v8, %v5828_v44  ;;  %v12361_v19 = vpop.f32.mrf.mxu1 }
 0x44d   : > { %v12310_v13 = vpop.f32.mrf.mxu0  ;;  %v5569_v27 = vadd.f32 %v12118_v14, %v12131_v16 }
 0x44e   : > { %v6101_v50 = vadd.f32 %v12234_v5, %v5829_v53  ;;  %v5830_v43 = vadd.f32 %v12236_v56, %v5562_v24  ;;  %v5833_v5 = vadd.f32 %v12240_v41, %v5565_v61  ;;  %v6103_v7 = vadd.f32 %v12244_v30, %v5831_v32 }
 0x44f   : > { %v12316_v58 = vpop.f32.mrf.mxu0  ;;  %v5567_v56 = vadd.f32 %v12108_v63, %v12121_v15  ;;  %v5568_v24 = vadd.f32 %v12123_v10, %v12136_v1  ;;  %v5571_v32 = vadd.f32 %v12128_v20, %v12141_v29 }
 0x450   : > { %v6102_v41 = vadd.f32 %v12250_v9, %v5830_v43 }
 0x451   : > { %v12320_v48 = vpop.f32.mrf.mxu0  ;;  %v5835_v44 = vadd.f32 %v12246_v23, %v5567_v56  ;;  %v5839_v61 = vadd.f32 %v12258_v52, %v5571_v32  ;;  %v13159_v52 = vld [vmem:[#allocation57_spill] sm:$0xff] }
 0x453   : > { %v8819_v11 = vpop.f32.mrf.mxu0 }
 0x454   : > { %v6370_v35 = vadd.f32 %v8819_v11, %v6099_v39  ;;  %v5832_v39 = vadd.f32 %v12242_v18, %v5564_v0  ;;  %v5566_v11 = vadd.f32 %v12113_v59, %v12126_v49  ;;  %v6105_v18 = vadd.f32 %v12256_v38, %v5833_v5  ;;  %v13160_v0 = vld [vmem:[#allocation31_spill] sm:$0xff] }
 0x455   : > { %v6210_v60 = vpop.f32.mrf.mxu0 }
 0x456   : > { %v6409_v54 = vadd.f32 %v12330_v21, %v6370_v35  ;;  %v6369_v34 = vadd.f32 %v6210_v60, %v6098_v62  ;;  %v12377_v35 = vpop.f32.mrf.mxu1  ;;  %v5834_v62 = vadd.f32 %v12248_v26, %v5566_v11  ;;  %v6104_v23 = vadd.f32 %v12262_v40, %v5832_v39  ;;  %v13165_v39 = vld [vmem:[#allocation19_spill] sm:$0xff] }
 0x457   : > { %v8822_v33 = vpop.f32.mrf.mxu0  ;;  %v5837_v60 = vadd.f32 %v12252_v25, %v5569_v27  ;;  %v6107_v26 = vadd.f32 %v12268_v37, %v5835_v44  ;;  %v13166_v11 = vld [vmem:[#allocation55_spill] sm:$0xff]  ;;  %v13168_v27 = vld [vmem:[#allocation44_spill] sm:$0xff] }
 0x458   : > { %6441 = vst.msk [vmem:[%s12339_s8 + $0x8] sm:$0xff] %vm465_vm2, %v6409_v54  ;;  %v6408_v6 = vadd.f32 %v12330_v21, %v6369_v34  ;;  %v6372_v3 = vadd.f32 %v8822_v33, %v6101_v50  ;;  %v12393_v54 = vpop.f32.mrf.mxu1  ;;  %v5836_v34 = vadd.f32 %v12254_v46, %v5568_v24  ;;  %v6106_v25 = vadd.f32 %v12274_v22, %v5834_v62 }
 0x459   : > { %v6220_v53 = vpop.f32.mrf.mxu0  ;;  %v5570_v50 = vadd.f32 %v12133_v47, %v12146_v51  ;;  %v6109_v46 = vadd.f32 %v12280_v57, %v5837_v60  ;;  %v5573_v33 = vadd.f32 %v12138_v28, %v12151_v42  ;;  %v13171_v60 = vld [vmem:[#allocation61_spill] sm:$0xff] }
 0x45a   : > { %6440 = vst.msk [vmem:[%s12339_s8] sm:$0xff] %vm465_vm2, %v6408_v6  ;;  %v6411_v12 = vadd.f32 %v12330_v21, %v6372_v3  ;;  %v6371_v17 = vadd.f32 %v6220_v53, %v6100_v31  ;;  %v12409_v43 = vpop.f32.mrf.mxu1  ;;  %v13158_v6 = vld [vmem:[#allocation5_spill] sm:$0xff]  ;;  %v6108_v31 = vadd.f32 %v13159_v52, %v5836_v34  ;;  %v13161_v53 = vld [vmem:[#allocation70_spill] sm:$0xff] }
 0x45b   : > { %v8825_v8 = vpop.f32.mrf.mxu0  ;;  %v5838_v3 = vadd.f32 %v13158_v6, %v5570_v50  ;;  %v5572_v5 = vadd.f32 %v13161_v53, %v13160_v0  ;;  %v13179_v52 = vld [vmem:[#allocation34_spill] sm:$0xff] }
 0x45c   : > { %6443 = vst.msk [vmem:[%s12339_s8 + $0x18] sm:$0xff] %vm465_vm2, %v6411_v12  ;;  %v6410_v2 = vadd.f32 %v12330_v21, %v6371_v17  ;;  %v6374_v36 = vadd.f32 %v8825_v8, %v6103_v7  ;;  %v13162_v12 = vld [vmem:[#allocation6_spill] sm:$0xff]  ;;  %v13164_v8 = vld [vmem:[#allocation72_spill] sm:$0xff] }
 0x45d   : > { %v6230_v30 = vpop.f32.mrf.mxu0  ;;  %v5841_v17 = vadd.f32 %v13162_v12, %v5573_v33  ;;  %v13163_v7 = vld [vmem:[#allocation54_spill] sm:$0xff]  ;;  %v13177_v33 = vld [vmem:[#allocation40_spill] sm:$0xff] }
 0x45e   : > { %6442 = vst.msk [vmem:[%s12339_s8 + $0x10] sm:$0xff] %vm465_vm2, %v6410_v2  ;;  %v6413_v63 = vadd.f32 %v12330_v21, %v6374_v36  ;;  %v6373_v15 = vadd.f32 %v6230_v30, %v6102_v41  ;;  %v6111_v56 = vadd.f32 %v13163_v7, %v5839_v61  ;;  %v5575_v2 = vadd.f32 %v13165_v39, %v13164_v8  ;;  %v12425_v36 = vpop.f32.mrf.mxu1  ;;  %v13175_v61 = vld [vmem:[#allocation38_spill] sm:$0xff] }
 0x45f   : > { %v8828_v9 = vpop.f32.mrf.mxu0  ;;  %v5840_v30 = vadd.f32 %v13166_v11, %v5572_v5  ;;  %v13184_v11 = vld [vmem:[#allocation77_spill] sm:$0xff] }
 0x460   : > { %6445 = vst.msk [vmem:[%s12339_s8 + $0x28] sm:$0xff] %vm465_vm2, %v6413_v63  ;;  %v6412_v59 = vadd.f32 %v12330_v21, %v6373_v15  ;;  %v6376_v49 = vadd.f32 %v8828_v9, %v6105_v18  ;;  %v13167_v15 = vld [vmem:[#allocation39_spill] sm:$0xff] }
 0x461   : > { %v6240_v38 = vpop.f32.mrf.mxu0  ;;  %v6110_v18 = vadd.f32 %v13167_v15, %v5838_v3  ;;  %v13169_v9 = vld [vmem:[#allocation27_spill] sm:$0xff] }
 0x462   : > { %6444 = vst.msk [vmem:[%s12339_s8 + $0x20] sm:$0xff] %vm465_vm2, %v6412_v59  ;;  %v6415_v14 = vadd.f32 %v12330_v21, %v6376_v49  ;;  %v6375_v16 = vadd.f32 %v6240_v38, %v6104_v23  ;;  %v5574_v62 = vadd.f32 %v13169_v9, %v13168_v27  ;;  %v13170_v49 = vld [vmem:[#allocation52_spill] sm:$0xff] }
 0x463   : > { %v8831_v40 = vpop.f32.mrf.mxu0  ;;  %v5843_v23 = vadd.f32 %v13170_v49, %v5575_v2  ;;  %v13188_v49 = vld [vmem:[#allocation80_spill] sm:$0xff] }
 0x464   : > { %6447 = vst.msk [vmem:[%s12339_s8 + $0x38] sm:$0xff] %vm465_vm2, %v6415_v14  ;;  %v6414_v10 = vadd.f32 %v12330_v21, %v6375_v16  ;;  %v6378_v1 = vadd.f32 %v8831_v40, %v6107_v26  ;;  %v6113_v14 = vadd.f32 %v13171_v60, %v5841_v17  ;;  %v13172_v16 = vld [vmem:[#allocation78_spill] sm:$0xff]  ;;  %v13173_v26 = vld [vmem:[#allocation35_spill] sm:$0xff]  ;;  %v12441_v40 = vpop.f32.mrf.mxu1 }
 0x465   : > { %v6250_v37 = vpop.f32.mrf.mxu0  ;;  %v5577_v32 = vadd.f32 %v13173_v26, %v13172_v16  ;;  %v13190_v26 = vld [vmem:[#allocation46_spill] sm:$0xff] }
 0x466   : > { %6446 = vst.msk [vmem:[%s12339_s8 + $0x30] sm:$0xff] %vm465_vm2, %v6414_v10  ;;  %v6417_v20 = vadd.f32 %v12330_v21, %v6378_v1  ;;  %v6377_v29 = vadd.f32 %v6250_v37, %v6106_v25  ;;  %v13174_v10 = vld [vmem:[#allocation7_spill] sm:$0xff]  ;;  %v6112_v37 = vadd.f32 %v12314_v45, %v5840_v30  ;;  %v8799_v0 = vpop.f32.mrf.mxu1  ;;  %v13180_v45 = vld [vmem:[#allocation9_spill] sm:$0xff]  ;;  %v13185_v30 = vld [vmem:[#allocation4_spill] sm:$0xff] }
 0x467   : > { %v8834_v22 = vpop.f32.mrf.mxu0  ;;  %v5842_v1 = vadd.f32 %v13174_v10, %v5574_v62 }
 0x468   : > { %6449 = vst.msk [vmem:[%s12339_s8 + $0x48] sm:$0xff] %vm465_vm2, %v6417_v20  ;;  %v6416_v47 = vadd.f32 %v12330_v21, %v6377_v29  ;;  %v6380_v51 = vadd.f32 %v8834_v22, %v6109_v46  ;;  %v13176_v20 = vld [vmem:[#allocation76_spill] sm:$0xff]  ;;  %v5845_v22 = vadd.f32 %v13177_v33, %v5577_v32  ;;  %v13191_v32 = vld [vmem:[#allocation37_spill] sm:$0xff] }
 0x469   : > { %v6260_v57 = vpop.f32.mrf.mxu0  ;;  %v5576_v29 = vadd.f32 %v13176_v20, %v13175_v61  ;;  %v6114_v17 = vadd.f32 %v12345_v55, %v5842_v1  ;;  %v13186_v55 = vld [vmem:[#allocation14_spill] sm:$0xff]  ;;  %v13193_v20 = vld [vmem:[#allocation84_spill] sm:$0xff] }
 0x46a   : > { %6448 = vst.msk [vmem:[%s12339_s8 + $0x40] sm:$0xff] %vm465_vm2, %v6416_v47  ;;  %v6419_v28 = vadd.f32 %v12330_v21, %v6380_v51  ;;  %v6379_v42 = vadd.f32 %v6260_v57, %v6108_v31  ;;  %v6115_v47 = vadd.f32 %v12325_v4, %v5843_v23  ;;  %v13178_v51 = vld [vmem:[#allocation47_spill] sm:$0xff]  ;;  %v13183_v4 = vld [vmem:[#allocation42_spill] sm:$0xff] }
 0x46b   : > { %v8837_v41 = vpop.f32.mrf.mxu0  ;;  %v5579_v31 = vadd.f32 %v13179_v52, %v13178_v51  ;;  %v5844_v5 = vadd.f32 %v13180_v45, %v5576_v29  ;;  %v13194_v29 = vld [vmem:[#allocation45_spill] sm:$0xff]  ;;  %v13196_v52 = vld [vmem:[#allocation48_spill] sm:$0xff] }
 0x46c   : > { %6451 = vst.msk [vmem:[%s12339_s8 + $0x58] sm:$0xff] %vm465_vm2, %v6419_v28  ;;  %v6418_v44 = vadd.f32 %v12330_v21, %v6379_v42  ;;  %v6382_v63 = vadd.f32 %v8837_v41, %v6111_v56  ;;  %v13181_v28 = vld [vmem:[#allocation75_spill] sm:$0xff]  ;;  %v13182_v42 = vld [vmem:[#allocation74_spill] sm:$0xff]  ;;  %v6117_v41 = vadd.f32 %v12361_v19, %v5845_v22  ;;  %v13189_v19 = vld [vmem:[#allocation53_spill] sm:$0xff] }
 0x46d   : > { %v6270_v59 = vpop.f32.mrf.mxu0  ;;  %v5578_v7 = vadd.f32 %v13182_v42, %v13181_v28  ;;  %v5847_v8 = vadd.f32 %v13183_v4, %v5579_v31  ;;  %v6116_v62 = vadd.f32 %v12377_v35, %v5844_v5  ;;  %v13192_v35 = vld [vmem:[#allocation8_spill] sm:$0xff]  ;;  %v13197_v31 = vld [vmem:[#allocation3_spill] sm:$0xff] }
 0x46e   : > { %6450 = vst.msk [vmem:[%s12339_s8 + $0x50] sm:$0xff] %vm465_vm2, %v6418_v44  ;;  %v6421_v24 = vadd.f32 %v12330_v21, %v6382_v63  ;;  %v6381_v38 = vadd.f32 %v6270_v59, %v6110_v18  ;;  %v5581_v44 = vadd.f32 %v13185_v30, %v13184_v11  ;;  %v6059_v63 = vpop.f32.mrf.mxu1  ;;  %v13187_v59 = vld [vmem:[#allocation82_spill] sm:$0xff]  ;;  %v13199_v28 = vld [vmem:[#allocation83_spill] sm:$0xff]  ;;  %v13202_v11 = vld [vmem:[#allocation85_spill] sm:$0xff] }
 0x46f   : > { %v8840_v34 = vpop.f32.mrf.mxu0  ;;  %v5846_v18 = vadd.f32 %v13186_v55, %v5578_v7  ;;  %v5580_v23 = vadd.f32 %v13188_v49, %v13187_v59  ;;  %v6119_v16 = vadd.f32 %v12393_v54, %v5847_v8  ;;  %v13195_v54 = vld [vmem:[#allocation10_spill] sm:$0xff]  ;;  %v13200_v42 = vld [vmem:[#allocation79_spill] sm:$0xff]  ;;  %v13204_v55 = vld [vmem:[#allocation12_spill] sm:$0xff] }
 0x470   : > { %6453 = vst.msk [vmem:[%s12339_s8 + $0x68] sm:$0xff] %vm465_vm2, %v6421_v24  ;;  %v6420_v25 = vadd.f32 %v12330_v21, %v6381_v38  ;;  %v6384_v50 = vadd.f32 %v8840_v34, %v6113_v14  ;;  %v5849_v38 = vadd.f32 %v13189_v19, %v5581_v44  ;;  %v5583_v34 = vadd.f32 %v13191_v32, %v13190_v26  ;;  %v8802_v10 = vpop.f32.mrf.mxu1  ;;  %v13203_v30 = vld [vmem:[#allocation50_spill] sm:$0xff]  ;;  %v13206_v59 = vld [vmem:[#allocation81_spill] sm:$0xff] }
 0x471   : > { %v6280_v46 = vpop.f32.mrf.mxu0  ;;  %v6118_v61 = vadd.f32 %v12409_v43, %v5846_v18  ;;  %v13198_v43 = vld [vmem:[#allocation59_spill] sm:$0xff]  ;;  %v5584_v7 = vadd.f32 %v13200_v42, %v13199_v28  ;;  %v5587_v44 = vadd.f32 %v13203_v30, %v13202_v11  ;;  %v13209_v26 = vld [vmem:[#allocation49_spill] sm:$0xff] }
 0x472   : > { %6452 = vst.msk [vmem:[%s12339_s8 + $0x60] sm:$0xff] %vm465_vm2, %v6420_v25  ;;  %v6423_v6 = vadd.f32 %v12330_v21, %v6384_v50  ;;  %v6383_v3 = vadd.f32 %v6280_v46, %v6112_v37  ;;  %v5848_v25 = vadd.f32 %v13192_v35, %v5580_v23  ;;  %v5582_v46 = vadd.f32 %v13194_v29, %v13193_v20  ;;  %v6069_v51 = vpop.f32.mrf.mxu1 }
 0x473   : > { %v8843_v53 = vpop.f32.mrf.mxu0  ;;  %v5851_v22 = vadd.f32 %v13195_v54, %v5583_v34 }
 0x474   : > { %6455 = vst.msk [vmem:[%s12339_s8 + $0x78] sm:$0xff] %vm465_vm2, %v6423_v6  ;;  %v6422_v57 = vadd.f32 %v12330_v21, %v6383_v3  ;;  %v6386_v12 = vadd.f32 %v8843_v53, %v6115_v47  ;;  %v6121_v47 = vadd.f32 %v12425_v36, %v5849_v38  ;;  %v5585_v53 = vadd.f32 %v13197_v31, %v13196_v52  ;;  %v13201_v36 = vld [vmem:[#allocation41_spill] sm:$0xff] }
 0x475   : > { %v6290_v56 = vpop.f32.mrf.mxu0  ;;  %v5850_v5 = vadd.f32 %v13198_v43, %v5582_v46 }
 0x476   : > { %6454 = vst.msk [vmem:[%s12339_s8 + $0x70] sm:$0xff] %vm465_vm2, %v6422_v57  ;;  %v6425_v39 = vadd.f32 %v12330_v21, %v6386_v12  ;;  %v6385_v2 = vadd.f32 %v6290_v56, %v6114_v17  ;;  %v6120_v17 = vadd.f32 %v12441_v40, %v5848_v25  ;;  %v5853_v4 = vadd.f32 %v13201_v36, %v5585_v53 }
 0x477   : > { %v8846_v15 = vpop.f32.mrf.mxu0  ;;  %v5852_v40 = vadd.f32 %v13204_v55, %v5584_v7 }
 0x478   : > { %6457 = vst.msk [vmem:[%s12339_s8 + $0x88] sm:$0xff] %vm465_vm2, %v6425_v39  ;;  %v6424_v27 = vadd.f32 %v12330_v21, %v6385_v2  ;;  %v6388_v9 = vadd.f32 %v8846_v15, %v6117_v41  ;;  %v6123_v2 = vadd.f32 %v8799_v0, %v5851_v22  ;;  %v8805_v41 = vpop.f32.mrf.mxu1 }
 0x479   : > { %v6300_v24 = vpop.f32.mrf.mxu0  ;;  %v6124_v25 = vadd.f32 %v6069_v51, %v5852_v40 }
 0x47a   : > { %6456 = vst.msk [vmem:[%s12339_s8 + $0x80] sm:$0xff] %vm465_vm2, %v6424_v27  ;;  %v6427_v60 = vadd.f32 %v12330_v21, %v6388_v9  ;;  %v6387_v14 = vadd.f32 %v6300_v24, %v6116_v62  ;;  %v6122_v9 = vadd.f32 %v6059_v63, %v5850_v5  ;;  %v13205_v62 = vld [vmem:[#allocation51_spill] sm:$0xff]  ;;  %v13207_v24 = vld [vmem:[#allocation21_spill] sm:$0xff] }
 0x47b   : > { %v8849_v1 = vpop.f32.mrf.mxu0  ;;  %v5586_v49 = vadd.f32 %v13206_v59, %v13205_v62  ;;  %v5855_v0 = vadd.f32 %v13207_v24, %v5587_v44 }
 0x47c   : > { %6459 = vst.msk [vmem:[%s12339_s8 + $0x98] sm:$0xff] %vm465_vm2, %v6427_v60  ;;  %v6426_v50 = vadd.f32 %v12330_v21, %v6387_v14  ;;  %v6390_v37 = vadd.f32 %v8849_v1, %v6119_v16  ;;  %v6125_v60 = vadd.f32 %v8802_v10, %v5853_v4  ;;  %v6079_v14 = vpop.f32.mrf.mxu1  ;;  %v13208_v16 = vld [vmem:[#allocation87_spill] sm:$0xff] }
 0x47d   : > { %v6310_v33 = vpop.f32.mrf.mxu0  ;;  %v5589_v32 = vadd.f32 %v13209_v26, %v13208_v16  ;;  %v5854_v63 = vadd.f32 %v12310_v13, %v5586_v49  ;;  %v6127_v13 = vadd.f32 %v8805_v41, %v5855_v0 }
 0x47e   : > { %6458 = vst.msk [vmem:[%s12339_s8 + $0x90] sm:$0xff] %vm465_vm2, %v6426_v50  ;;  %v6429_v6 = vadd.f32 %v12330_v21, %v6390_v37  ;;  %v6389_v3 = vadd.f32 %v6310_v33, %v6118_v61  ;;  %v13210_v50 = vld [vmem:[#allocation88_spill] sm:$0xff]  ;;  %v13211_v37 = vld [vmem:[#allocation86_spill] sm:$0xff]  ;;  %v8808_v20 = vpop.f32.mrf.mxu1 }
 0x47f   : > { %v8852_v45 = vpop.f32.mrf.mxu0  ;;  %v5588_v61 = vadd.f32 %v13211_v37, %v13210_v50  ;;  %v5857_v29 = vadd.f32 %v12316_v58, %v5589_v32 }
 0x480   : > { %6461 = vst.msk [vmem:[%s12339_s8 + $0xa8] sm:$0xff] %vm465_vm2, %v6429_v6  ;;  %v6428_v57 = vadd.f32 %v12330_v21, %v6389_v3  ;;  %v6392_v12 = vadd.f32 %v8852_v45, %v6121_v47  ;;  %v6126_v47 = vadd.f32 %v6079_v14, %v5854_v63  ;;  %v6089_v51 = vpop.f32.mrf.mxu1 }
 0x481   : > { %v6320_v56 = vpop.f32.mrf.mxu0  ;;  %v5856_v22 = vadd.f32 %v12320_v48, %v5588_v61  ;;  %v6129_v52 = vadd.f32 %v8808_v20, %v5857_v29 }
 0x482   : > { %6460 = vst.msk [vmem:[%s12339_s8 + $0xa0] sm:$0xff] %vm465_vm2, %v6428_v57  ;;  %v6431_v8 = vadd.f32 %v12330_v21, %v6392_v12  ;;  %v6391_v39 = vadd.f32 %v6320_v56, %v6120_v17 }
 0x483   : > { %v8855_v15 = vpop.f32.mrf.mxu0  ;;  %v6128_v43 = vadd.f32 %v6089_v51, %v5856_v22 }
 0x484   : > { %6463 = vst.msk [vmem:[%s12339_s8 + $0xb8] sm:$0xff] %vm465_vm2, %v6431_v8  ;;  %v6430_v18 = vadd.f32 %v12330_v21, %v6391_v39  ;;  %v6394_v27 = vadd.f32 %v8855_v15, %v6123_v2 }
 0x485   : > { %v6330_v23 = vpop.f32.mrf.mxu0 }
 0x486   : > { %6462 = vst.msk [vmem:[%s12339_s8 + $0xb0] sm:$0xff] %vm465_vm2, %v6430_v18  ;;  %v6433_v19 = vadd.f32 %v12330_v21, %v6394_v27  ;;  %v6393_v38 = vadd.f32 %v6330_v23, %v6122_v9 }
 0x487   : > { %v8858_v34 = vpop.f32.mrf.mxu0 }
 0x488   : > { %6465 = vst.msk [vmem:[%s12339_s8 + $0xc8] sm:$0xff] %vm465_vm2, %v6433_v19  ;;  %v6432_v1 = vadd.f32 %v12330_v21, %v6393_v38  ;;  %v6396_v35 = vadd.f32 %v8858_v34, %v6125_v60 }
 0x489   : > { %v6340_v10 = vpop.f32.mrf.mxu0 }
 0x48a   : > { %6464 = vst.msk [vmem:[%s12339_s8 + $0xc0] sm:$0xff] %vm465_vm2, %v6432_v1  ;;  %v6435_v46 = vadd.f32 %v12330_v21, %v6396_v35  ;;  %v6395_v33 = vadd.f32 %v6340_v10, %v6124_v25 }
 0x48b   : > { %v8861_v54 = vpop.f32.mrf.mxu0 }
 0x48c   : > { %6467 = vst.msk [vmem:[%s12339_s8 + $0xd8] sm:$0xff] %vm465_vm2, %v6435_v46  ;;  %v6434_v6 = vadd.f32 %v12330_v21, %v6395_v33  ;;  %v6398_v3 = vadd.f32 %v8861_v54, %v6127_v13 }
 0x48d   : > { %v6350_v58 = vpop.f32.mrf.mxu0 }
 0x48e   : > { %6466 = vst.msk [vmem:[%s12339_s8 + $0xd0] sm:$0xff] %vm465_vm2, %v6434_v6  ;;  %v6437_v31 = vadd.f32 %v12330_v21, %v6398_v3  ;;  %v6397_v53 = vadd.f32 %v6350_v58, %v6126_v47 }
 0x48f   : > { %v8864_v45 = vpop.f32.mrf.mxu0 }
 0x490   : > { %6469 = vst.msk [vmem:[%s12339_s8 + $0xe8] sm:$0xff] %vm465_vm2, %v6437_v31  ;;  %v6436_v48 = vadd.f32 %v12330_v21, %v6397_v53  ;;  %v6400_v5 = vadd.f32 %v8864_v45, %v6129_v52 }
 0x491   : > { %v6360_v57 = vpop.f32.mrf.mxu0 }
 0x492   : > { %6468 = vst.msk [vmem:[%s12339_s8 + $0xe0] sm:$0xff] %vm465_vm2, %v6436_v48  ;;  %v6439_v12 = vadd.f32 %v12330_v21, %v6400_v5  ;;  %v6399_v17 = vadd.f32 %v6360_v57, %v6128_v43 }
 0x494   : > { %6471 = vst.msk [vmem:[%s12339_s8 + $0xf8] sm:$0xff] %vm465_vm2, %v6439_v12  ;;  %v6438_v28 = vadd.f32 %v12330_v21, %v6399_v17 }
 0x496   : > { %6470 = vst.msk [vmem:[%s12339_s8 + $0xf0] sm:$0xff] %vm465_vm2, %v6438_v28 }
 0x497 PF: > { %s17_s24 = sadd.s32 1, %s8890_s24  }
 0x498   : > { %p14_p4 = scmp.ge.s32.totalorder %s17_s24, 4  }
 0x49a   :  { %16 = sbr.rel (!%p14_p4) target bundleno = 1 (0x1), region = 95 }

</bundles_post_ra>
